<compile_context>
chip_gen: v5e
topology: v5e:2x2
jax: 0.10.0
libtpu: 0.0.40
codegen_flags: <defaults>
</compile_context>

<pallas_src>
import functools

import jax
import jax.numpy as jnp
import numpy as np
from jax.experimental import pallas as pl
from jax.experimental.pallas import tpu as pltpu


# ----------------------------------------------------------------------------
# small math helpers (trace inside the kernel: exp/log/max/abs + EUP logistic)
# ----------------------------------------------------------------------------
def _softplus(v):
  return jnp.maximum(v, 0.0) + jnp.log(1.0 + jnp.exp(-jnp.abs(v)))


def _silu(v):
  return v * jax.nn.sigmoid(v)


# ----------------------------------------------------------------------------
# Host-precomputed block-diagonal operators (static: depend only on tile_b/L)
# ----------------------------------------------------------------------------
def _suffix_matrix(tile_b, seq_len):
  """SU[r, c] = 1 iff same sequence and pos(c) > pos(r)  ->  SU @ delta gives
  the exclusive suffix sum S_t = sum_{s>t} delta_s for every sequence."""
  r = np.arange(tile_b * seq_len)
  same = (r[:, None] // seq_len) == (r[None, :] // seq_len)
  upper = (r[None, :] % seq_len) > (r[:, None] % seq_len)
  return jnp.asarray((same & upper).astype(np.float32))


def _shift_stack(tile_b, seq_len, d_conv):
  """Vertical stack of lag-j shift operators (j = 1..d_conv-1):
  (S_j @ u)[r] = u[r-j] if r-j is in the same sequence, else 0 (causal pad)."""
  rows = tile_b * seq_len
  r = np.arange(rows)
  same = (r[:, None] // seq_len) == (r[None, :] // seq_len)
  mats = [(same & (r[:, None] - r[None, :] == j)).astype(np.float32)
          for j in range(1, d_conv)]
  return jnp.asarray(np.concatenate(mats, axis=0))


def _choose_tile_b(bsz, max_tile=8):
  """Largest divisor of bsz <= max_tile that keeps >= 2 grid steps (so both
  v7x TensorCores get work); bsz == 1 degenerates to a single step."""
  best = 1
  for t in range(1, min(bsz, max_tile) + 1):
    if bsz % t == 0 and (bsz // t >= 2 or bsz == 1):
      best = t
  return best


# ----------------------------------------------------------------------------
# Fused SimpleMamba kernel (tile_b batch elements per grid step)
# ----------------------------------------------------------------------------
def _simple_mamba_kernel(x_ref, w_in_ref, conv_w_ref, conv_b_ref, w_dbc_ref,
                         b_dt_ref, a_t_ref, d_ref, w_head_ref, b_lin_ref,
                         su_ref, shift_ref, o_ref, *,
                         tile_b, seq_len, d_inner, d_state, d_conv):
  f32 = jnp.float32
  L = seq_len
  R = tile_b * L

  x2 = x_ref[...].astype(f32)                                   # (R, d_model)

  # ---- in_proj: one (R, d_model) @ (d_model, 2*d_inner) MXU matmul ---------
  xz = jnp.dot(x2, w_in_ref[...], preferred_element_type=f32)   # (R, 2*d_inner)
  u0 = xz[:, :d_inner]                                          # conv branch
  res = xz[:, d_inner:]                                         # gate branch

  # ---- depthwise causal Conv1d + bias + SiLU, no VMEM pad scratch ----------
  # Lag-j shifted copies (zero-filled at sequence starts) come from one matmul
  # with the host-precomputed block-diagonal shift operators; taps are VPU FMAs.
  acc = u0 * conv_w_ref[d_conv - 1:d_conv, :] + conv_b_ref[...]
  if d_conv > 1:
    shifted_all = jnp.dot(shift_ref[...], u0,
                          preferred_element_type=f32)           # ((K-1)*R, di)
    for j in range(1, d_conv):                                  # small, static
      acc = acc + (shifted_all[(j - 1) * R:j * R, :] *
                   conv_w_ref[d_conv - 1 - j:d_conv - j, :])
  u = _silu(acc)                                                # (R, d_inner)

  # ---- fused x_proj (+ dt_proj folded in) -> [delta_pre | B | C] -----------
  dbc = jnp.dot(u, w_dbc_ref[...], preferred_element_type=f32)  # (R, di+2*ds)
  delta = _softplus(dbc[:, :d_inner] + b_dt_ref[...])           # (R, d_inner)
  b_mat = dbc[:, d_inner:d_inner + d_state]                     # (R, d_state)
  c_mat = dbc[:, d_inner + d_state:]                            # (R, d_state)
  du = delta * u

  # ---- selective scan, de-serialized ---------------------------------------
  # h_L = sum_t exp(A * S_t) * (B_t (x) du_t),  S_t = sum_{s>t} delta_s.
  # One matmul for the suffix sums, then batched exp/mul and two reductions.
  # Exact algebra; numerically safe because A < 0 and delta >= 0.
  s_suf = jnp.dot(su_ref[...], delta, preferred_element_type=f32)  # (R, di)
  a_t = a_t_ref[...]                                            # (d_state, di)

  # TODO(synk): for long seq_len, tile the time axis of the suffix-sum
  # operator (chunked scan with a carried state) instead of one (R, R) block.
  y_rows, res_rows = [], []
  for b in range(tile_b):                                       # static unroll
    lo, hi = b * L, (b + 1) * L
    e = jnp.exp(s_suf[lo:hi, None, :] * a_t[None, :, :])        # (L, ds, di)
    w_tc = b_mat[lo:hi, :] * c_mat[hi - 1:hi, :]                # (L, d_state)
    g = jnp.sum(e * w_tc[:, :, None], axis=1)                   # (L, d_inner)
    y_b = jnp.sum(g * du[lo:hi, :], axis=0, keepdims=True)      # (1, d_inner)
    y_b = y_b + d_ref[...] * u[hi - 1:hi, :]                    # + D * u_last
    y_rows.append(y_b)
    res_rows.append(res[hi - 1:hi, :])                          # gate @ last t
  y_last = jnp.concatenate(y_rows, axis=0)                      # (tile_b, di)
  res_last = jnp.concatenate(res_rows, axis=0)                  # (tile_b, di)

  # ---- gate + fused (out_proj @ Linear(12,1)) head --------------------------
  y_last = y_last * _silu(res_last)
  pred = jnp.dot(y_last, w_head_ref[...],
                 preferred_element_type=f32) + b_lin_ref[...]   # (tile_b, 1)
  o_ref[0] = pred.astype(o_ref.dtype)


# ----------------------------------------------------------------------------
# pallas_call wrapper (does the exact host-side algebraic fusions)
# ----------------------------------------------------------------------------
def simple_mamba_forward(x, params, *, d_state, d_conv, d_inner, dt_rank):
  bsz, seq_len, d_model = x.shape
  tile_b = _choose_tile_b(bsz)
  num_steps = bsz // tile_b
  rows = tile_b * seq_len

  # Exact algebraic fusions (done once, at full f32 precision):
  #   dt_proj folded into x_proj, out_proj folded into the Linear(12,1) head.
  with jax.default_matmul_precision("highest"):
    w_delta = params["w_xp"][:, :dt_rank] @ params["w_dt"]      # (di, di)
    w_dbc = jnp.concatenate([w_delta, params["w_xp"][:, dt_rank:]], axis=1)
    w_head = params["w_out"] @ params["w_lin"]                  # (di, 1)

  su_mat = _suffix_matrix(tile_b, seq_len)                      # (rows, rows)
  if d_conv > 1:
    shift_mat = _shift_stack(tile_b, seq_len, d_conv)           # ((K-1)*rows, rows)
  else:
    shift_mat = jnp.zeros((rows, rows), jnp.float32)            # unused dummy

  x2d = x.reshape(bsz * seq_len, d_model)                       # free reshape

  weights = [params["w_in"], params["conv_w"], params["conv_b"], w_dbc,
             params["b_dt"], params["a_t"], params["d_vec"], w_head,
             params["b_lin"], su_mat, shift_mat]

  def full_spec(arr):
    nd = arr.ndim
    return pl.BlockSpec(arr.shape, lambda i, _nd=nd: (0,) * _nd)

  kernel = functools.partial(_simple_mamba_kernel, tile_b=tile_b,
                             seq_len=seq_len, d_inner=d_inner,
                             d_state=d_state, d_conv=d_conv)

  pred = pl.pallas_call(
      kernel,
      out_shape=jax.ShapeDtypeStruct((num_steps, tile_b, 1), jnp.float32),
      grid=(num_steps,),
      in_specs=[pl.BlockSpec((rows, d_model), lambda i: (i, 0))]
               + [full_spec(w) for w in weights],
      out_specs=pl.BlockSpec((1, tile_b, 1), lambda i: (i, 0, 0)),
      compiler_params=pltpu.CompilerParams(dimension_semantics=("parallel",)),
  )(x2d, *weights)
  return pred.reshape(bsz, 1)


# ----------------------------------------------------------------------------
# Deterministic parameter construction (PyTorch layouts -> kernel layouts)
# ----------------------------------------------------------------------------
def init_simple_mamba_params(key, d_model, d_state, d_conv, d_inner, dt_rank):
  ks = jax.random.split(key, 9)
  s = 0.2
  w_in_pt = s * jax.random.normal(ks[0], (2 * d_inner, d_model), jnp.float32)
  conv_w_pt = s * jax.random.normal(ks[1], (d_inner, 1, d_conv), jnp.float32)
  conv_b = s * jax.random.normal(ks[2], (d_inner,), jnp.float32)
  w_xp_pt = s * jax.random.normal(ks[3], (dt_rank + 2 * d_state, d_inner),
                                  jnp.float32)
  w_dt_pt = s * jax.random.normal(ks[4], (d_inner, dt_rank), jnp.float32)
  b_dt = s * jax.random.normal(ks[5], (d_inner,), jnp.float32)
  a_log = jnp.log(jnp.broadcast_to(
      jnp.arange(1, d_state + 1, dtype=jnp.float32), (d_inner, d_state)))
  d_vec = jnp.ones((d_inner,), jnp.float32)
  w_out_pt = s * jax.random.normal(ks[6], (d_model, d_inner), jnp.float32)
  w_lin_pt = s * jax.random.normal(ks[7], (1, d_model), jnp.float32)
  b_lin = s * jax.random.normal(ks[8], (1,), jnp.float32)

  a = -jnp.exp(a_log)                                   # (d_inner, d_state)
  return {
      "w_in": jnp.transpose(w_in_pt),                   # (d_model, 2*d_inner)
      "conv_w": jnp.transpose(conv_w_pt[:, 0, :]),      # (d_conv, d_inner)
      "conv_b": conv_b.reshape(1, -1),
      "w_xp": jnp.transpose(w_xp_pt),                   # (d_inner, dt_rank+2ds)
      "w_dt": jnp.transpose(w_dt_pt),                   # (dt_rank, d_inner)
      "b_dt": b_dt.reshape(1, -1),
      "a_t": jnp.transpose(a),                          # (d_state, d_inner)
      "d_vec": d_vec.reshape(1, -1),
      "w_out": jnp.transpose(w_out_pt),                 # (d_inner, d_model)
      "w_lin": jnp.transpose(w_lin_pt),                 # (d_model, 1)
      "b_lin": b_lin.reshape(1, 1),
  }


# ----------------------------------------------------------------------------
# Pure-JAX reference (mirrors the PyTorch graph, sequential scan, unfused
# weights) for the correctness check
# ----------------------------------------------------------------------------
def simple_mamba_reference(x, params, *, d_state, d_conv, d_inner, dt_rank):
  bsz, seq_len, _ = x.shape
  with jax.default_matmul_precision("highest"):
    xz = x @ params["w_in"]
    u0 = xz[..., :d_inner]
    res = xz[..., d_inner:]
    u0p = jnp.pad(u0, ((0, 0), (d_conv - 1, 0), (0, 0)))
    acc = jnp.zeros_like(u0) + params["conv_b"][0]
    for k in range(d_conv):
      acc = acc + u0p[:, k:k + seq_len, :] * params["conv_w"][k][None, None, :]
    u = acc * jax.nn.sigmoid(acc)
    dbc = u @ params["w_xp"]
    dt_low = dbc[..., :dt_rank]
    b_mat = dbc[..., dt_rank:dt_rank + d_state]
    c_mat = dbc[..., dt_rank + d_state:]
    delta = _softplus(dt_low @ params["w_dt"] + params["b_dt"][0])
    a = jnp.transpose(params["a_t"])                    # (d_inner, d_state)
    h = jnp.zeros((bsz, d_inner, d_state), jnp.float32)
    ys = []
    for t in range(seq_len):
      da = jnp.exp(delta[:, t, :, None] * a[None])
      dbu = (delta[:, t, :, None] * u[:, t, :, None]) * b_mat[:, t, None, :]
      h = da * h + dbu
      ys.append(jnp.einsum("bds,bs->bd", h, c_mat[:, t, :]))
    y = jnp.stack(ys, axis=1) + u * params["d_vec"][0]
    y = y * (res * jax.nn.sigmoid(res))
    out = y @ params["w_out"]                           # (b, L, d_model)
    pred = out[:, -1, :] @ params["w_lin"] + params["b_lin"][0]
  return pred                                           # (b, 1)


# ----------------------------------------------------------------------------
if __name__ == "__main__":
  batch, seq_len = 8, 16
  d_model, d_state, d_conv, expand, dt_rank = 12, 16, 4, 2, 4
  d_inner = expand * d_model                            # 24

  key = jax.random.PRNGKey(0)
  kx, kp = jax.random.split(key)
  x = jax.random.normal(kx, (batch, seq_len, d_model), jnp.float32)
  params = init_simple_mamba_params(kp, d_model, d_state, d_conv, d_inner,
                                    dt_rank)

  pred = simple_mamba_forward(x, params, d_state=d_state, d_conv=d_conv,
                              d_inner=d_inner, dt_rank=dt_rank)
  pred = jax.block_until_ready(pred)

  ref = jax.block_until_ready(
      simple_mamba_reference(x, params, d_state=d_state, d_conv=d_conv,
                             d_inner=d_inner, dt_rank=dt_rank))

  assert pred.shape == (batch, 1)
  # Tolerance covers the exact-but-reordered algebra (fused projections,
  # suffix-sum scan) plus any MXU multi-pass precision differences between
  # the XLA-compiled reference matmuls and the in-kernel matmuls; real bugs
  # produce O(0.1-1) errors and are still caught.
  np.testing.assert_allclose(np.asarray(pred), np.asarray(ref),
                             rtol=2e-2, atol=2e-3)
  print("KERNEL_OK")
</pallas_src>

<mosaic_0001>
module attributes {stable_mosaic.version = 11 : i64} {
  func.func @_simple_mamba_kernel(%arg0: i32, %arg1: memref<64x12xf32, #tpu.memory_space<vmem>>, %arg2: memref<12x48xf32, #tpu.memory_space<vmem>>, %arg3: memref<4x24xf32, #tpu.memory_space<vmem>>, %arg4: memref<1x24xf32, #tpu.memory_space<vmem>>, %arg5: memref<24x56xf32, #tpu.memory_space<vmem>>, %arg6: memref<1x24xf32, #tpu.memory_space<vmem>>, %arg7: memref<16x24xf32, #tpu.memory_space<vmem>>, %arg8: memref<1x24xf32, #tpu.memory_space<vmem>>, %arg9: memref<24x1xf32, #tpu.memory_space<vmem>>, %arg10: memref<1x1xf32, #tpu.memory_space<vmem>>, %arg11: memref<64x64xf32, #tpu.memory_space<vmem>>, %arg12: memref<192x64xf32, #tpu.memory_space<vmem>>, %arg13: memref<1x4x1xf32, #tpu.memory_space<vmem>>) attributes {dimension_semantics = [#tpu.dimension_semantics<parallel>], iteration_bounds = array<i64: 2>, scalar_prefetch = 0 : i64, scratch_operands = 0 : i64, tpu.core_type = #tpu.core_type<tc>, window_params = [{transform_indices = @transform_0, window_bounds = array<i64: 64, 12>}, {pipeline_mode = #tpu.pipeline_mode<synchronous>, transform_indices = @transform_1, window_bounds = array<i64: 12, 48>}, {pipeline_mode = #tpu.pipeline_mode<synchronous>, transform_indices = @transform_2, window_bounds = array<i64: 4, 24>}, {pipeline_mode = #tpu.pipeline_mode<synchronous>, transform_indices = @transform_3, window_bounds = array<i64: 1, 24>}, {pipeline_mode = #tpu.pipeline_mode<synchronous>, transform_indices = @transform_4, window_bounds = array<i64: 24, 56>}, {pipeline_mode = #tpu.pipeline_mode<synchronous>, transform_indices = @transform_5, window_bounds = array<i64: 1, 24>}, {pipeline_mode = #tpu.pipeline_mode<synchronous>, transform_indices = @transform_6, window_bounds = array<i64: 16, 24>}, {pipeline_mode = #tpu.pipeline_mode<synchronous>, transform_indices = @transform_7, window_bounds = array<i64: 1, 24>}, {pipeline_mode = #tpu.pipeline_mode<synchronous>, transform_indices = @transform_8, window_bounds = array<i64: 24, 1>}, {pipeline_mode = #tpu.pipeline_mode<synchronous>, transform_indices = @transform_9, window_bounds = array<i64: 1, 1>}, {pipeline_mode = #tpu.pipeline_mode<synchronous>, transform_indices = @transform_10, window_bounds = array<i64: 64, 64>}, {pipeline_mode = #tpu.pipeline_mode<synchronous>, transform_indices = @transform_11, window_bounds = array<i64: 192, 64>}, {transform_indices = @transform_12, window_bounds = array<i64: 1, 4, 1>}]} {
    %c0 = arith.constant 0 : index
    %c0_0 = arith.constant 0 : index
    %0 = vector.load %arg1[%c0, %c0_0] : memref<64x12xf32, #tpu.memory_space<vmem>>, vector<64x12xf32>
    %c0_1 = arith.constant 0 : index
    %c0_2 = arith.constant 0 : index
    %1 = vector.load %arg2[%c0_1, %c0_2] : memref<12x48xf32, #tpu.memory_space<vmem>>, vector<12x48xf32>
    %cst = arith.constant dense<0.000000e+00> : vector<64x48xf32>
    %2 = tpu.matmul %0, %1, %cst {dimension_numbers = #tpu.dot_dimension_numbers<[1], [0], [0], [1], [0, 0, 1, 1], [], []>} : vector<64x12xf32>, vector<12x48xf32>, vector<64x48xf32> -> vector<64x48xf32>
    %3 = vector.extract_strided_slice %2 {offsets = [0, 0], sizes = [64, 24], strides = [1, 1]} : vector<64x48xf32> to vector<64x24xf32>
    %4 = vector.extract_strided_slice %2 {offsets = [0, 24], sizes = [64, 24], strides = [1, 1]} : vector<64x48xf32> to vector<64x24xf32>
    %c3 = arith.constant 3 : index
    %c0_3 = arith.constant 0 : index
    %5 = vector.load %arg3[%c3, %c0_3] : memref<4x24xf32, #tpu.memory_space<vmem>>, vector<1x24xf32>
    %6 = vector.broadcast %5 : vector<1x24xf32> to vector<64x24xf32>
    %7 = arith.mulf %3, %6 : vector<64x24xf32>
    %c0_4 = arith.constant 0 : index
    %c0_5 = arith.constant 0 : index
    %8 = vector.load %arg4[%c0_4, %c0_5] : memref<1x24xf32, #tpu.memory_space<vmem>>, vector<1x24xf32>
    %9 = vector.broadcast %8 : vector<1x24xf32> to vector<64x24xf32>
    %10 = arith.addf %7, %9 : vector<64x24xf32>
    %c0_6 = arith.constant 0 : index
    %c0_7 = arith.constant 0 : index
    %11 = vector.load %arg12[%c0_6, %c0_7] : memref<192x64xf32, #tpu.memory_space<vmem>>, vector<192x64xf32>
    %cst_8 = arith.constant dense<0.000000e+00> : vector<192x24xf32>
    %12 = tpu.matmul %11, %3, %cst_8 {dimension_numbers = #tpu.dot_dimension_numbers<[1], [0], [0], [1], [0, 0, 1, 1], [], []>} : vector<192x64xf32>, vector<64x24xf32>, vector<192x24xf32> -> vector<192x24xf32>
    %13 = vector.extract_strided_slice %12 {offsets = [0, 0], sizes = [64, 24], strides = [1, 1]} : vector<192x24xf32> to vector<64x24xf32>
    %c2 = arith.constant 2 : index
    %c0_9 = arith.constant 0 : index
    %14 = vector.load %arg3[%c2, %c0_9] : memref<4x24xf32, #tpu.memory_space<vmem>>, vector<1x24xf32>
    %15 = vector.broadcast %14 : vector<1x24xf32> to vector<64x24xf32>
    %16 = arith.mulf %13, %15 : vector<64x24xf32>
    %17 = arith.addf %10, %16 : vector<64x24xf32>
    %18 = vector.extract_strided_slice %12 {offsets = [64, 0], sizes = [64, 24], strides = [1, 1]} : vector<192x24xf32> to vector<64x24xf32>
    %c1 = arith.constant 1 : index
    %c0_10 = arith.constant 0 : index
    %19 = vector.load %arg3[%c1, %c0_10] : memref<4x24xf32, #tpu.memory_space<vmem>>, vector<1x24xf32>
    %20 = vector.broadcast %19 : vector<1x24xf32> to vector<64x24xf32>
    %21 = arith.mulf %18, %20 : vector<64x24xf32>
    %22 = arith.addf %17, %21 : vector<64x24xf32>
    %23 = vector.extract_strided_slice %12 {offsets = [128, 0], sizes = [64, 24], strides = [1, 1]} : vector<192x24xf32> to vector<64x24xf32>
    %c0_11 = arith.constant 0 : index
    %c0_12 = arith.constant 0 : index
    %24 = vector.load %arg3[%c0_11, %c0_12] : memref<4x24xf32, #tpu.memory_space<vmem>>, vector<1x24xf32>
    %25 = vector.broadcast %24 : vector<1x24xf32> to vector<64x24xf32>
    %26 = arith.mulf %23, %25 : vector<64x24xf32>
    %27 = arith.addf %22, %26 : vector<64x24xf32>
    %28 = arith.negf %27 : vector<64x24xf32>
    %29 = math.exp %28 : vector<64x24xf32>
    %cst_13 = arith.constant 1.000000e+00 : f32
    %30 = vector.broadcast %cst_13 : f32 to vector<64x24xf32>
    %31 = arith.addf %30, %29 : vector<64x24xf32>
    %32 = arith.divf %30, %31 : vector<64x24xf32>
    %33 = arith.mulf %27, %32 : vector<64x24xf32>
    %c0_14 = arith.constant 0 : index
    %c0_15 = arith.constant 0 : index
    %34 = vector.load %arg5[%c0_14, %c0_15] : memref<24x56xf32, #tpu.memory_space<vmem>>, vector<24x56xf32>
    %cst_16 = arith.constant dense<0.000000e+00> : vector<64x56xf32>
    %35 = tpu.matmul %33, %34, %cst_16 {dimension_numbers = #tpu.dot_dimension_numbers<[1], [0], [0], [1], [0, 0, 1, 1], [], []>} : vector<64x24xf32>, vector<24x56xf32>, vector<64x56xf32> -> vector<64x56xf32>
    %36 = vector.extract_strided_slice %35 {offsets = [0, 0], sizes = [64, 24], strides = [1, 1]} : vector<64x56xf32> to vector<64x24xf32>
    %c0_17 = arith.constant 0 : index
    %c0_18 = arith.constant 0 : index
    %37 = vector.load %arg6[%c0_17, %c0_18] : memref<1x24xf32, #tpu.memory_space<vmem>>, vector<1x24xf32>
    %38 = vector.broadcast %37 : vector<1x24xf32> to vector<64x24xf32>
    %39 = arith.addf %36, %38 : vector<64x24xf32>
    %cst_19 = arith.constant 0.000000e+00 : f32
    %40 = vector.broadcast %cst_19 : f32 to vector<64x24xf32>
    %41 = arith.maximumf %39, %40 : vector<64x24xf32>
    %42 = math.absf %39 : vector<64x24xf32>
    %cst_20 = arith.constant 0.000000e+00 : f32
    %43 = vector.broadcast %cst_20 : f32 to vector<64x24xf32>
    %44 = arith.subf %43, %42 : vector<64x24xf32>
    %45 = math.exp %44 : vector<64x24xf32>
    %cst_21 = arith.constant 1.000000e+00 : f32
    %46 = vector.broadcast %cst_21 : f32 to vector<64x24xf32>
    %47 = arith.addf %46, %45 : vector<64x24xf32>
    %48 = math.log %47 : vector<64x24xf32>
    %49 = arith.addf %41, %48 : vector<64x24xf32>
    %50 = vector.extract_strided_slice %35 {offsets = [0, 24], sizes = [64, 16], strides = [1, 1]} : vector<64x56xf32> to vector<64x16xf32>
    %51 = vector.extract_strided_slice %35 {offsets = [0, 40], sizes = [64, 16], strides = [1, 1]} : vector<64x56xf32> to vector<64x16xf32>
    %52 = arith.mulf %49, %33 : vector<64x24xf32>
    %c0_22 = arith.constant 0 : index
    %c0_23 = arith.constant 0 : index
    %53 = vector.load %arg11[%c0_22, %c0_23] : memref<64x64xf32, #tpu.memory_space<vmem>>, vector<64x64xf32>
    %cst_24 = arith.constant dense<0.000000e+00> : vector<64x24xf32>
    %54 = tpu.matmul %53, %49, %cst_24 {dimension_numbers = #tpu.dot_dimension_numbers<[1], [0], [0], [1], [0, 0, 1, 1], [], []>} : vector<64x64xf32>, vector<64x24xf32>, vector<64x24xf32> -> vector<64x24xf32>
    %c0_25 = arith.constant 0 : index
    %c0_26 = arith.constant 0 : index
    %55 = vector.load %arg7[%c0_25, %c0_26] : memref<16x24xf32, #tpu.memory_space<vmem>>, vector<16x24xf32>
    %56 = vector.extract_strided_slice %54 {offsets = [0, 0], sizes = [16, 24], strides = [1, 1]} : vector<64x24xf32> to vector<16x24xf32>
    %57 = vector.shape_cast %56 : vector<16x24xf32> to vector<16x1x24xf32>
    %58 = vector.shape_cast %55 : vector<16x24xf32> to vector<1x16x24xf32>
    %59 = vector.broadcast %57 : vector<16x1x24xf32> to vector<16x16x24xf32>
    %60 = vector.broadcast %58 : vector<1x16x24xf32> to vector<16x16x24xf32>
    %61 = arith.mulf %59, %60 : vector<16x16x24xf32>
    %62 = math.exp %61 : vector<16x16x24xf32>
    %63 = vector.extract_strided_slice %50 {offsets = [0, 0], sizes = [16, 16], strides = [1, 1]} : vector<64x16xf32> to vector<16x16xf32>
    %64 = vector.extract_strided_slice %51 {offsets = [15, 0], sizes = [1, 16], strides = [1, 1]} : vector<64x16xf32> to vector<1x16xf32>
    %65 = vector.broadcast %64 : vector<1x16xf32> to vector<16x16xf32>
    %66 = arith.mulf %63, %65 : vector<16x16xf32>
    %67 = vector.shape_cast %66 : vector<16x16xf32> to vector<16x16x1xf32>
    %68 = vector.broadcast %67 : vector<16x16x1xf32> to vector<16x16x24xf32>
    %69 = arith.mulf %62, %68 : vector<16x16x24xf32>
    %cst_27 = arith.constant dense<0.000000e+00> : vector<16x24xf32>
    %70 = vector.multi_reduction <add>, %69, %cst_27 [1] : vector<16x16x24xf32> to vector<16x24xf32>
    %71 = vector.extract_strided_slice %52 {offsets = [0, 0], sizes = [16, 24], strides = [1, 1]} : vector<64x24xf32> to vector<16x24xf32>
    %72 = arith.mulf %70, %71 : vector<16x24xf32>
    %cst_28 = arith.constant dense<0.000000e+00> : vector<24xf32>
    %73 = vector.multi_reduction <add>, %72, %cst_28 [0] : vector<16x24xf32> to vector<24xf32>
    %74 = vector.shape_cast %73 : vector<24xf32> to vector<1x24xf32>
    %c0_29 = arith.constant 0 : index
    %c0_30 = arith.constant 0 : index
    %75 = vector.load %arg8[%c0_29, %c0_30] : memref<1x24xf32, #tpu.memory_space<vmem>>, vector<1x24xf32>
    %76 = vector.extract_strided_slice %33 {offsets = [15, 0], sizes = [1, 24], strides = [1, 1]} : vector<64x24xf32> to vector<1x24xf32>
    %77 = arith.mulf %75, %76 : vector<1x24xf32>
    %78 = arith.addf %74, %77 : vector<1x24xf32>
    %79 = vector.extract_strided_slice %4 {offsets = [15, 0], sizes = [1, 24], strides = [1, 1]} : vector<64x24xf32> to vector<1x24xf32>
    %80 = vector.extract_strided_slice %54 {offsets = [16, 0], sizes = [16, 24], strides = [1, 1]} : vector<64x24xf32> to vector<16x24xf32>
    %81 = vector.shape_cast %80 : vector<16x24xf32> to vector<16x1x24xf32>
    %82 = vector.shape_cast %55 : vector<16x24xf32> to vector<1x16x24xf32>
    %83 = vector.broadcast %81 : vector<16x1x24xf32> to vector<16x16x24xf32>
    %84 = vector.broadcast %82 : vector<1x16x24xf32> to vector<16x16x24xf32>
    %85 = arith.mulf %83, %84 : vector<16x16x24xf32>
    %86 = math.exp %85 : vector<16x16x24xf32>
    %87 = vector.extract_strided_slice %50 {offsets = [16, 0], sizes = [16, 16], strides = [1, 1]} : vector<64x16xf32> to vector<16x16xf32>
    %88 = vector.extract_strided_slice %51 {offsets = [31, 0], sizes = [1, 16], strides = [1, 1]} : vector<64x16xf32> to vector<1x16xf32>
    %89 = vector.broadcast %88 : vector<1x16xf32> to vector<16x16xf32>
    %90 = arith.mulf %87, %89 : vector<16x16xf32>
    %91 = vector.shape_cast %90 : vector<16x16xf32> to vector<16x16x1xf32>
    %92 = vector.broadcast %91 : vector<16x16x1xf32> to vector<16x16x24xf32>
    %93 = arith.mulf %86, %92 : vector<16x16x24xf32>
    %cst_31 = arith.constant dense<0.000000e+00> : vector<16x24xf32>
    %94 = vector.multi_reduction <add>, %93, %cst_31 [1] : vector<16x16x24xf32> to vector<16x24xf32>
    %95 = vector.extract_strided_slice %52 {offsets = [16, 0], sizes = [16, 24], strides = [1, 1]} : vector<64x24xf32> to vector<16x24xf32>
    %96 = arith.mulf %94, %95 : vector<16x24xf32>
    %cst_32 = arith.constant dense<0.000000e+00> : vector<24xf32>
    %97 = vector.multi_reduction <add>, %96, %cst_32 [0] : vector<16x24xf32> to vector<24xf32>
    %98 = vector.shape_cast %97 : vector<24xf32> to vector<1x24xf32>
    %c0_33 = arith.constant 0 : index
    %c0_34 = arith.constant 0 : index
    %99 = vector.load %arg8[%c0_33, %c0_34] : memref<1x24xf32, #tpu.memory_space<vmem>>, vector<1x24xf32>
    %100 = vector.extract_strided_slice %33 {offsets = [31, 0], sizes = [1, 24], strides = [1, 1]} : vector<64x24xf32> to vector<1x24xf32>
    %101 = arith.mulf %99, %100 : vector<1x24xf32>
    %102 = arith.addf %98, %101 : vector<1x24xf32>
    %103 = vector.extract_strided_slice %4 {offsets = [31, 0], sizes = [1, 24], strides = [1, 1]} : vector<64x24xf32> to vector<1x24xf32>
    %104 = vector.extract_strided_slice %54 {offsets = [32, 0], sizes = [16, 24], strides = [1, 1]} : vector<64x24xf32> to vector<16x24xf32>
    %105 = vector.shape_cast %104 : vector<16x24xf32> to vector<16x1x24xf32>
    %106 = vector.shape_cast %55 : vector<16x24xf32> to vector<1x16x24xf32>
    %107 = vector.broadcast %105 : vector<16x1x24xf32> to vector<16x16x24xf32>
    %108 = vector.broadcast %106 : vector<1x16x24xf32> to vector<16x16x24xf32>
    %109 = arith.mulf %107, %108 : vector<16x16x24xf32>
    %110 = math.exp %109 : vector<16x16x24xf32>
    %111 = vector.extract_strided_slice %50 {offsets = [32, 0], sizes = [16, 16], strides = [1, 1]} : vector<64x16xf32> to vector<16x16xf32>
    %112 = vector.extract_strided_slice %51 {offsets = [47, 0], sizes = [1, 16], strides = [1, 1]} : vector<64x16xf32> to vector<1x16xf32>
    %113 = vector.broadcast %112 : vector<1x16xf32> to vector<16x16xf32>
    %114 = arith.mulf %111, %113 : vector<16x16xf32>
    %115 = vector.shape_cast %114 : vector<16x16xf32> to vector<16x16x1xf32>
    %116 = vector.broadcast %115 : vector<16x16x1xf32> to vector<16x16x24xf32>
    %117 = arith.mulf %110, %116 : vector<16x16x24xf32>
    %cst_35 = arith.constant dense<0.000000e+00> : vector<16x24xf32>
    %118 = vector.multi_reduction <add>, %117, %cst_35 [1] : vector<16x16x24xf32> to vector<16x24xf32>
    %119 = vector.extract_strided_slice %52 {offsets = [32, 0], sizes = [16, 24], strides = [1, 1]} : vector<64x24xf32> to vector<16x24xf32>
    %120 = arith.mulf %118, %119 : vector<16x24xf32>
    %cst_36 = arith.constant dense<0.000000e+00> : vector<24xf32>
    %121 = vector.multi_reduction <add>, %120, %cst_36 [0] : vector<16x24xf32> to vector<24xf32>
    %122 = vector.shape_cast %121 : vector<24xf32> to vector<1x24xf32>
    %c0_37 = arith.constant 0 : index
    %c0_38 = arith.constant 0 : index
    %123 = vector.load %arg8[%c0_37, %c0_38] : memref<1x24xf32, #tpu.memory_space<vmem>>, vector<1x24xf32>
    %124 = vector.extract_strided_slice %33 {offsets = [47, 0], sizes = [1, 24], strides = [1, 1]} : vector<64x24xf32> to vector<1x24xf32>
    %125 = arith.mulf %123, %124 : vector<1x24xf32>
    %126 = arith.addf %122, %125 : vector<1x24xf32>
    %127 = vector.extract_strided_slice %4 {offsets = [47, 0], sizes = [1, 24], strides = [1, 1]} : vector<64x24xf32> to vector<1x24xf32>
    %128 = vector.extract_strided_slice %54 {offsets = [48, 0], sizes = [16, 24], strides = [1, 1]} : vector<64x24xf32> to vector<16x24xf32>
    %129 = vector.shape_cast %128 : vector<16x24xf32> to vector<16x1x24xf32>
    %130 = vector.shape_cast %55 : vector<16x24xf32> to vector<1x16x24xf32>
    %131 = vector.broadcast %129 : vector<16x1x24xf32> to vector<16x16x24xf32>
    %132 = vector.broadcast %130 : vector<1x16x24xf32> to vector<16x16x24xf32>
    %133 = arith.mulf %131, %132 : vector<16x16x24xf32>
    %134 = math.exp %133 : vector<16x16x24xf32>
    %135 = vector.extract_strided_slice %50 {offsets = [48, 0], sizes = [16, 16], strides = [1, 1]} : vector<64x16xf32> to vector<16x16xf32>
    %136 = vector.extract_strided_slice %51 {offsets = [63, 0], sizes = [1, 16], strides = [1, 1]} : vector<64x16xf32> to vector<1x16xf32>
    %137 = vector.broadcast %136 : vector<1x16xf32> to vector<16x16xf32>
    %138 = arith.mulf %135, %137 : vector<16x16xf32>
    %139 = vector.shape_cast %138 : vector<16x16xf32> to vector<16x16x1xf32>
    %140 = vector.broadcast %139 : vector<16x16x1xf32> to vector<16x16x24xf32>
    %141 = arith.mulf %134, %140 : vector<16x16x24xf32>
    %cst_39 = arith.constant dense<0.000000e+00> : vector<16x24xf32>
    %142 = vector.multi_reduction <add>, %141, %cst_39 [1] : vector<16x16x24xf32> to vector<16x24xf32>
    %143 = vector.extract_strided_slice %52 {offsets = [48, 0], sizes = [16, 24], strides = [1, 1]} : vector<64x24xf32> to vector<16x24xf32>
    %144 = arith.mulf %142, %143 : vector<16x24xf32>
    %cst_40 = arith.constant dense<0.000000e+00> : vector<24xf32>
    %145 = vector.multi_reduction <add>, %144, %cst_40 [0] : vector<16x24xf32> to vector<24xf32>
    %146 = vector.shape_cast %145 : vector<24xf32> to vector<1x24xf32>
    %c0_41 = arith.constant 0 : index
    %c0_42 = arith.constant 0 : index
    %147 = vector.load %arg8[%c0_41, %c0_42] : memref<1x24xf32, #tpu.memory_space<vmem>>, vector<1x24xf32>
    %148 = vector.extract_strided_slice %33 {offsets = [63, 0], sizes = [1, 24], strides = [1, 1]} : vector<64x24xf32> to vector<1x24xf32>
    %149 = arith.mulf %147, %148 : vector<1x24xf32>
    %150 = arith.addf %146, %149 : vector<1x24xf32>
    %151 = vector.extract_strided_slice %4 {offsets = [63, 0], sizes = [1, 24], strides = [1, 1]} : vector<64x24xf32> to vector<1x24xf32>
    %152 = tpu.concatenate %78, %102, %126, %150 in 0 : vector<1x24xf32>, vector<1x24xf32>, vector<1x24xf32>, vector<1x24xf32> -> vector<4x24xf32>
    %153 = tpu.concatenate %79, %103, %127, %151 in 0 : vector<1x24xf32>, vector<1x24xf32>, vector<1x24xf32>, vector<1x24xf32> -> vector<4x24xf32>
    %154 = arith.negf %153 : vector<4x24xf32>
    %155 = math.exp %154 : vector<4x24xf32>
    %cst_43 = arith.constant 1.000000e+00 : f32
    %156 = vector.broadcast %cst_43 : f32 to vector<4x24xf32>
    %157 = arith.addf %156, %155 : vector<4x24xf32>
    %158 = arith.divf %156, %157 : vector<4x24xf32>
    %159 = arith.mulf %153, %158 : vector<4x24xf32>
    %160 = arith.mulf %152, %159 : vector<4x24xf32>
    %c0_44 = arith.constant 0 : index
    %c0_45 = arith.constant 0 : index
    %161 = vector.load %arg9[%c0_44, %c0_45] : memref<24x1xf32, #tpu.memory_space<vmem>>, vector<24x1xf32>
    %cst_46 = arith.constant dense<0.000000e+00> : vector<4x1xf32>
    %162 = tpu.matmul %160, %161, %cst_46 {dimension_numbers = #tpu.dot_dimension_numbers<[1], [0], [0], [1], [0, 0, 1, 1], [], []>} : vector<4x24xf32>, vector<24x1xf32>, vector<4x1xf32> -> vector<4x1xf32>
    %c0_47 = arith.constant 0 : index
    %c0_48 = arith.constant 0 : index
    %163 = vector.load %arg10[%c0_47, %c0_48] : memref<1x1xf32, #tpu.memory_space<vmem>>, vector<1x1xf32>
    %164 = vector.broadcast %163 : vector<1x1xf32> to vector<4x1xf32>
    %165 = arith.addf %162, %164 : vector<4x1xf32>
    %c0_49 = arith.constant 0 : index
    %c0_50 = arith.constant 0 : index
    %c0_51 = arith.constant 0 : index
    %166 = vector.load %arg13[%c0_49, %c0_50, %c0_51] : memref<1x4x1xf32, #tpu.memory_space<vmem>>, vector<1x4x1xf32>
    %167 = vector.shape_cast %166 : vector<1x4x1xf32> to vector<4x1xf32>
    %168 = vector.shape_cast %165 : vector<4x1xf32> to vector<1x4x1xf32>
    tpu.vector_store %arg13[%c0_49, %c0_50, %c0_51], %168 {strides = array<i32>} : memref<1x4x1xf32, #tpu.memory_space<vmem>>, vector<1x4x1xf32>,
    return
  }
  func.func @transform_0(%arg0: i32) -> (i32, i32) {
    %c0_i32 = arith.constant 0 : i32
    %c0_i32_0 = arith.constant 0 : i32
    return %arg0, %c0_i32 : i32, i32
  }
  func.func @transform_1(%arg0: i32) -> (i32, i32) {
    %c0_i32 = arith.constant 0 : i32
    %c0_i32_0 = arith.constant 0 : i32
    %c0_i32_1 = arith.constant 0 : i32
    return %c0_i32, %c0_i32_0 : i32, i32
  }
  func.func @transform_2(%arg0: i32) -> (i32, i32) {
    %c0_i32 = arith.constant 0 : i32
    %c0_i32_0 = arith.constant 0 : i32
    %c0_i32_1 = arith.constant 0 : i32
    return %c0_i32, %c0_i32_0 : i32, i32
  }
  func.func @transform_3(%arg0: i32) -> (i32, i32) {
    %c0_i32 = arith.constant 0 : i32
    %c0_i32_0 = arith.constant 0 : i32
    %c0_i32_1 = arith.constant 0 : i32
    return %c0_i32, %c0_i32_0 : i32, i32
  }
  func.func @transform_4(%arg0: i32) -> (i32, i32) {
    %c0_i32 = arith.constant 0 : i32
    %c0_i32_0 = arith.constant 0 : i32
    %c0_i32_1 = arith.constant 0 : i32
    return %c0_i32, %c0_i32_0 : i32, i32
  }
  func.func @transform_5(%arg0: i32) -> (i32, i32) {
    %c0_i32 = arith.constant 0 : i32
    %c0_i32_0 = arith.constant 0 : i32
    %c0_i32_1 = arith.constant 0 : i32
    return %c0_i32, %c0_i32_0 : i32, i32
  }
  func.func @transform_6(%arg0: i32) -> (i32, i32) {
    %c0_i32 = arith.constant 0 : i32
    %c0_i32_0 = arith.constant 0 : i32
    %c0_i32_1 = arith.constant 0 : i32
    return %c0_i32, %c0_i32_0 : i32, i32
  }
  func.func @transform_7(%arg0: i32) -> (i32, i32) {
    %c0_i32 = arith.constant 0 : i32
    %c0_i32_0 = arith.constant 0 : i32
    %c0_i32_1 = arith.constant 0 : i32
    return %c0_i32, %c0_i32_0 : i32, i32
  }
  func.func @transform_8(%arg0: i32) -> (i32, i32) {
    %c0_i32 = arith.constant 0 : i32
    %c0_i32_0 = arith.constant 0 : i32
    %c0_i32_1 = arith.constant 0 : i32
    return %c0_i32, %c0_i32_0 : i32, i32
  }
  func.func @transform_9(%arg0: i32) -> (i32, i32) {
    %c0_i32 = arith.constant 0 : i32
    %c0_i32_0 = arith.constant 0 : i32
    %c0_i32_1 = arith.constant 0 : i32
    return %c0_i32, %c0_i32_0 : i32, i32
  }
  func.func @transform_10(%arg0: i32) -> (i32, i32) {
    %c0_i32 = arith.constant 0 : i32
    %c0_i32_0 = arith.constant 0 : i32
    %c0_i32_1 = arith.constant 0 : i32
    return %c0_i32, %c0_i32_0 : i32, i32
  }
  func.func @transform_11(%arg0: i32) -> (i32, i32) {
    %c0_i32 = arith.constant 0 : i32
    %c0_i32_0 = arith.constant 0 : i32
    %c0_i32_1 = arith.constant 0 : i32
    return %c0_i32, %c0_i32_0 : i32, i32
  }
  func.func @transform_12(%arg0: i32) -> (i32, i32, i32) {
    %c0_i32 = arith.constant 0 : i32
    %c0_i32_0 = arith.constant 0 : i32
    %c0_i32_1 = arith.constant 0 : i32
    return %arg0, %c0_i32, %c0_i32_0 : i32, i32, i32
  }
}

</mosaic_0001>

<bundles_post_ra>
// kernel: tpu_custom_call.1
= control target key start
LH: loop header
LB: loop body
LE: loop exit
PB: predicated region body
PF: predicated region fallthrough
CT: control target
= control target key end

     0   :  { %s4463_s23 = smov 0   ;;  %s6095_s0 = inlined_call_operand.vmem [shape: f32[128,12], index: 0, kind: input, shape index: {}]   ;;  %s6096_s1 = inlined_call_operand.vmem [shape: f32[12,48], index: 1, kind: input, shape index: {}]   ;;  %s6097_s2 = inlined_call_operand.vmem [shape: f32[4,24], index: 2, kind: input, shape index: {}]   ;;  %s6098_s3 = inlined_call_operand.vmem [shape: f32[1,24], index: 3, kind: input, shape index: {}]   ;;  %s6099_s4 = inlined_call_operand.vmem [shape: f32[24,56], index: 4, kind: input, shape index: {}]   ;;  %s6100_s5 = inlined_call_operand.vmem [shape: f32[1,24], index: 5, kind: input, shape index: {}]   ;;  %s6101_s6 = inlined_call_operand.vmem [shape: f32[16,24], index: 6, kind: input, shape index: {}]   ;;  %s6102_s7 = inlined_call_operand.vmem [shape: f32[1,24], index: 7, kind: input, shape index: {}]   ;;  %s6103_s8 = inlined_call_operand.vmem [shape: f32[24,1], index: 8, kind: input, shape index: {}]   ;;  %s6104_s9 = inlined_call_operand.<no memory space> [shape: f32[1,1], index: 9, kind: input, shape index: {}]   ;;  %s6105_s10 = inlined_call_operand.vmem [shape: f32[64,64], index: 10, kind: input, shape index: {}]   ;;  %s6106_s11 = inlined_call_operand.vmem [shape: f32[192,64], index: 11, kind: input, shape index: {}]   ;;  %s6107_s12 = inlined_call_operand.vmem [shape: f32[2,4,1], index: 12, kind: output, shape index: {}]  }
   0x1   :  { %v17_v0 = vstv %s6104_s9 }
   0x2   :  { %18 = vst [vmem:[#allocation2] sm:$0x1] %v17_v0 }
   0x3 LB: > { %s4469_s24 = sadd.s32 4294967295, %s4391_s23   ;;  %p3882_p0 = scmp.ge.s32.totalorder %s4391_s23, 1  ;;  %s4391_s23 = sphi %s4463_s23, %s24_s23  }
   0x4   : > { %p365_p1 = scmp.lt.s32.totalorder %s4391_s23, 3 }
   0x6   : > { %p366_p2 = pnand %p3882_p0, %p365_p1 }
   0x7   : > { %s3883_s28 = sshll.u32 (!%p366_p2), %s4469_s24, 3  ;;  %s4394_s30 = smov (!%p366_p2), 104  }
   0x8   : > { %369 = sbr.rel (%p366_p2) target bundleno = 1569 (0x621), region = 68  ;;  %p407_p3 = scmp.lt.s32.totalorder (!%p366_p2), %s3883_s28, 15 }
   0x9   : > { %p412_p4 = scmp.lt.s32.totalorder (!%p366_p2), %s4469_s24, 1 }
   0xd   : > { %v425_v1 = vld [vmem:[%s6096_s1 + $0x8] sm:$0xf]  ;;  %vm451_vm0 = vcmask 1043456   ;;  %v424_v2 = vld [vmem:[%s6096_s1] sm:$0xff]  ;;  %s6129_s28 = smov (!%p407_p3, %s3883_s28), 15  ;;  %vm426_vm1 = vcmask 97280  }
   0xe   : > { %3886 = vmatpush.msk.msra.mxu0 %vm451_vm0, %v425_v1  ;;  %3947 = vmatpush.msk.msra.mxu3 %vm451_vm0, %v425_v1  ;;  %s3884_s29 = sshll.u32 %s6129_s28, 3  ;;  %vm3747_vm2 = vcmask 1040384   ;;  %vm3749_vm3 = vcmask 1041408   ;;  %v518_v24 = vld [vmem:[%s6106_s11] sm:$0xff]  ;;  %vm542_vm4 = vcmask 523264   ;;  %v519_v26 = vld [vmem:[%s6106_s11 + $0x8] sm:$0xff] }
   0xf   : > { %s410_s14 = scalar_lea.vmem %s6095_s0, %s3884_s29  ;;  %v530_v25 = vld [vmem:[%s6106_s11 + $0x60] sm:$0xff]  ;;  %v531_v27 = vld [vmem:[%s6106_s11 + $0x68] sm:$0xff]  ;;  %v520_v28 = vld [vmem:[%s6106_s11 + $0x10] sm:$0xff]  ;;  %vm921_vm9 = vcmask 195584   ;;  %s4393_s29 = smov 112  }
  0x10   : > { %470 = vmatpush.msra.mxu0 %v424_v2  ;;  %3948 = vmatpush.msra.mxu3 %v424_v2  ;;  %v416_v3 = vld [vmem:[%s410_s14] sm:$0xff]  ;;  %v421_v4 = vld [vmem:[%s410_s14 + $0x28] sm:$0xff]  ;;  %v422_v6 = vld [vmem:[%s410_s14 + $0x30] sm:$0xff]  ;;  %s6131_s24 = smov (!%p412_p4, %s4469_s24), 1 }
  0x11   : > { %3887 = vmatmul.msk.f32.vlgmr.msra.gmra.mxu0 %vm426_vm1, %v416_v3  ;;  %3892 = vmatmul.msk.f32.vlgmr.msra.gmra.mxu3 %vm426_vm1, %v421_v4  ;;  %v417_v5 = vld [vmem:[%s410_s14 + $0x8] sm:$0xff]  ;;  %v418_v7 = vld [vmem:[%s410_s14 + $0x10] sm:$0xff]  ;;  %v423_v8 = vld [vmem:[%s410_s14 + $0x38] sm:$0xff]  ;;  %s3885_s9 = sshll.u32 %s6131_s24, 2 }
  0x12   : > { %v419_v9 = vld [vmem:[%s410_s14 + $0x18] sm:$0xff]  ;;  %v420_v10 = vld [vmem:[%s410_s14 + $0x20] sm:$0xff]  ;;  %v532_v29 = vld [vmem:[%s6106_s11 + $0x70] sm:$0xff] }
  0x13   : > { %v521_v30 = vld [vmem:[%s6106_s11 + $0x18] sm:$0xff]  ;;  %v522_v32 = vld [vmem:[%s6106_s11 + $0x20] sm:$0xff]  ;;  %v523_v34 = vld [vmem:[%s6106_s11 + $0x28] sm:$0xff] }
  0x14   : > { %v533_v31 = vld [vmem:[%s6106_s11 + $0x78] sm:$0xff]  ;;  %v534_v33 = vld [vmem:[%s6106_s11 + $0x80] sm:$0xff]  ;;  %v535_v35 = vld [vmem:[%s6106_s11 + $0x88] sm:$0xff] }
  0x15   : > { %v524_v36 = vld [vmem:[%s6106_s11 + $0x30] sm:$0xff]  ;;  %v525_v38 = vld [vmem:[%s6106_s11 + $0x38] sm:$0xff]  ;;  %v526_v40 = vld [vmem:[%s6106_s11 + $0x40] sm:$0xff] }
  0x16   : > { %v536_v37 = vld [vmem:[%s6106_s11 + $0x90] sm:$0xff]  ;;  %v537_v39 = vld [vmem:[%s6106_s11 + $0x98] sm:$0xff]  ;;  %v538_v41 = vld [vmem:[%s6106_s11 + $0xa0] sm:$0xff] }
  0x17   : > { %v527_v42 = vld [vmem:[%s6106_s11 + $0x48] sm:$0xff]  ;;  %v528_v44 = vld [vmem:[%s6106_s11 + $0x50] sm:$0xff]  ;;  %v529_v46 = vld [vmem:[%s6106_s11 + $0x58] sm:$0xff] }
  0x18   : > { %v539_v43 = vld [vmem:[%s6106_s11 + $0xa8] sm:$0xff]  ;;  %v540_v45 = vld [vmem:[%s6106_s11 + $0xb0] sm:$0xff]  ;;  %v541_v47 = vld [vmem:[%s6106_s11 + $0xb8] sm:$0xff] }
  0x19   : > { %3888 = vmatmul.msk.f32.gmra.mxu0 %vm426_vm1, %v417_v5  ;;  %3893 = vmatmul.msk.f32.gmra.mxu3 %vm426_vm1, %v422_v6  ;;  %v4631_v53 = vld [vmem:[%s6097_s2 + $0x3] ss:$0 sm:$0xff]  ;;  %v4638_v56 = vld [vmem:[%s6098_s3] ss:$0 sm:$0xff]  ;;  %v4643_v57 = vld [vmem:[%s6097_s2 + $0x2] ss:$0 sm:$0xff] }
  0x1a   : > { %v920_v62 = vld [vmem:[%s6099_s4 + $0x10] sm:$0xff]  ;;  %v4657_v0 = vld [vmem:[%s6097_s2 + $0x1] ss:$0 sm:$0xff] }
  0x1b   : > { %959 = vmatpush.msrb.mxu0 %v920_v62  ;;  %3957 = vmatpush.msrb.mxu3 %v920_v62 }
  0x21   : > { %3889 = vmatmul.msk.f32.gmra.mxu0 %vm426_vm1, %v418_v7  ;;  %3894 = vmatmul.msk.f32.gmra.mxu3 %vm426_vm1, %v423_v8 }
  0x29   : > { %3890 = vmatmul.msk.f32.gmra.mxu0 %vm426_vm1, %v419_v9 }
  0x31   : > { %3891 = vmatmul.msk.f32.gmra.mxu0 %vm426_vm1, %v420_v10 }
  0x8e   : > { %v4491_v11 = vpop.f32.mrf.mxu0 }
  0x94   : > { %v4493_v12 = vpop.f32.mrf.mxu3 }
  0x95   : > { %v3760_v20 = vrot.slane %v4493_v12, 5  ;;  %v503_v7 = vmul.f32 %v4631_v53, %v4493_v12 }
  0x96   : > { %v4495_v13 = vpop.f32.mrf.mxu0 }
  0x97   : > { %v3754_v18 = vrot.slane %v4495_v13, 7 }
  0x9c   : > { %v4497_v14 = vpop.f32.mrf.mxu3 }
  0x9e   : > { %v4499_v15 = vpop.f32.mrf.mxu0 }
  0xa4   : > { %v4501_v16 = vpop.f32.mrf.mxu3 }
  0xa5   : > { %623 = vmatpush.msra.mxu1 %v4501_v16  ;;  %3949 = vmatpush.msra.mxu2 %v4501_v16 }
  0xa6   : > { %v4505_v17 = vpop.f32.mrf.mxu0 }
  0xa7   : > { %v3757_v19 = vrot.slane %v4505_v17, 6  ;;  %624 = vmatpush.msra.mxu1 %v4497_v14  ;;  %3950 = vmatpush.msra.mxu2 %v4497_v14  ;;  %v501_v54 = vmul.f32 %v4631_v53, %v4505_v17 }
  0xa9   : > { %v3765_v21 = vsel %vm3747_vm2, %v3754_v18, %v3757_v19  ;;  %625 = vmatpush.msra.mxu1 %v4493_v12  ;;  %3951 = vmatpush.msra.mxu2 %v4493_v12  ;;  %v513_v59 = vadd.f32 %v4638_v56, %v501_v54  ;;  %v515_v18 = vadd.f32 %v4638_v56, %v503_v7 }
  0xaa   : > { %v4516_v22 = vsel %vm3749_vm3, %v3765_v21, %v3760_v20  ;;  %v504_v21 = vmul.f32 %v4631_v53, %v4497_v14  ;;  %v4682_v14 = vld [vmem:[%s6097_s2] ss:$0 sm:$0xff]  ;;  %v500_v54 = vmul.f32 %v4631_v53, %v4499_v15 }
  0xac   : > { %v516_v12 = vadd.f32 %v4638_v56, %v504_v21  ;;  %v512_v62 = vadd.f32 %v4638_v56, %v500_v54 }
  0xae   : > { %v4518_v23 = vpop.f32.mrf.mxu0 }
  0xaf   : > { %626 = vmatpush.msra.mxu1 %v4518_v23  ;;  %3952 = vmatpush.msra.mxu2 %v4518_v23  ;;  %v502_v63 = vmul.f32 %v4631_v53, %v4518_v23 }
  0xb1   : > { %627 = vmatpush.msra.mxu1 %v4505_v17  ;;  %3953 = vmatpush.msra.mxu2 %v4505_v17  ;;  %v514_v4 = vadd.f32 %v4638_v56, %v502_v63 }
  0xb3   : > { %628 = vmatpush.msra.mxu1 %v4499_v15  ;;  %3954 = vmatpush.msra.mxu2 %v4499_v15 }
  0xb5   : > { %629 = vmatpush.msra.mxu1 %v4495_v13  ;;  %3955 = vmatpush.msra.mxu2 %v4495_v13 }
  0xb7   : > { %630 = vmatpush.msra.mxu1 %v4491_v11  ;;  %3956 = vmatpush.msra.mxu2 %v4491_v11 }
  0xb8   : > { %3895 = vmatmul.msk.f32.vlgmr.msra.gmra.mxu1 %vm542_vm4, %v518_v24  ;;  %3907 = vmatmul.msk.f32.vlgmr.msra.gmra.mxu2 %vm542_vm4, %v530_v25 }
  0xc0   : > { %3896 = vmatmul.msk.f32.gmra.mxu1 %vm542_vm4, %v519_v26  ;;  %3908 = vmatmul.msk.f32.gmra.mxu2 %vm542_vm4, %v531_v27 }
  0xc8   : > { %3897 = vmatmul.msk.f32.gmra.mxu1 %vm542_vm4, %v520_v28  ;;  %3909 = vmatmul.msk.f32.gmra.mxu2 %vm542_vm4, %v532_v29 }
  0xd0   : > { %3898 = vmatmul.msk.f32.gmra.mxu1 %vm542_vm4, %v521_v30  ;;  %3910 = vmatmul.msk.f32.gmra.mxu2 %vm542_vm4, %v533_v31 }
  0xd8   : > { %3899 = vmatmul.msk.f32.gmra.mxu1 %vm542_vm4, %v522_v32  ;;  %3911 = vmatmul.msk.f32.gmra.mxu2 %vm542_vm4, %v534_v33  ;;  %v498_v32 = vmul.f32 %v4631_v53, %v4491_v11  ;;  %v919_v11 = vld [vmem:[%s6099_s4 + $0x8] sm:$0xff] }
  0xd9   : > { %960 = vmatpush.msrb.mxu0 %v919_v11  ;;  %3958 = vmatpush.msrb.mxu3 %v919_v11 }
  0xe0   : > { %3900 = vmatmul.msk.f32.gmra.mxu1 %vm542_vm4, %v523_v34  ;;  %3912 = vmatmul.msk.f32.gmra.mxu2 %vm542_vm4, %v535_v35  ;;  %v510_v35 = vadd.f32 %v4638_v56, %v498_v32 }
  0xe8   : > { %3901 = vmatmul.msk.f32.gmra.mxu1 %vm542_vm4, %v524_v36  ;;  %3913 = vmatmul.msk.f32.gmra.mxu2 %vm542_vm4, %v536_v37 }
  0xf0   : > { %3902 = vmatmul.msk.f32.gmra.mxu1 %vm542_vm4, %v525_v38  ;;  %3914 = vmatmul.msk.f32.gmra.mxu2 %vm542_vm4, %v537_v39 }
  0xf8   : > { %3903 = vmatmul.msk.f32.gmra.mxu1 %vm542_vm4, %v526_v40  ;;  %3915 = vmatmul.msk.f32.gmra.mxu2 %vm542_vm4, %v538_v41  ;;  %v499_v40 = vmul.f32 %v4631_v53, %v4495_v13 }
 0x100   : > { %3904 = vmatmul.msk.f32.gmra.mxu1 %vm542_vm4, %v527_v42  ;;  %3916 = vmatmul.msk.f32.gmra.mxu2 %vm542_vm4, %v539_v43 }
 0x108   : > { %3905 = vmatmul.msk.f32.gmra.mxu1 %vm542_vm4, %v528_v44  ;;  %3917 = vmatmul.msk.f32.gmra.mxu2 %vm542_vm4, %v540_v45  ;;  %v918_v44 = vld [vmem:[%s6099_s4] sm:$0xff] }
 0x109   : > { %961 = vmatpush.msrb.mxu0 %v918_v44  ;;  %3959 = vmatpush.msrb.mxu3 %v918_v44 }
 0x110   : > { %3906 = vmatmul.msk.f32.gmra.mxu1 %vm542_vm4, %v529_v46  ;;  %3918 = vmatmul.msk.f32.gmra.mxu2 %vm542_vm4, %v541_v47  ;;  %v511_v46 = vadd.f32 %v4638_v56, %v499_v40 }
 0x135   : > { %v632_v48 = vpop.f32.mrf.mxu1 }
 0x136   : > { %v706_v33 = vmul.f32 %v4643_v57, %v632_v48 }
 0x138   : > { %v714_v37 = vadd.f32 %v706_v33, %v510_v35 }
 0x13b   : > { %v668_v49 = vpop.f32.mrf.mxu2 }
 0x13c   : > { %v728_v3 = vmul.f32 %v4657_v0, %v668_v49 }
 0x13d   : > { %v635_v50 = vpop.f32.mrf.mxu1 }
 0x13e   : > { %v707_v42 = vmul.f32 %v4643_v57, %v635_v50 }
 0x140   : > { %v715_v13 = vadd.f32 %v707_v42, %v511_v46 }
 0x143   : > { %v671_v51 = vpop.f32.mrf.mxu2 }
 0x144   : > { %v729_v17 = vmul.f32 %v4657_v0, %v671_v51 }
 0x145   : > { %v4626_v52 = vpop.f32.mrf.mxu1 }
 0x14b   : > { %v674_v55 = vpop.f32.mrf.mxu2 }
 0x14c   : > { %v730_v26 = vmul.f32 %v4657_v0, %v674_v55 }
 0x14d   : > { %v641_v58 = vpop.f32.mrf.mxu1 }
 0x14e   : > { %v709_v60 = vmul.f32 %v4643_v57, %v641_v58 }
 0x150   : > { %v4647_v61 = vadd.f32 %v709_v60, %v513_v59  ;;  %v708_v59 = vmul.f32 %v4643_v57, %v4626_v52 }
 0x153   : > { %v4659_v1 = vpop.f32.mrf.mxu2 }
 0x155   : > { %v644_v2 = vpop.f32.mrf.mxu1 }
 0x156   : > { %v710_v5 = vmul.f32 %v4643_v57, %v644_v2 }
 0x158   : > { %v718_v6 = vadd.f32 %v710_v5, %v514_v4 }
 0x15a   : > { %v736_v8 = vadd.f32 %v728_v3, %v718_v6  ;;  %v716_v6 = vadd.f32 %v708_v59, %v512_v62 }
 0x15b   : > { %v680_v9 = vpop.f32.mrf.mxu2 }
 0x15c   : > { %v742_v38 = vmul.f32 %v4682_v14, %v680_v9 }
 0x15d   : > { %v647_v10 = vpop.f32.mrf.mxu1 }
 0x15e   : > { %v711_v19 = vmul.f32 %v4643_v57, %v647_v10 }
 0x160   : > { %v719_v20 = vadd.f32 %v711_v19, %v515_v18  ;;  %v505_v18 = vmul.f32 %v4631_v53, %v4501_v16 }
 0x162   : > { %v737_v23 = vadd.f32 %v729_v17, %v719_v20 }
 0x163   : > { %v683_v24 = vpop.f32.mrf.mxu2 }
 0x164   : > { %v743_v51 = vmul.f32 %v4682_v14, %v683_v24 }
 0x165   : > { %v650_v25 = vpop.f32.mrf.mxu1 }
 0x166   : > { %v712_v27 = vmul.f32 %v4643_v57, %v650_v25 }
 0x168   : > { %v720_v28 = vadd.f32 %v712_v27, %v516_v12 }
 0x16a   : > { %v4674_v29 = vadd.f32 %v730_v26, %v720_v28  ;;  %v517_v26 = vadd.f32 %v4638_v56, %v505_v18 }
 0x16b   : > { %v686_v30 = vpop.f32.mrf.mxu2 }
 0x16d   : > { %v653_v31 = vpop.f32.mrf.mxu1 }
 0x16e   : > { %v713_v20 = vmul.f32 %v4643_v57, %v653_v31 }
 0x170   : > { %v721_v32 = vadd.f32 %v713_v20, %v517_v26 }
 0x173   : > { %v4684_v34 = vpop.f32.mrf.mxu2 }
 0x174   : > { %v745_v57 = vmul.f32 %v4682_v14, %v4684_v34 }
 0x175   : > { %v656_v36 = vpop.f32.mrf.mxu1 }
 0x176   : > { %v724_v39 = vmul.f32 %v4657_v0, %v656_v36 }
 0x178   : > { %v732_v41 = vadd.f32 %v724_v39, %v714_v37 }
 0x17a   : > { %v4695_v43 = vadd.f32 %v742_v38, %v732_v41 }
 0x17b   : > { %v692_v45 = vpop.f32.mrf.mxu2 }
 0x17c   : > { %v3919_v47 = vmul.f32 -1.442695, %v4695_v43  ;;  %v746_v48 = vmul.f32 %v4682_v14, %v692_v45 }
 0x17d   : > { %v659_v49 = vpop.f32.mrf.mxu1 }
 0x17e   : > { %4052 = vpow2.f32 %v3919_v47  ;;  %v725_v50 = vmul.f32 %v4657_v0, %v659_v49  ;;  %v4707_v55 = vadd.f32 %v746_v48, %v736_v8  ;;  %v744_v8 = vmul.f32 %v4682_v14, %v686_v30 }
 0x17f   : > { %v731_v30 = vmul.f32 %v4657_v0, %v4659_v1 }
 0x180   : > { %v733_v58 = vadd.f32 %v725_v50, %v715_v13  ;;  %v3923_v3 = vmul.f32 -1.442695, %v4707_v55 }
 0x181   : > { %v739_v40 = vadd.f32 %v731_v30, %v721_v32 }
 0x182   : > { %v4711_v60 = vadd.f32 %v743_v51, %v733_v58 }
 0x183   : > { %v695_v63 = vpop.f32.mrf.mxu2 }
 0x184   : > { %v4053_v2 = vpop.eup %4052  ;;  %v3920_v4 = vmul.f32 -1.442695, %v4711_v60  ;;  %v747_v5 = vmul.f32 %v4682_v14, %v695_v63 }
 0x185   : > { %v782_v15 = vadd.f32 1.0, %v4053_v2  ;;  %v662_v7 = vpop.f32.mrf.mxu1 }
 0x186   : > { %4054 = vpow2.f32 %v3920_v4  ;;  %v4718_v9 = vadd.f32 %v747_v5, %v737_v23  ;;  %v726_v52 = vmul.f32 %v4657_v0, %v662_v7 }
 0x187   : > { %4056 = vrcp.f32 %v782_v15  ;;  %v799_v35 = vand.u32 2147483647, %v782_v15  ;;  %v801_v56 = vand.u32 2147483648, %v782_v15  ;;  %vm795_vm6 = vweird.f32 %v782_v15 }
 0x188   : > { %4058 = vpow2.f32 %v3923_v3  ;;  %v3924_v10 = vmul.f32 -1.442695, %v4718_v9  ;;  %v734_v17 = vadd.f32 %v726_v52, %v716_v6 }
 0x189   : > { %vm800_vm7 = vcmp.eq.f32.partialorder %v799_v35, 8.507059e+37 }
 0x18a   : > { %v4724_v19 = vadd.f32 %v744_v8, %v734_v17  ;;  %4060 = vpow2.f32 %v3924_v10 }
 0x18b   : > { %v698_v21 = vpop.f32.mrf.mxu2 }
 0x18c   : > { %v4055_v24 = vpop.eup %4054  ;;  %v3921_v23 = vmul.f32 -1.442695, %v4724_v19  ;;  %v748_v1 = vmul.f32 %v4682_v14, %v698_v21 }
 0x18d   : > { %v4057_v25 = vpop.eup %4056  ;;  %v4729_v12 = vadd.f32 1.0, %v4055_v24  ;;  %v665_v27 = vpop.f32.mrf.mxu1 }
 0x18e   : > { %v4059_v28 = vpop.eup %4058  ;;  %v791_v53 = vmul.f32 %v4057_v25, %v782_v15  ;;  %4062 = vpow2.f32 %v3921_v23  ;;  %v727_v31 = vmul.f32 %v4657_v0, %v665_v27  ;;  %vm796_vm5 = vweird.f32 %v4057_v25 }
 0x18f   : > { %4064 = vrcp.f32 %v4729_v12  ;;  %v4737_v36 = vadd.f32 1.0, %v4059_v28  ;;  %v802_v0 = vor.u32 1.1754944e-38, %v801_v56  ;;  %vm797_vm8 = vmor %vm795_vm6, %vm796_vm5  ;;  %v4749_v49 = vadd.f32 %v748_v1, %v4674_v29 }
 0x190   : > { %v792_v33 = vsub.f32 1.0, %v791_v53  ;;  %v735_v37 = vadd.f32 %v727_v31, %v4647_v61  ;;  %v4061_v38 = vpop.eup %4060  ;;  %v814_v59 = vand.u32 2147483647, %v4729_v12  ;;  %v816_v29 = vand.u32 2147483648, %v4729_v12 }
 0x191   : > { %4066 = vrcp.f32 %v4737_v36  ;;  %v4745_v61 = vadd.f32 1.0, %v4061_v38  ;;  %v3925_v62 = vmul.f32 -1.442695, %v4749_v49  ;;  %vm810_vm11 = vweird.f32 %v4729_v12 }
 0x192   : > { %v793_v39 = vmul.f32 %v4057_v25, %v792_v33  ;;  %v4741_v11 = vadd.f32 %v745_v57, %v735_v37  ;;  %v817_v4 = vor.u32 1.1754944e-38, %v816_v29  ;;  %vm815_vm13 = vcmp.eq.f32.partialorder %v814_v59, 8.507059e+37 }
 0x193   : > { %v701_v34 = vpop.f32.mrf.mxu2  ;;  %vm855_vm5 = vweird.f32 %v4737_v36 }
 0x194   : > { %v4063_v41 = vpop.eup %4062  ;;  %v794_v42 = vadd.f32 %v4057_v25, %v793_v39  ;;  %v749_v44 = vmul.f32 %v4682_v14, %v701_v34  ;;  %v3922_v47 = vmul.f32 -1.442695, %v4741_v11  ;;  %v859_v39 = vand.u32 2147483647, %v4737_v36 }
 0x195   : > { %v4065_v45 = vpop.eup %4064  ;;  %v784_v46 = vadd.f32 1.0, %v4063_v41 }
 0x196   : > { %v798_v48 = vsel %vm797_vm8, %v4057_v25, %v794_v42  ;;  %v4751_v13 = vadd.f32 %v749_v44, %v739_v40  ;;  %v806_v51 = vmul.f32 %v4065_v45, %v4729_v12  ;;  %vm811_vm10 = vweird.f32 %v4065_v45 }
 0x197   : > { %v803_v50 = vsel %vm800_vm7, %v802_v0, %v798_v48  ;;  %4068 = vrcp.f32 %v784_v46  ;;  %vm812_vm12 = vmor %vm810_vm11, %vm811_vm10  ;;  %v831_v21 = vand.u32 2147483648, %v784_v46  ;;  %v829_v23 = vand.u32 2147483647, %v784_v46 }
 0x198   : > { %v4755_v14 = vmul.f32 %v803_v50, %v4695_v43  ;;  %4070 = vpow2.f32 %v3922_v47  ;;  %v3926_v54 = vmul.f32 -1.442695, %v4751_v13  ;;  %v807_v58 = vsub.f32 1.0, %v806_v51  ;;  %v4764_v43 = vpop.eup %4066 }
 0x199   : > { %4072 = vrcp.f32 %v4745_v61  ;;  %v851_v25 = vmul.f32 %v4764_v43, %v4737_v36  ;;  %vm825_vm15 = vweird.f32 %v784_v46  ;;  %v832_v27 = vor.u32 1.1754944e-38, %v831_v21 }
 0x19a   : > { %4074 = vpow2.f32 %v3926_v54  ;;  %3927 = vmatmul.msk.f32.vlgmr.msrb.gmra.mxu0 %vm921_vm9, %v4755_v14  ;;  %v808_v63 = vmul.f32 %v4065_v45, %v807_v58  ;;  %vm830_vm1 = vcmp.eq.f32.partialorder %v829_v23, 8.507059e+37  ;;  %vm856_vm8 = vweird.f32 %v4764_v43 }
 0x19b   : > { %4076 = vpow2.f32 %v3925_v62  ;;  %v852_v57 = vsub.f32 1.0, %v851_v25  ;;  %v861_v44 = vand.u32 2147483648, %v4737_v36 }
 0x19c   : > { %v809_v2 = vadd.f32 %v4065_v45, %v808_v63  ;;  %v876_v63 = vand.u32 2147483648, %v4745_v61 }
 0x19d   : > { %v4069_v3 = vpop.eup %4068  ;;  %v853_v34 = vmul.f32 %v4764_v43, %v852_v57 }
 0x19e   : > { %v4071_v5 = vpop.eup %4070  ;;  %v813_v6 = vsel %vm812_vm12, %v4065_v45, %v809_v2  ;;  %v821_v15 = vmul.f32 %v4069_v3, %v784_v46  ;;  %vm826_vm14 = vweird.f32 %v4069_v3 }
 0x19f   : > { %v4767_v7 = vpop.eup %4072  ;;  %v785_v8 = vadd.f32 1.0, %v4071_v5  ;;  %v818_v52 = vsel %vm815_vm13, %v817_v4, %v813_v6  ;;  %vm827_vm0 = vmor %vm825_vm15, %vm826_vm14  ;;  %v854_v51 = vadd.f32 %v4764_v43, %v853_v34  ;;  %v874_v5 = vand.u32 2147483647, %v4745_v61 }
 0x1a0   : > { %v4075_v10 = vpop.eup %4074  ;;  %v4770_v17 = vmul.f32 %v818_v52, %v4711_v60  ;;  %v822_v18 = vsub.f32 1.0, %v821_v15  ;;  %v866_v60 = vmul.f32 %v4767_v7, %v4745_v61  ;;  %vm871_vm12 = vweird.f32 %v4767_v7 }
 0x1a1   : > { %4078 = vrcp.f32 %v785_v8  ;;  %v4772_v20 = vadd.f32 1.0, %v4075_v10  ;;  %v4077_v26 = vpop.eup %4076  ;;  %v846_v1 = vand.u32 2147483648, %v785_v8  ;;  %v844_v42 = vand.u32 2147483647, %v785_v8 }
 0x1a2   : > { %3928 = vmatmul.msk.f32.gmra.mxu0 %vm921_vm9, %v4770_v17  ;;  %1800 = vst [vmem:[#allocation1] sm:$0xff] %v4770_v17  ;;  %v823_v24 = vmul.f32 %v4069_v3, %v822_v18  ;;  %v4782_v53 = vadd.f32 1.0, %v4077_v26  ;;  %v867_v31 = vsub.f32 1.0, %v866_v60  ;;  %vm840_vm7 = vweird.f32 %v785_v8 }
 0x1a3   : > { %4080 = vrcp.f32 %v4772_v20  ;;  %v906_v0 = vand.u32 2147483648, %v4772_v20  ;;  %v904_v46 = vand.u32 2147483647, %v4772_v20  ;;  %v847_v48 = vor.u32 1.1754944e-38, %v846_v1 }
 0x1a4   : > { %v824_v12 = vadd.f32 %v4069_v3, %v823_v24  ;;  %4082 = vrcp.f32 %v4782_v53  ;;  %vm900_vm13 = vweird.f32 %v4772_v20  ;;  %vm845_vm14 = vcmp.eq.f32.partialorder %v844_v42, 8.507059e+37 }
 0x1a5   : > { %v907_v29 = vor.u32 1.1754944e-38, %v906_v0  ;;  %v862_v52 = vor.u32 1.1754944e-38, %v861_v44  ;;  %v877_v10 = vor.u32 1.1754944e-38, %v876_v63  ;;  %v891_v25 = vand.u32 2147483648, %v4782_v53 }
 0x1a6   : > { %v828_v28 = vsel %vm827_vm0, %v4069_v3, %v824_v12  ;;  %vm870_vm0 = vweird.f32 %v4745_v61 }
 0x1a7   : > { %v4079_v30 = vpop.eup %4078  ;;  %v833_v32 = vsel %vm830_vm1, %v832_v27, %v828_v28  ;;  %vm905_vm1 = vcmp.eq.f32.partialorder %v904_v46, 8.507059e+37  ;;  %v892_v26 = vor.u32 1.1754944e-38, %v891_v25 }
 0x1a8   : > { %v4785_v33 = vmul.f32 %v833_v32, %v4724_v19  ;;  %v836_v35 = vmul.f32 %v4079_v30, %v785_v8  ;;  %v868_v19 = vmul.f32 %v4767_v7, %v867_v31  ;;  %vm841_vm6 = vweird.f32 %v4079_v30 }
 0x1a9   : > { %v4081_v56 = vpop.eup %4080  ;;  %vm842_vm11 = vmor %vm840_vm7, %vm841_vm6  ;;  %v4817_v15 = vld [vmem:[#allocation1 + $0x7] ss:$9 sm:$0xff] }
 0x1aa   : > { %v896_v37 = vmul.f32 %v4081_v56, %v4772_v20  ;;  %3929 = vmatmul.msk.f32.gmra.mxu0 %vm921_vm9, %v4785_v33  ;;  %v837_v38 = vsub.f32 1.0, %v836_v35  ;;  %vm901_vm10 = vweird.f32 %v4081_v56  ;;  %v869_v50 = vadd.f32 %v4767_v7, %v868_v19  ;;  %v4083_v59 = vpop.eup %4082  ;;  %vm4812_vm6 = vmor %vm855_vm5, %vm856_vm8 }
 0x1ab   : > { %vm902_vm15 = vmor %vm900_vm13, %vm901_vm10  ;;  %v858_v8 = vsel %vm4812_vm6, %v4764_v43, %v854_v51  ;;  %v881_v61 = vmul.f32 %v4083_v59, %v4782_v53  ;;  %vm860_vm5 = vcmp.eq.f32.partialorder %v859_v39, 8.507059e+37  ;;  %vm875_vm8 = vcmp.eq.f32.partialorder %v874_v5, 8.507059e+37 }
 0x1ac   : > { %v897_v40 = vsub.f32 1.0, %v896_v37  ;;  %v838_v41 = vmul.f32 %v4079_v30, %v837_v38  ;;  %vm872_vm7 = vmor %vm870_vm0, %vm871_vm12  ;;  %v863_v43 = vsel %vm860_vm5, %v862_v52, %v858_v8  ;;  %vm886_vm10 = vweird.f32 %v4083_v59 }
 0x1ad   : > { %v873_v36 = vsel %vm872_vm7, %v4767_v7, %v869_v50  ;;  %v882_v20 = vsub.f32 1.0, %v881_v61  ;;  %vm1763_vm0 = vcmask 1044484   ;;  %vm1769_vm6 = vcmask 1046534  }
 0x1ae   : > { %v898_v45 = vmul.f32 %v4081_v56, %v897_v40  ;;  %v839_v47 = vadd.f32 %v4079_v30, %v838_v41  ;;  %v878_v18 = vsel %vm875_vm8, %v877_v10, %v873_v36  ;;  %vm1772_vm7 = vcmask 1047559  }
 0x1af   : > { %v4835_v21 = vmul.f32 %v878_v18, %v4718_v9  ;;  %v883_v7 = vmul.f32 %v4083_v59, %v882_v20 }
 0x1b0   : > { %v899_v54 = vadd.f32 %v4081_v56, %v898_v45  ;;  %v843_v58 = vsel %vm842_vm11, %v4079_v30, %v839_v47  ;;  %vm885_vm11 = vweird.f32 %v4782_v53 }
 0x1b1   : > { %v848_v62 = vsel %vm845_vm14, %v847_v48, %v843_v58  ;;  %v884_v23 = vadd.f32 %v4083_v59, %v883_v7  ;;  %vm887_vm12 = vmor %vm885_vm11, %vm886_vm10  ;;  %vm1754_vm14 = vcmask 1041409  }
 0x1b2   : > { %v903_v2 = vsel %vm902_vm15, %v4081_v56, %v899_v54  ;;  %v4806_v3 = vmul.f32 %v848_v62, %v4741_v11  ;;  %vm1760_vm15 = vcmask 1043459  }
 0x1b3   : > { %v908_v6 = vsel %vm905_vm1, %v907_v29, %v903_v2  ;;  %v888_v9 = vsel %vm887_vm12, %v4083_v59, %v884_v23  ;;  %vm1766_vm1 = vcmask 1045509  }
 0x1b4   : > { %v917_v11 = vmul.f32 %v908_v6, %v4751_v13  ;;  %3930 = vmatmul.msk.f32.gmra.mxu0 %vm921_vm9, %v4806_v3  ;;  %2444 = vst [vmem:[#allocation1] sm:$0xff] %v4806_v3  ;;  %v4832_v13 = vmul.f32 %v863_v43, %v4707_v55  ;;  %v889_v55 = vand.u32 2147483647, %v4782_v53 }
 0x1b6   : > { %3934 = vmatmul.msk.f32.vlgmr.msrb.gmra.mxu3 %vm921_vm9, %v917_v11  ;;  %vm890_vm13 = vcmp.eq.f32.partialorder %v889_v55, 8.507059e+37 }
 0x1b7   : > { %v893_v12 = vsel %vm890_vm13, %v892_v26, %v888_v9 }
 0x1b8   : > { %v4850_v27 = vmul.f32 %v893_v12, %v4749_v49  ;;  %v4050_v49 = vld [vmem:[%s6100_s5] ss:$0 sm:$0xff] }
 0x1bb   : > { %v4837_v24 = vld [vmem:[#allocation1 + $0x7] ss:$9 sm:$0xff] }
 0x1bc   : > { %3931 = vmatmul.msk.f32.gmra.mxu0 %vm921_vm9, %v4832_v13  ;;  %3088 = vst [vmem:[#allocation1] sm:$0xff] %v4835_v21 }
 0x1c3   : > { %v4845_v60 = vld [vmem:[#allocation1 + $0x7] ss:$9 sm:$0xff] }
 0x1c4   : > { %3932 = vmatmul.msk.f32.gmra.mxu0 %vm921_vm9, %v4835_v21  ;;  %3732 = vst [vmem:[#allocation1] sm:$0xff] %v917_v11 }
 0x1cc   : > { %3933 = vmatmul.msk.f32.gmra.mxu0 %vm921_vm9, %v4850_v27 }
 0x217   : > { %v4854_v28 = vpop.f32.mrf.mxu0 }
 0x218   : > { %v4896_v54 = vadd.f32 %v4050_v49, %v4854_v28 }
 0x21a   : > { %v1007_v6 = vand.u32 2147483647, %v4896_v54 }
 0x21c   : > { %v1015_v43 = vsub.f32 0.0, %v1007_v6 }
 0x21e   : > { %v1023_v55 = vmul.f32 1.442695, %v1015_v43 }
 0x21f   : > { %v4856_v30 = vpop.f32.mrf.mxu0 }
 0x220   : > { %v1298_v53 = vperm.slane %v4856_v30, 7  ;;  %v4890_v46 = vadd.f32 %v4050_v49, %v4856_v30 }
 0x222   : > { %1300 = vrot.lane.b32.xlu0 %v1298_v53, %s4393_s29  ;;  %v1008_v59 = vand.u32 2147483647, %v4890_v46  ;;  %v1306_v53 = vlaneseq }
 0x224   : > { %v1016_v36 = vsub.f32 0.0, %v1008_v59 }
 0x226   : > { %v1025_v20 = vmul.f32 1.442695, %v1016_v36 }
 0x227   : > { %v4859_v32 = vpop.f32.mrf.mxu0 }
 0x228   : > { %v4880_v41 = vadd.f32 %v4050_v49, %v4859_v32 }
 0x22a   : > { %v1009_v51 = vand.u32 2147483647, %v4880_v41 }
 0x22c   : > { %v1017_v2 = vsub.f32 0.0, %v1009_v51 }
 0x22e   : > { %v1027_v10 = vmul.f32 1.442695, %v1017_v2 }
 0x231   : > { %v4861_v57 = vpop.f32.mrf.mxu0 }
 0x232   : > { %v1950_v31 = vperm.slane %v4861_v57, 7  ;;  %v4877_v19 = vadd.f32 %v4050_v49, %v4861_v57 }
 0x234   : > { %1952 = vrot.lane.b32.xlu0 %v1950_v31, %s4393_s29  ;;  %v1010_v47 = vand.u32 2147483647, %v4877_v19 }
 0x236   : > { %v1018_v29 = vsub.f32 0.0, %v1010_v47 }
 0x238   : > { %v1029_v61 = vmul.f32 1.442695, %v1018_v29 }
 0x239   : > { %v4867_v35 = vpop.f32.mrf.mxu0  ;;  %v4869_v56 = vpop.f32.mrf.mxu3 }
 0x23a   : > { %v998_v37 = vadd.f32 %v4050_v49, %v4869_v56  ;;  %v3238_v38 = vperm.slane %v4869_v56, 7  ;;  %v4874_v1 = vadd.f32 %v4050_v49, %v4867_v35 }
 0x23c   : > { %v1014_v39 = vand.u32 2147483647, %v998_v37  ;;  %3240 = vrot.lane.b32.xlu0 %v3238_v38, %s4393_s29  ;;  %v1011_v42 = vand.u32 2147483647, %v4874_v1  ;;  %v1006_v26 = vmax.f32 %v998_v37, 0.0  ;;  %v1307_v38 = vshrl.u32 %v1306_v53, 7 }
 0x23e   : > { %v1022_v34 = vsub.f32 0.0, %v1014_v39  ;;  %v1019_v50 = vsub.f32 0.0, %v1011_v42  ;;  %v4906_v42 = vadd.s32 32, %v1307_v38 }
 0x240   : > { %v1037_v40 = vmul.f32 1.442695, %v1022_v34  ;;  %v1031_v4 = vmul.f32 1.442695, %v1019_v50  ;;  %3973 = vset.pattern.permute.xlu2 %v4906_v42  ;;  %3971 = vset.pattern.permute.xlu1 %v4906_v42 }
 0x241   : > { %v4883_v0 = vpop.f32.mrf.mxu0 }
 0x242   : > { %v4886_v44 = vadd.f32 %v4050_v49, %v4883_v0  ;;  %v2594_v45 = vperm.slane %v4883_v0, 7  ;;  %4084 = vpow2.f32 %v1037_v40 }
 0x244   : > { %v1012_v48 = vand.u32 2147483647, %v4886_v44  ;;  %2596 = vrot.lane.b32.xlu0 %v2594_v45, %s4393_s29  ;;  %v4908_v45 = vadd.s32 24, %v1307_v38  ;;  %s415_s29 = scalar_lea.vmem %s6107_s12, %s3885_s9 }
 0x246   : > { %v1020_v58 = vsub.f32 0.0, %v1012_v48  ;;  %3970 = vset.pattern.permute.xlu0 %v4908_v45 }
 0x248   : > { %v1033_v62 = vmul.f32 1.442695, %v1020_v58  ;;  %v4085_v63 = vpop.eup %4084 }
 0x249   : > { %v4899_v5 = vpop.f32.mrf.mxu0  ;;  %v1046_v8 = vadd.f32 1.0, %v4085_v63 }
 0x24a   : > { %v997_v11 = vadd.f32 %v4050_v49, %v4899_v5  ;;  %4086 = vpow2.f32 %v1033_v62 }
 0x24b   : > { %4088 = vlog2.f32 %v1046_v8 }
 0x24c   : > { %v1013_v52 = vand.u32 2147483647, %v997_v11  ;;  %4090 = vpow2.f32 %v1031_v4  ;;  %v1005_v4 = vmax.f32 %v997_v11, 0.0  ;;  %v1002_v11 = vmax.f32 %v4877_v19, 0.0 }
 0x24d   : > { %4092 = vpow2.f32 %v1029_v61  ;;  %v1004_v61 = vmax.f32 %v4886_v44, 0.0 }
 0x24e   : > { %v1021_v18 = vsub.f32 0.0, %v1013_v52  ;;  %4094 = vpow2.f32 %v1027_v10 }
 0x250   : > { %v1035_v7 = vmul.f32 1.442695, %v1021_v18  ;;  %v4087_v23 = vpop.eup %4086  ;;  %v1003_v18 = vmax.f32 %v4874_v1, 0.0 }
 0x251   : > { %v4089_v25 = vpop.eup %4088  ;;  %v1044_v49 = vadd.f32 1.0, %v4087_v23 }
 0x252   : > { %4096 = vpow2.f32 %v1035_v7  ;;  %v4091_v9 = vpop.eup %4090  ;;  %v1062_v12 = vmul.f32 0.6931472, %v4089_v25 }
 0x253   : > { %4098 = vpow2.f32 %v1025_v20  ;;  %v4093_v39 = vpop.eup %4092  ;;  %v1043_v34 = vadd.f32 1.0, %v4091_v9  ;;  %v1001_v9 = vmax.f32 %v4880_v41, 0.0 }
 0x254   : > { %v4903_v31 = vadd.f32 %v1062_v12, %v1006_v26  ;;  %4100 = vpow2.f32 %v1023_v55  ;;  %v4095_v40 = vpop.eup %4094  ;;  %v1042_v37 = vadd.f32 1.0, %v4093_v39  ;;  %v1000_v12 = vmax.f32 %v4890_v46, 0.0  ;;  %v1079_v39 = vld [vmem:[%s6105_s10] sm:$0xff]  ;;  %v1080_v46 = vld [vmem:[%s6105_s10 + $0x8] sm:$0xff] }
 0x255   : > { %4102 = vlog2.f32 %v1044_v49  ;;  %v1041_v50 = vadd.f32 1.0, %v4095_v40  ;;  %v999_v49 = vmax.f32 %v4896_v54, 0.0 }
 0x256   : > { %1119 = vmatpush.msra.mxu3 %v4903_v31  ;;  %4104 = vlog2.f32 %v1043_v34 }
 0x258   : > { %v4097_v47 = vpop.eup %4096 }
 0x259   : > { %v1045_v48 = vadd.f32 1.0, %v4097_v47  ;;  %v4099_v51 = vpop.eup %4098 }
 0x25a   : > { %v4101_v58 = vpop.eup %4100  ;;  %v1040_v59 = vadd.f32 1.0, %v4099_v51  ;;  %v1081_v51 = vld [vmem:[%s6105_s10 + $0x10] sm:$0xff] }
 0x25b   : > { %4106 = vlog2.f32 %v1045_v48  ;;  %v4103_v29 = vpop.eup %4102  ;;  %v1039_v62 = vadd.f32 1.0, %v4101_v58 }
 0x25c   : > { %4108 = vlog2.f32 %v1042_v37  ;;  %v4105_v63 = vpop.eup %4104  ;;  %v1058_v8 = vmul.f32 0.6931472, %v4103_v29 }
 0x25d   : > { %4110 = vlog2.f32 %v1041_v50  ;;  %v1056_v10 = vmul.f32 0.6931472, %v4105_v63 }
 0x25e   : > { %4112 = vlog2.f32 %v1040_v59  ;;  %v4918_v20 = vadd.f32 %v1058_v8, %v1004_v61 }
 0x25f   : > { %4114 = vlog2.f32 %v1039_v62  ;;  %v4922_v25 = vadd.f32 %v1056_v10, %v1003_v18 }
 0x261   : > { %v4107_v2 = vpop.eup %4106 }
 0x262   : > { %v1060_v6 = vmul.f32 0.6931472, %v4107_v2  ;;  %v4109_v36 = vpop.eup %4108 }
 0x263   : > { %v4111_v43 = vpop.eup %4110  ;;  %v1054_v7 = vmul.f32 0.6931472, %v4109_v36 }
 0x264   : > { %v4914_v52 = vadd.f32 %v1060_v6, %v1005_v4  ;;  %v4113_v23 = vpop.eup %4112  ;;  %v1052_v55 = vmul.f32 0.6931472, %v4111_v43  ;;  %v1082_v6 = vld [vmem:[%s6105_s10 + $0x18] sm:$0xff] }
 0x265   : > { %v4115_v44 = vpop.eup %4114  ;;  %v4926_v26 = vadd.f32 %v1054_v7, %v1002_v11  ;;  %v1050_v1 = vmul.f32 0.6931472, %v4113_v23  ;;  %v5004_v7 = vld [vmem:[%s6101_s6] sm:$0xff] }
 0x266   : > { %1120 = vmatpush.msra.mxu3 %v4914_v52  ;;  %v4930_v53 = vadd.f32 %v1052_v55, %v1001_v9  ;;  %v1048_v19 = vmul.f32 0.6931472, %v4115_v44 }
 0x267   : > { %v4934_v38 = vadd.f32 %v1050_v1, %v1000_v12 }
 0x268   : > { %1121 = vmatpush.msra.mxu3 %v4918_v20  ;;  %v4937_v41 = vadd.f32 %v1048_v19, %v999_v49 }
 0x26a   : > { %1122 = vmatpush.msra.mxu3 %v4922_v25 }
 0x26c   : > { %1123 = vmatpush.msra.mxu3 %v4926_v26 }
 0x26e   : > { %1124 = vmatpush.msra.mxu3 %v4930_v53 }
 0x270   : > { %1125 = vmatpush.msra.mxu3 %v4934_v38 }
 0x272   : > { %1126 = vmatpush.msra.mxu3 %v4937_v41 }
 0x273   : > { %3935 = vmatmul.msk.f32.vlgmr.msra.gmra.mxu3 %vm542_vm4, %v1079_v39 }
 0x27b   : > { %3936 = vmatmul.msk.f32.gmra.mxu3 %vm542_vm4, %v1080_v46 }
 0x283   : > { %3937 = vmatmul.msk.f32.gmra.mxu3 %vm542_vm4, %v1081_v51 }
 0x28b   : > { %3938 = vmatmul.msk.f32.gmra.mxu3 %vm542_vm4, %v1082_v6 }
 0x294   : > { %v1301_v54 = vpop.permute.xlu0 %1300 }
 0x295   : > { %v1303_v34 = vmul.f32 %v1301_v54, %v4854_v28  ;;  %v4962_v58 = vmul.f32 %v1301_v54, %v4856_v30 }
 0x297   : > { %v1318_v40 = vperm.slane %v1303_v34, 1  ;;  %v1305_v47 = vperm.slane %v1303_v34, 0  ;;  %v1331_v48 = vperm.slane %v1303_v34, 2  ;;  %v1344_v37 = vperm.slane %v1303_v34, 3 }
 0x298   : > { %v1383_v28 = vperm.slane %v1303_v34, 6  ;;  %v1357_v50 = vperm.slane %v1303_v34, 4  ;;  %v1370_v59 = vperm.slane %v1303_v34, 5  ;;  %v1409_v29 = vperm.slane %v4962_v58, 0 }
 0x299   : > { %1329 = vperm.xlu2 %3973, %v1318_v40   ;;  %1316 = vperm.xlu1 %3971, %v1305_v47   ;;  %v1396_v62 = vperm.slane %v1303_v34, 7  ;;  %v1448_v63 = vperm.slane %v4962_v58, 3  ;;  %v1474_v30 = vperm.slane %v4962_v58, 5  ;;  %v1422_v2 = vperm.slane %v4962_v58, 1 }
 0x29a   : > { %1310 = vperm.xlu0 %3970, %v1305_v47   ;;  %v1435_v61 = vperm.slane %v4962_v58, 2  ;;  %v1461_v46 = vperm.slane %v4962_v58, 4 }
 0x2a1   : > { %3974 = vset.pattern.permute.xlu2 %v4908_v45  ;;  %3972 = vset.pattern.permute.xlu1 %v4908_v45 }
 0x2a2   : > { %3976 = vset.pattern.permute.xlu0 %v4906_v42 }
 0x2a6   : > { %v4975_v4 = vpop.permute.xlu0 %1952 }
 0x2a7   : > { %v4985_v8 = vmul.f32 %v4975_v4, %v4859_v32  ;;  %v4999_v32 = vld [vmem:[%s6101_s6 + $0x8] sm:$0xff] }
 0x2a9   : > { %1336 = vperm.xlu2 %3974, %v1331_v48   ;;  %1323 = vperm.xlu1 %3972, %v1318_v40   ;;  %v6110_v43 = vperm.slane %v4985_v8, 1  ;;  %v6111_v54 = vperm.slane %v4985_v8, 3 }
 0x2aa   : > { %1355 = vperm.xlu0 %3976, %v1344_v37  }
 0x2ae   : > { %v4992_v18 = vpop.permute.xlu0 %3240 }
 0x2b1   : > { %1349 = vperm.xlu2 %3974, %v1344_v37   ;;  %3975 = vset.pattern.permute.xlu1 %v4906_v42 }
 0x2b2   : > { %3979 = vset.pattern.permute.xlu0 %v4908_v45 }
 0x2b6   : > { %v5012_v12 = vpop.permute.xlu0 %2596 }
 0x2b9   : > { %3978 = vset.pattern.permute.xlu2 %v4906_v42  ;;  %1342 = vperm.xlu1 %3975, %v1331_v48  }
 0x2ba   : > { %1388 = vperm.xlu0 %3979, %v1383_v28  }
 0x2c1   : > { %1368 = vperm.xlu2 %3978, %v1357_v50   ;;  %3977 = vset.pattern.permute.xlu1 %v4908_v45 }
 0x2c2   : > { %3982 = vset.pattern.permute.xlu0 %v4906_v42 }
 0x2c9   : > { %1381 = vperm.xlu2 %3978, %v1370_v59   ;;  %1362 = vperm.xlu1 %3977, %v1357_v50  }
 0x2ca   : > { %1420 = vperm.xlu0 %3982, %v1409_v29  }
 0x2d1   : > { %3981 = vset.pattern.permute.xlu2 %v4908_v45  ;;  %1375 = vperm.xlu1 %3977, %v1370_v59  }
 0x2d2   : > { %3985 = vset.pattern.permute.xlu0 %v4908_v45 }
 0x2d9   : > { %1401 = vperm.xlu2 %3981, %v1396_v62   ;;  %3980 = vset.pattern.permute.xlu1 %v4906_v42 }
 0x2da   : > { %1453 = vperm.xlu0 %3985, %v1448_v63  }
 0x2e1   : > { %1414 = vperm.xlu2 %3981, %v1409_v29   ;;  %1394 = vperm.xlu1 %3980, %v1383_v28  }
 0x2e2   : > { %3988 = vset.pattern.permute.xlu0 %v4906_v42 }
 0x2e9   : > { %3984 = vset.pattern.permute.xlu2 %v4906_v42  ;;  %1407 = vperm.xlu1 %3980, %v1396_v62  }
 0x2ea   : > { %1485 = vperm.xlu0 %3988, %v1474_v30  }
 0x2f1   : > { %1433 = vperm.xlu2 %3984, %v1422_v2   ;;  %3983 = vset.pattern.permute.xlu1 %v4908_v45 }
 0x2f2   : > { %3991 = vset.pattern.permute.xlu0 %v4908_v45 }
 0x2f3   : > { %v1330_v49 = vpop.permute.xlu2 %1329 }
 0x2f6   : > { %v4987_v36 = vpop.f32.mrf.mxu3 }
 0x2f7   : > { %v1170_v10 = vperm.slane %v4987_v36, 0  ;;  %v1156_v9 = vrot.slane %v4987_v36, 1  ;;  %v1158_v1 = vrot.slane %v4987_v36, 3 }
 0x2f9   : > { %1446 = vperm.xlu2 %3984, %v1435_v61   ;;  %1427 = vperm.xlu1 %3983, %v1422_v2   ;;  %v1203_v23 = vmul.f32 %v1170_v10, %v4999_v32  ;;  %v1202_v11 = vmul.f32 %v1170_v10, %v5004_v7  ;;  %v1171_v19 = vperm.slane %v1156_v9, 0  ;;  %v1173_v39 = vperm.slane %v1158_v1, 0 }
 0x2fa   : > { %1975 = vperm.xlu0 %3991, %v6110_v43   ;;  %v1157_v9 = vrot.slane %v4987_v36, 2 }
 0x2fb   : > { %v1236_v55 = vmul.f32 1.442695, %v1203_v23  ;;  %v1234_v44 = vmul.f32 1.442695, %v1202_v11  ;;  %v1205_v40 = vmul.f32 %v1171_v19, %v4999_v32  ;;  %v1208_v48 = vmul.f32 %v1173_v39, %v5004_v7  ;;  %v1083_v11 = vld [vmem:[%s6105_s10 + $0x20] sm:$0xff] }
 0x2fc   : > { %v1204_v28 = vmul.f32 %v1171_v19, %v5004_v7  ;;  %v1209_v59 = vmul.f32 %v1173_v39, %v4999_v32  ;;  %3939 = vmatmul.msk.f32.gmra.mxu3 %vm542_vm4, %v1083_v11  ;;  %v1172_v39 = vperm.slane %v1157_v9, 0 }
 0x2fd   : > { %4116 = vpow2.f32 %v1236_v55  ;;  %v1240_v62 = vmul.f32 1.442695, %v1205_v40  ;;  %v1246_v6 = vmul.f32 1.442695, %v1208_v48 }
 0x2fe   : > { %4118 = vpow2.f32 %v1234_v44  ;;  %v1238_v23 = vmul.f32 1.442695, %v1204_v28  ;;  %v1248_v44 = vmul.f32 1.442695, %v1209_v59 }
 0x2ff   : > { %4120 = vpow2.f32 %v1240_v62 }
 0x300   : > { %4122 = vpow2.f32 %v1246_v6 }
 0x301   : > { %3987 = vset.pattern.permute.xlu2 %v4908_v45  ;;  %1440 = vperm.xlu1 %3983, %v1435_v61   ;;  %4124 = vpow2.f32 %v1238_v23 }
 0x302   : > { %3994 = vset.pattern.permute.xlu0 %v4906_v42  ;;  %4126 = vpow2.f32 %v1248_v44 }
 0x303   : > { %v4117_v34 = vpop.eup %4116  ;;  %v5023_v2 = vpop.permute.xlu2 %1336 }
 0x304   : > { %v4119_v47 = vpop.eup %4118 }
 0x305   : > { %v4121_v40 = vpop.eup %4120 }
 0x306   : > { %v4123_v48 = vpop.eup %4122 }
 0x307   : > { %v4125_v28 = vpop.eup %4124 }
 0x309   : > { %1466 = vperm.xlu2 %3987, %v1461_v46   ;;  %3986 = vset.pattern.permute.xlu1 %v4906_v42 }
 0x30a   : > { %2007 = vperm.xlu0 %3994, %v6111_v54  }
 0x30b   : > { %v1317_v37 = vpop.permute.xlu1 %1316 }
 0x30c   : > { %v1514_v51 = vmul.f32 %v4117_v34, %v1317_v37  ;;  %v1311_v50 = vpop.permute.xlu0 %1310 }
 0x30d   : > { %v1513_v29 = vmul.f32 %v4119_v47, %v1311_v50  ;;  %v1084_v47 = vld [vmem:[%s6105_s10 + $0x28] sm:$0xff]  ;;  %v4127_v50 = vpop.eup %4126 }
 0x30e   : > { %v1546_v61 = vsel %vm921_vm9, %v1514_v51, 0.0  ;;  %3940 = vmatmul.msk.f32.gmra.mxu3 %vm542_vm4, %v1084_v47  ;;  %v1206_v51 = vmul.f32 %v1172_v39, %v5004_v7 }
 0x30f   : > { %v1545_v10 = vsel %vm921_vm9, %v1513_v29, 0.0  ;;  %v1516_v29 = vmul.f32 %v4121_v40, %v1330_v49  ;;  %v1085_v40 = vld [vmem:[%s6105_s10 + $0x30] sm:$0xff] }
 0x310   : > { %v1547_v55 = vadd.f32 %v1546_v61, %v1545_v10  ;;  %v1207_v61 = vmul.f32 %v1172_v39, %v4999_v32  ;;  %v5047_v10 = vmul.f32 %v4937_v41, %v4755_v14  ;;  %v1242_v44 = vmul.f32 1.442695, %v1206_v51 }
 0x311   : > { %1479 = vperm.xlu2 %3987, %v1474_v30   ;;  %1459 = vperm.xlu1 %3986, %v1448_v63   ;;  %v1350_v30 = vpop.permute.xlu2 %1349  ;;  %v6108_v63 = vperm.slane %v4985_v8, 6  ;;  %v1555_v49 = vsel %vm921_vm9, %v1516_v29, 0.0 }
 0x312   : > { %v1548_v1 = vrot.slane %v1547_v55, 4  ;;  %3997 = vset.pattern.permute.xlu0 %v4908_v45  ;;  %v1519_v62 = vmul.f32 %v4123_v48, %v1350_v30  ;;  %v1244_v41 = vmul.f32 1.442695, %v1207_v61  ;;  %4128 = vpow2.f32 %v1242_v44 }
 0x313   : > { %v1159_v30 = vrot.slane %v4987_v36, 4  ;;  %v1500_v44 = vperm.slane %v4962_v58, 7 }
 0x314   : > { %v1549_v19 = vadd.f32 %v1548_v1, %v1547_v55  ;;  %v1572_v39 = vsel %vm921_vm9, %v1519_v62, 0.0  ;;  %4130 = vpow2.f32 %v1244_v41 }
 0x315   : > { %v1174_v62 = vperm.slane %v1159_v30, 0 }
 0x316   : > { %v1550_v34 = vrot.slane %v1549_v19, 2  ;;  %3941 = vmatmul.msk.f32.gmra.mxu3 %vm542_vm4, %v1085_v40 }
 0x318   : > { %v1551_v37 = vadd.f32 %v1550_v34, %v1549_v19  ;;  %v1487_v19 = vperm.slane %v4962_v58, 6  ;;  %v1691_v58 = vrot.slane %v5047_v10, 1 }
 0x319   : > { %3990 = vset.pattern.permute.xlu2 %v4906_v42  ;;  %1472 = vperm.xlu1 %3986, %v1461_v46  }
 0x31a   : > { %v1552_v59 = vrot.slane %v1551_v37, 1  ;;  %2040 = vperm.xlu0 %3997, %v6108_v63  }
 0x31b   : > { %v1324_v6 = vpop.permute.xlu1 %1323  ;;  %v5061_v48 = vpop.permute.xlu2 %1368 }
 0x31c   : > { %v1553_v23 = vadd.f32 %v1552_v59, %v1551_v37  ;;  %v1515_v11 = vmul.f32 %v4125_v28, %v1324_v6  ;;  %v1356_v55 = vpop.permute.xlu0 %1355  ;;  %v5070_v59 = vmul.f32 %v4975_v4, %v4861_v57  ;;  %v1160_v57 = vrot.slane %v4987_v36, 5 }
 0x31d   : > { %v1520_v9 = vmul.f32 %v4127_v50, %v1356_v55  ;;  %v5066_v50 = vpop.f32.mrf.mxu3 }
 0x31e   : > { %v5050_v46 = vmul.f32 %v1553_v23, %v5047_v10  ;;  %v1554_v1 = vsel %vm921_vm9, %v1515_v11, 0.0  ;;  %v1178_v23 = vperm.slane %v5066_v50, 0  ;;  %v4129_v11 = vpop.eup %4128 }
 0x31f   : > { %v1556_v34 = vadd.f32 %v1555_v49, %v1554_v1  ;;  %v1573_v14 = vsel %vm921_vm9, %v1520_v9, 0.0  ;;  %v6109_v1 = vperm.slane %v5070_v59, 0  ;;  %v4131_v49 = vpop.eup %4130  ;;  %v1517_v4 = vmul.f32 %v4129_v11, %v5023_v2 }
 0x320   : > { %v1574_v47 = vadd.f32 %v1573_v14, %v1572_v39  ;;  %v1211_v39 = vmul.f32 %v1174_v62, %v4999_v32  ;;  %v1218_v41 = vmul.f32 %v1178_v23, %v5004_v7  ;;  %v1219_v2 = vmul.f32 %v1178_v23, %v4999_v32  ;;  %v1086_v23 = vld [vmem:[%s6105_s10 + $0x38] sm:$0xff] }
 0x321   : > { %v1557_v37 = vrot.slane %v1556_v34, 4  ;;  %1498 = vperm.xlu2 %3990, %v1487_v19   ;;  %3989 = vset.pattern.permute.xlu1 %v4908_v45  ;;  %v1563_v11 = vsel %vm921_vm9, %v1517_v4, 0.0 }
 0x322   : > { %v1575_v28 = vrot.slane %v1574_v47, 4  ;;  %4000 = vset.pattern.permute.xlu0 %v4906_v42  ;;  %3942 = vmatmul.msk.f32.gmra.mxu3 %vm542_vm4, %v1086_v23  ;;  %vm1757_vm4 = vcmask 1042434  }
 0x323   : > { %v1558_v51 = vadd.f32 %v1557_v37, %v1556_v34  ;;  %v1210_v37 = vmul.f32 %v1174_v62, %v5004_v7  ;;  %v1957_v62 = vperm.slane %v4985_v8, 0 }
 0x324   : > { %v1576_v29 = vadd.f32 %v1575_v28, %v1574_v47  ;;  %v5082_v47 = vpop.permute.xlu2 %1381  ;;  %v1693_v28 = vrot.slane %v5047_v10, 3 }
 0x325   : > { %v1559_v6 = vrot.slane %v1558_v51, 2  ;;  %v1250_v54 = vmul.f32 1.442695, %v1210_v37 }
 0x326   : > { %v1577_v61 = vrot.slane %v1576_v29, 2 }
 0x327   : > { %v1560_v55 = vadd.f32 %v1559_v6, %v1558_v51 }
 0x328   : > { %v1578_v9 = vadd.f32 %v1577_v61, %v1576_v29  ;;  %v1252_v29 = vmul.f32 1.442695, %v1211_v39  ;;  %v1175_v61 = vperm.slane %v1160_v57, 0 }
 0x329   : > { %v1561_v34 = vrot.slane %v1560_v55, 1  ;;  %1511 = vperm.xlu2 %3990, %v1500_v44   ;;  %1492 = vperm.xlu1 %3989, %v1487_v19  }
 0x32a   : > { %v1579_v14 = vrot.slane %v1578_v9, 1  ;;  %2072 = vperm.xlu0 %4000, %v6109_v1   ;;  %4132 = vpow2.f32 %v1252_v29  ;;  %v1213_v39 = vmul.f32 %v1175_v61, %v4999_v32  ;;  %v1692_v29 = vrot.slane %v5047_v10, 2 }
 0x32b   : > { %v1562_v40 = vadd.f32 %v1561_v34, %v1560_v55  ;;  %v1343_v30 = vpop.permute.xlu1 %1342  ;;  %v1266_v34 = vmul.f32 1.442695, %v1218_v41  ;;  %v1212_v41 = vmul.f32 %v1175_v61, %v5004_v7 }
 0x32c   : > { %v1580_v51 = vadd.f32 %v1579_v14, %v1578_v9  ;;  %v1518_v19 = vmul.f32 %v4131_v49, %v1343_v30  ;;  %v1268_v9 = vmul.f32 1.442695, %v1219_v2 }
 0x32d   : > { %v1722_v6 = vmul.f32 %v1691_v58, %v1562_v40  ;;  %4134 = vpow2.f32 %v1266_v34  ;;  %v5103_v58 = vpop.permute.xlu0 %1388  ;;  %v1256_v40 = vmul.f32 1.442695, %v1213_v39  ;;  %v1254_v37 = vmul.f32 1.442695, %v1212_v41 }
 0x32e   : > { %v5088_v63 = vmul.f32 %v1693_v28, %v1580_v51  ;;  %v1564_v55 = vsel %vm921_vm9, %v1518_v19, 0.0  ;;  %4136 = vpow2.f32 %v1250_v54 }
 0x32f   : > { %v1753_v1 = vrot.slane %v1722_v6, 7  ;;  %v1565_v43 = vadd.f32 %v1564_v55, %v1563_v11  ;;  %4138 = vpow2.f32 %v1268_v9 }
 0x330   : > { %4140 = vpow2.f32 %v1256_v40 }
 0x331   : > { %v1755_v49 = vsel %vm1754_vm14, %v1753_v1, %v5050_v46  ;;  %v1566_v57 = vrot.slane %v1565_v43, 4  ;;  %1505 = vperm.xlu1 %3989, %v1500_v44   ;;  %1968 = vperm.xlu2 %3990, %v1957_v62   ;;  %v4133_v46 = vpop.eup %4132  ;;  %v2100_v44 = vperm.slane %v5070_v59, 3  ;;  %4142 = vpow2.f32 %v1254_v37 }
 0x332   : > { %4003 = vset.pattern.permute.xlu0 %v4908_v45  ;;  %v1522_v2 = vmul.f32 %v4133_v46, %v5061_v48  ;;  %v1759_v37 = vrot.slane %v5088_v63, 5 }
 0x333   : > { %v1567_v4 = vadd.f32 %v1566_v57, %v1565_v43  ;;  %v5100_v14 = vpop.permute.xlu2 %1401  ;;  %v4135_v28 = vpop.eup %4134  ;;  %v1161_v43 = vrot.slane %v4987_v36, 6 }
 0x334   : > { %v4137_v51 = vpop.eup %4136 }
 0x335   : > { %v1568_v30 = vrot.slane %v1567_v4, 2  ;;  %v4139_v54 = vpop.eup %4138  ;;  %v1176_v39 = vperm.slane %v1161_v43, 0 }
 0x336   : > { %v4141_v40 = vpop.eup %4140 }
 0x337   : > { %v1569_v1 = vadd.f32 %v1568_v30, %v1567_v4  ;;  %v1582_v4 = vsel %vm921_vm9, %v1522_v2, 0.0  ;;  %v1214_v43 = vmul.f32 %v1176_v39, %v5004_v7 }
 0x339   : > { %v1570_v19 = vrot.slane %v1569_v1, 1  ;;  %3993 = vset.pattern.permute.xlu2 %v4908_v45  ;;  %1962 = vperm.xlu1 %3989, %v1957_v62   ;;  %v1983_v62 = vperm.slane %v4985_v8, 2 }
 0x33a   : > { %2105 = vperm.xlu0 %4003, %v2100_v44  }
 0x33b   : > { %v1571_v6 = vadd.f32 %v1570_v19, %v1569_v1  ;;  %v1415_v61 = vpop.permute.xlu2 %1414  ;;  %v1363_v11 = vpop.permute.xlu1 %1362 }
 0x33c   : > { %v1529_v55 = vmul.f32 %v4135_v28, %v1415_v61  ;;  %v1521_v34 = vmul.f32 %v4137_v51, %v1363_v11  ;;  %v1421_v23 = vpop.permute.xlu0 %1420  ;;  %v4143_v51 = vpop.eup %4142 }
 0x33d   : > { %v1723_v9 = vmul.f32 %v1692_v29, %v1571_v6  ;;  %v1530_v57 = vmul.f32 %v4139_v54, %v1421_v23  ;;  %v1162_v54 = vrot.slane %v4987_v36, 7  ;;  %v1524_v29 = vmul.f32 %v4141_v40, %v5082_v47 }
 0x33e   : > { %v1617_v48 = vsel %vm921_vm9, %v1529_v55, 0.0  ;;  %v1581_v41 = vsel %vm921_vm9, %v1521_v34, 0.0  ;;  %v1258_v36 = vmul.f32 1.442695, %v1214_v43 }
 0x33f   : > { %v1756_v30 = vrot.slane %v1723_v9, 6  ;;  %v1583_v46 = vadd.f32 %v1582_v4, %v1581_v41  ;;  %v1618_v1 = vsel %vm921_vm9, %v1530_v57, 0.0  ;;  %v1177_v23 = vperm.slane %v1162_v54, 0 }
 0x340   : > { %v1619_v28 = vadd.f32 %v1618_v1, %v1617_v48  ;;  %v1591_v57 = vsel %vm921_vm9, %v1524_v29, 0.0  ;;  %v2126_v1 = vperm.slane %v5070_v59, 5  ;;  %4144 = vpow2.f32 %v1258_v36 }
 0x341   : > { %v1758_v19 = vsel %vm1757_vm4, %v1756_v30, %v1755_v49  ;;  %v1584_v2 = vrot.slane %v1583_v46, 4  ;;  %1988 = vperm.xlu2 %3993, %v1983_v62   ;;  %3992 = vset.pattern.permute.xlu1 %v4906_v42  ;;  %v1215_v49 = vmul.f32 %v1176_v39, %v4999_v32  ;;  %v1217_v29 = vmul.f32 %v1177_v23, %v4999_v32 }
 0x342   : > { %v1761_v6 = vsel %vm1760_vm15, %v1759_v37, %v1758_v19  ;;  %v1620_v61 = vrot.slane %v1619_v28, 4  ;;  %4006 = vset.pattern.permute.xlu0 %v4906_v42  ;;  %v1694_v19 = vrot.slane %v5047_v10, 4 }
 0x343   : > { %v1585_v63 = vadd.f32 %v1584_v2, %v1583_v46  ;;  %v1376_v11 = vpop.permute.xlu1 %1375  ;;  %v1260_v40 = vmul.f32 1.442695, %v1215_v49  ;;  %v1216_v46 = vmul.f32 %v1177_v23, %v5004_v7 }
 0x344   : > { %v1621_v55 = vadd.f32 %v1620_v61, %v1619_v28  ;;  %v1523_v34 = vmul.f32 %v4143_v51, %v1376_v11  ;;  %v6118_v28 = vperm.slane %v4985_v8, 3  ;;  %v6119_v51 = vperm.slane %v4985_v8, 1 }
 0x345   : > { %v1586_v9 = vrot.slane %v1585_v63, 2  ;;  %4146 = vpow2.f32 %v1260_v40  ;;  %v5142_v61 = vmul.f32 %v4934_v38, %v4770_v17  ;;  %v1262_v11 = vmul.f32 1.442695, %v1216_v46 }
 0x346   : > { %v1622_v4 = vrot.slane %v1621_v55, 2  ;;  %v1590_v48 = vsel %vm921_vm9, %v1523_v34, 0.0  ;;  %v4145_v36 = vpop.eup %4144 }
 0x347   : > { %v1587_v47 = vadd.f32 %v1586_v9, %v1585_v63  ;;  %v1592_v41 = vadd.f32 %v1591_v57, %v1590_v48  ;;  %v1163_v48 = vrot.slane %v5066_v50, 1  ;;  %4148 = vpow2.f32 %v1262_v11 }
 0x348   : > { %v1623_v30 = vadd.f32 %v1622_v4, %v1621_v55  ;;  %v1264_v4 = vmul.f32 1.442695, %v1217_v29  ;;  %v1525_v40 = vmul.f32 %v4145_v36, %v5103_v58  ;;  %v2009_v29 = vperm.slane %v4985_v8, 4 }
 0x349   : > { %v1588_v39 = vrot.slane %v1587_v47, 1  ;;  %v1593_v37 = vrot.slane %v1592_v41, 4  ;;  %2001 = vperm.xlu2 %3993, %v6118_v28   ;;  %1981 = vperm.xlu1 %3992, %v6119_v51  }
 0x34a   : > { %v1624_v43 = vrot.slane %v1623_v30, 1  ;;  %2137 = vperm.xlu0 %4006, %v2126_v1   ;;  %4150 = vpow2.f32 %v1264_v4 }
 0x34b   : > { %v1589_v54 = vadd.f32 %v1588_v39, %v1587_v47  ;;  %v1594_v2 = vadd.f32 %v1593_v37, %v1592_v41  ;;  %v4147_v47 = vpop.eup %4146  ;;  %v5149_v38 = vpop.permute.xlu2 %1433  ;;  %v1167_v41 = vrot.slane %v5066_v50, 5  ;;  %v1179_v37 = vperm.slane %v1163_v48, 0 }
 0x34c   : > { %v1625_v63 = vadd.f32 %v1624_v43, %v1623_v30  ;;  %v1695_v30 = vrot.slane %v5047_v10, 5 }
 0x34d   : > { %v1725_v49 = vmul.f32 %v1694_v19, %v1589_v54  ;;  %v1595_v55 = vrot.slane %v1594_v2, 2  ;;  %v1183_v19 = vperm.slane %v1167_v41, 0  ;;  %v4149_v43 = vpop.eup %4148 }
 0x34e   : > { %v5145_v34 = vmul.f32 %v1625_v63, %v5142_v61  ;;  %v1221_v63 = vmul.f32 %v1179_v37, %v4999_v32 }
 0x34f   : > { %v1762_v9 = vrot.slane %v1725_v49, 4  ;;  %v1596_v57 = vadd.f32 %v1595_v55, %v1594_v2  ;;  %v1164_v55 = vrot.slane %v5066_v50, 2  ;;  %v1228_v4 = vmul.f32 %v1183_v19, %v5004_v7 }
 0x350   : > { %v1272_v41 = vmul.f32 1.442695, %v1221_v63 }
 0x351   : > { %v1764_v23 = vsel %vm1763_vm0, %v1762_v9, %v1761_v6  ;;  %v1597_v17 = vrot.slane %v1596_v57, 1  ;;  %3996 = vset.pattern.permute.xlu2 %v4906_v42  ;;  %1994 = vperm.xlu1 %3992, %v1983_v62   ;;  %v5160_v6 = vmul.f32 %v4992_v18, %v4899_v5  ;;  %v1599_v62 = vsel %vm921_vm9, %v1525_v40, 0.0  ;;  %v4151_v5 = vpop.eup %4150 }
 0x352   : > { %4009 = vset.pattern.permute.xlu0 %v4908_v45  ;;  %v1229_v9 = vmul.f32 %v1183_v19, %v4999_v32  ;;  %4152 = vpow2.f32 %v1272_v41 }
 0x353   : > { %v1598_v46 = vadd.f32 %v1597_v17, %v1596_v57  ;;  %v1395_v39 = vpop.permute.xlu1 %1394  ;;  %v3258_v11 = vperm.slane %v5160_v6, 1  ;;  %v1527_v57 = vmul.f32 %v4149_v43, %v5100_v14  ;;  %v5175_v48 = vpop.permute.xlu2 %1446  ;;  %v2022_v43 = vperm.slane %v4985_v8, 5 }
 0x354   : > { %v1526_v28 = vmul.f32 %v4147_v47, %v1395_v39  ;;  %v1288_v39 = vmul.f32 1.442695, %v1229_v9 }
 0x355   : > { %v1726_v51 = vmul.f32 %v1695_v30, %v1598_v46  ;;  %v1180_v30 = vperm.slane %v1164_v55, 0 }
 0x356   : > { %v1600_v58 = vsel %vm921_vm9, %v1526_v28, 0.0  ;;  %v1608_v28 = vsel %vm921_vm9, %v1527_v57, 0.0  ;;  %4154 = vpow2.f32 %v1288_v39 }
 0x357   : > { %v1765_v54 = vrot.slane %v1726_v51, 3  ;;  %v1601_v2 = vadd.f32 %v1600_v58, %v1599_v62  ;;  %v1286_v51 = vmul.f32 1.442695, %v1228_v4  ;;  %v5180_v62 = vpop.permute.xlu0 %1453  ;;  %v1222_v57 = vmul.f32 %v1180_v30, %v5004_v7 }
 0x358   : > { %v5191_v4 = vmul.f32 %v4992_v18, %v4869_v56 }
 0x359   : > { %v1767_v49 = vsel %vm1766_vm1, %v1765_v54, %v1764_v23  ;;  %v1602_v36 = vrot.slane %v1601_v2, 4  ;;  %2020 = vperm.xlu2 %3996, %v2009_v29   ;;  %3995 = vset.pattern.permute.xlu1 %v4908_v45  ;;  %v1220_v23 = vmul.f32 %v1179_v37, %v5004_v7  ;;  %v1223_v37 = vmul.f32 %v1180_v30, %v4999_v32 }
 0x35a   : > { %3263 = vperm.xlu0 %4009, %v3258_v11   ;;  %4156 = vpow2.f32 %v1286_v51  ;;  %v1165_v51 = vrot.slane %v5066_v50, 3 }
 0x35b   : > { %v1603_v47 = vadd.f32 %v1602_v36, %v1601_v2  ;;  %v1408_v17 = vpop.permute.xlu1 %1407  ;;  %v1270_v54 = vmul.f32 1.442695, %v1220_v23 }
 0x35c   : > { %v1528_v40 = vmul.f32 %v4151_v5, %v1408_v17  ;;  %v1696_v5 = vrot.slane %v5047_v10, 6 }
 0x35d   : > { %v1604_v46 = vrot.slane %v1603_v47, 2  ;;  %4158 = vpow2.f32 %v1270_v54 }
 0x35e   : > { %v1609_v14 = vsel %vm921_vm9, %v1528_v40, 0.0 }
 0x35f   : > { %v1605_v58 = vadd.f32 %v1604_v46, %v1603_v47  ;;  %v1610_v19 = vadd.f32 %v1609_v14, %v1608_v28  ;;  %v1276_v47 = vmul.f32 1.442695, %v1223_v37  ;;  %v1486_v39 = vpop.permute.xlu0 %1485  ;;  %v1274_v28 = vmul.f32 1.442695, %v1222_v57 }
 0x360   : > { %v1697_v37 = vrot.slane %v5047_v10, 7 }
 0x361   : > { %v1606_v2 = vrot.slane %v1605_v58, 1  ;;  %v1611_v63 = vrot.slane %v1610_v19, 4  ;;  %2033 = vperm.xlu2 %3996, %v2022_v43   ;;  %2014 = vperm.xlu1 %3995, %v2009_v29   ;;  %v4153_v29 = vpop.eup %4152  ;;  %4160 = vpow2.f32 %v1276_v47 }
 0x362   : > { %4012 = vset.pattern.permute.xlu0 %v4906_v42  ;;  %v4155_v41 = vpop.eup %4154  ;;  %4162 = vpow2.f32 %v1274_v28 }
 0x363   : > { %v1607_v55 = vadd.f32 %v1606_v2, %v1605_v58  ;;  %v1612_v36 = vadd.f32 %v1611_v63, %v1610_v19  ;;  %v5186_v9 = vpop.permute.xlu2 %1466  ;;  %v4157_v14 = vpop.eup %4156  ;;  %v3362_v58 = vperm.slane %v5191_v4, 1  ;;  %v1532_v19 = vmul.f32 %v4153_v29, %v5149_v38 }
 0x364   : > { %v4159_v30 = vpop.eup %4158  ;;  %v1540_v54 = vmul.f32 %v4155_v41, %v1486_v39 }
 0x365   : > { %v1727_v17 = vmul.f32 %v1696_v5, %v1607_v55  ;;  %v1613_v23 = vrot.slane %v1612_v36, 2  ;;  %v1181_v55 = vperm.slane %v1165_v51, 0  ;;  %v1627_v47 = vsel %vm921_vm9, %v1532_v19, 0.0 }
 0x367   : > { %v1768_v40 = vrot.slane %v1727_v17, 2  ;;  %v1614_v46 = vadd.f32 %v1613_v23, %v1612_v36  ;;  %v4161_v23 = vpop.eup %4160  ;;  %v1225_v19 = vmul.f32 %v1181_v55, %v4999_v32 }
 0x368   : > { %v4163_v39 = vpop.eup %4162 }
 0x369   : > { %v1770_v56 = vsel %vm1769_vm6, %v1768_v40, %v1767_v49  ;;  %v1615_v18 = vrot.slane %v1614_v46, 1  ;;  %3999 = vset.pattern.permute.xlu2 %v4908_v45  ;;  %2027 = vperm.xlu1 %3995, %v2022_v43   ;;  %v1663_v43 = vsel %vm921_vm9, %v1540_v54, 0.0  ;;  %v2048_v40 = vperm.slane %v4985_v8, 7 }
 0x36a   : > { %3373 = vperm.xlu0 %4012, %v3362_v58  }
 0x36b   : > { %v1616_v2 = vadd.f32 %v1615_v18, %v1614_v46  ;;  %v1480_v63 = vpop.permute.xlu2 %1479  ;;  %v1428_v5 = vpop.permute.xlu1 %1427  ;;  %v1224_v46 = vmul.f32 %v1181_v55, %v5004_v7  ;;  %v1534_v18 = vmul.f32 %v4161_v23, %v5175_v48  ;;  %v6112_v23 = vperm.slane %v5160_v6, 0 }
 0x36c   : > { %v1539_v36 = vmul.f32 %v4157_v14, %v1480_v63  ;;  %v1531_v57 = vmul.f32 %v4159_v30, %v1428_v5  ;;  %v1166_v14 = vrot.slane %v5066_v50, 4 }
 0x36d   : > { %v1728_v49 = vmul.f32 %v1697_v37, %v1616_v2  ;;  %v1278_v63 = vmul.f32 1.442695, %v1224_v46  ;;  %v6120_v46 = vperm.slane %v5070_v59, 0 }
 0x36e   : > { %v1662_v38 = vsel %vm921_vm9, %v1539_v36, 0.0  ;;  %v1626_v17 = vsel %vm921_vm9, %v1531_v57, 0.0 }
 0x36f   : > { %v1771_v29 = vrot.slane %v1728_v49, 1  ;;  %v1664_v10 = vadd.f32 %v1663_v43, %v1662_v38  ;;  %v1628_v41 = vadd.f32 %v1627_v47, %v1626_v17  ;;  %v1636_v49 = vsel %vm921_vm9, %v1534_v18, 0.0 }
 0x370   : > { %v1280_v43 = vmul.f32 1.442695, %v1225_v19  ;;  %4164 = vpow2.f32 %v1278_v63 }
 0x371   : > { %v5208_v28 = vsel %vm1772_vm7, %v1771_v29, %v1770_v56  ;;  %v1665_v51 = vrot.slane %v1664_v10, 4  ;;  %v1629_v30 = vrot.slane %v1628_v41, 4  ;;  %2053 = vperm.xlu2 %3999, %v2048_v40   ;;  %3998 = vset.pattern.permute.xlu1 %v4906_v42  ;;  %v1182_v56 = vperm.slane %v1166_v14, 0 }
 0x372   : > { %4015 = vset.pattern.permute.xlu0 %v4908_v45  ;;  %v1702_v14 = vrot.slane %v5142_v61, 5  ;;  %4166 = vpow2.f32 %v1280_v43 }
 0x373   : > { %v1666_v54 = vadd.f32 %v1665_v51, %v1664_v10  ;;  %v1630_v37 = vadd.f32 %v1629_v30, %v1628_v41  ;;  %v1441_v2 = vpop.permute.xlu1 %1440  ;;  %v1226_v55 = vmul.f32 %v1182_v56, %v5004_v7  ;;  %v1698_v51 = vrot.slane %v5142_v61, 1 }
 0x374   : > { %v1533_v5 = vmul.f32 %v4163_v39, %v1441_v2  ;;  %v6121_v39 = vperm.slane %v4985_v8, 6 }
 0x375   : > { %v1667_v36 = vrot.slane %v1666_v54, 2  ;;  %v1631_v57 = vrot.slane %v1630_v37, 2 }
 0x376   : > { %v1635_v47 = vsel %vm921_vm9, %v1533_v5, 0.0  ;;  %v4165_v8 = vpop.eup %4164 }
 0x377   : > { %v1668_v38 = vadd.f32 %v1667_v36, %v1666_v54  ;;  %v1632_v17 = vadd.f32 %v1631_v57, %v1630_v37  ;;  %v1637_v48 = vadd.f32 %v1636_v49, %v1635_v47  ;;  %v1227_v54 = vmul.f32 %v1182_v56, %v4999_v32 }
 0x378   : > { %v1282_v37 = vmul.f32 1.442695, %v1226_v55  ;;  %v1535_v56 = vmul.f32 %v4165_v8, %v5180_v62  ;;  %v1699_v55 = vrot.slane %v5142_v61, 2  ;;  %v2074_v62 = vperm.slane %v5070_v59, 1 }
 0x379   : > { %v1669_v29 = vrot.slane %v1668_v38, 1  ;;  %v1633_v10 = vrot.slane %v1632_v17, 1  ;;  %v1638_v41 = vrot.slane %v1637_v48, 4  ;;  %2066 = vperm.xlu2 %3999, %v6120_v46   ;;  %2046 = vperm.xlu1 %3998, %v6121_v39   ;;  %v1284_v47 = vmul.f32 1.442695, %v1227_v54  ;;  %v4167_v46 = vpop.eup %4166 }
 0x37a   : > { %3250 = vperm.xlu0 %4015, %v6112_v23   ;;  %4168 = vpow2.f32 %v1282_v37  ;;  %v3349_v54 = vperm.slane %v5191_v4, 0 }
 0x37b   : > { %v1670_v30 = vadd.f32 %v1669_v29, %v1668_v38  ;;  %v1634_v18 = vadd.f32 %v1633_v10, %v1632_v17  ;;  %v1639_v19 = vadd.f32 %v1638_v41, %v1637_v48  ;;  %v5230_v49 = vpop.permute.xlu2 %1498  ;;  %v1168_v17 = vrot.slane %v5066_v50, 6 }
 0x37c   : > { %4170 = vpow2.f32 %v1284_v47 }
 0x37d   : > { %v5228_v2 = vmul.f32 %v1702_v14, %v1670_v30  ;;  %v1730_v63 = vmul.f32 %v1698_v51, %v1634_v18  ;;  %v1640_v5 = vrot.slane %v1639_v19, 2  ;;  %v1184_v39 = vperm.slane %v1168_v17, 0  ;;  %v5241_v30 = vpop.f32.mrf.mxu3 }
 0x37f   : > { %v1774_v36 = vrot.slane %v1730_v63, 7  ;;  %v1641_v57 = vadd.f32 %v1640_v5, %v1639_v19  ;;  %v1810_v19 = vrot.slane %v5241_v30, 3  ;;  %v1231_v5 = vmul.f32 %v1184_v39, %v4999_v32 }
 0x380   : > { %v4169_v51 = vpop.eup %4168  ;;  %v1230_v17 = vmul.f32 %v1184_v39, %v5004_v7 }
 0x381   : > { %v1775_v43 = vsel %vm1754_vm14, %v1774_v36, %v5145_v34  ;;  %v1642_v38 = vrot.slane %v1641_v57, 1  ;;  %4002 = vset.pattern.permute.xlu2 %v4906_v42  ;;  %2059 = vperm.xlu1 %3998, %v2048_v40   ;;  %v1644_v34 = vsel %vm921_vm9, %v1535_v56, 0.0  ;;  %v1169_v36 = vrot.slane %v5066_v50, 7 }
 0x382   : > { %4018 = vset.pattern.permute.xlu0 %v4906_v42  ;;  %v4171_v37 = vpop.eup %4170  ;;  %v1537_v47 = vmul.f32 %v4169_v51, %v5186_v9  ;;  %v2087_v9 = vperm.slane %v5070_v59, 2 }
 0x383   : > { %v1643_v48 = vadd.f32 %v1642_v38, %v1641_v57  ;;  %v1460_v29 = vpop.permute.xlu1 %1459  ;;  %v5248_v8 = vpop.permute.xlu2 %1511 }
 0x384   : > { %v1536_v10 = vmul.f32 %v4167_v46, %v1460_v29  ;;  %v1653_v50 = vsel %vm921_vm9, %v1537_v47, 0.0 }
 0x385   : > { %v1731_v41 = vmul.f32 %v1699_v55, %v1643_v48  ;;  %v1292_v48 = vmul.f32 1.442695, %v1231_v5  ;;  %v1185_v55 = vperm.slane %v1169_v36, 0 }
 0x386   : > { %v1645_v14 = vsel %vm921_vm9, %v1536_v10, 0.0 }
 0x387   : > { %v1776_v40 = vrot.slane %v1731_v41, 6  ;;  %v1646_v18 = vadd.f32 %v1645_v14, %v1644_v34  ;;  %v1290_v14 = vmul.f32 1.442695, %v1230_v17  ;;  %4172 = vpow2.f32 %v1292_v48 }
 0x388   : > { %v1822_v48 = vperm.slane %v5241_v30, 0 }
 0x389   : > { %v1777_v63 = vsel %vm1757_vm4, %v1776_v40, %v1775_v43  ;;  %v1647_v57 = vrot.slane %v1646_v18, 4  ;;  %2085 = vperm.xlu2 %4002, %v2074_v62   ;;  %4001 = vset.pattern.permute.xlu1 %v4908_v45  ;;  %v1825_v43 = vperm.slane %v1810_v19, 0  ;;  %v1233_v40 = vmul.f32 %v1185_v55, %v4999_v32 }
 0x38a   : > { %3360 = vperm.xlu0 %4018, %v3349_v54   ;;  %v1700_v19 = vrot.slane %v5142_v61, 3  ;;  %4174 = vpow2.f32 %v1290_v14 }
 0x38b   : > { %v1648_v46 = vadd.f32 %v1647_v57, %v1646_v18  ;;  %v1473_v38 = vpop.permute.xlu1 %1472  ;;  %v1861_v51 = vmul.f32 %v1825_v43, %v4999_v32  ;;  %v5264_v57 = vpop.permute.xlu2 %1968  ;;  %v1860_v47 = vmul.f32 %v1825_v43, %v5004_v7 }
 0x38c   : > { %v1538_v56 = vmul.f32 %v4171_v37, %v1473_v38  ;;  %v1232_v37 = vmul.f32 %v1185_v55, %v5004_v7  ;;  %v1296_v38 = vmul.f32 1.442695, %v1233_v40 }
 0x38d   : > { %v1649_v29 = vrot.slane %v1648_v46, 2  ;;  %v1898_v55 = vmul.f32 1.442695, %v1860_v47 }
 0x38e   : > { %v1654_v10 = vsel %vm921_vm9, %v1538_v56, 0.0 }
 0x38f   : > { %v1650_v41 = vadd.f32 %v1649_v29, %v1648_v46  ;;  %v1655_v34 = vadd.f32 %v1654_v10, %v1653_v50  ;;  %v1900_v46 = vmul.f32 1.442695, %v1861_v51  ;;  %v4173_v29 = vpop.eup %4172  ;;  %v5268_v50 = vpop.permute.xlu0 %1975  ;;  %v1855_v51 = vmul.f32 %v1822_v48, %v4999_v32 }
 0x390   : > { %v1542_v40 = vmul.f32 %v4173_v29, %v5230_v49 }
 0x391   : > { %v1651_v39 = vrot.slane %v1650_v41, 1  ;;  %v1656_v18 = vrot.slane %v1655_v34, 4  ;;  %2098 = vperm.xlu2 %4002, %v2087_v9   ;;  %2079 = vperm.xlu1 %4001, %v2074_v62   ;;  %v1294_v62 = vmul.f32 1.442695, %v1232_v37  ;;  %4176 = vpow2.f32 %v1900_v46 }
 0x392   : > { %4021 = vset.pattern.permute.xlu0 %v4908_v45  ;;  %4178 = vpow2.f32 %v1296_v38 }
 0x393   : > { %v1652_v5 = vadd.f32 %v1651_v39, %v1650_v41  ;;  %v1657_v36 = vadd.f32 %v1656_v18, %v1655_v34  ;;  %v3401_v41 = vperm.slane %v5191_v4, 4  ;;  %v4175_v34 = vpop.eup %4174  ;;  %4180 = vpow2.f32 %v1294_v62 }
 0x394   : > { %v1701_v18 = vrot.slane %v5142_v61, 4  ;;  %4182 = vpow2.f32 %v1898_v55 }
 0x395   : > { %v1732_v17 = vmul.f32 %v1700_v19, %v1652_v5  ;;  %v1658_v56 = vrot.slane %v1657_v36, 2 }
 0x397   : > { %v1778_v10 = vrot.slane %v1732_v17, 5  ;;  %v1659_v23 = vadd.f32 %v1658_v56, %v1657_v36  ;;  %v1888_v36 = vmul.f32 1.442695, %v1855_v51  ;;  %v4177_v47 = vpop.eup %4176  ;;  %v2008_v38 = vpop.permute.xlu0 %2007  ;;  %v2113_v56 = vperm.slane %v5070_v59, 4 }
 0x398   : > { %v4179_v46 = vpop.eup %4178  ;;  %v2172_v51 = vmul.f32 %v4177_v47, %v2008_v38 }
 0x399   : > { %v1779_v43 = vsel %vm1760_vm15, %v1778_v10, %v1777_v63  ;;  %v1660_v14 = vrot.slane %v1659_v23, 1  ;;  %4005 = vset.pattern.permute.xlu2 %v4908_v45  ;;  %2092 = vperm.xlu1 %4001, %v2087_v9   ;;  %v1854_v63 = vmul.f32 %v1822_v48, %v5004_v7  ;;  %v1672_v9 = vsel %vm921_vm9, %v1542_v40, 0.0  ;;  %v4181_v29 = vpop.eup %4180 }
 0x39a   : > { %3406 = vperm.xlu0 %4021, %v3401_v41   ;;  %v1782_v10 = vrot.slane %v5228_v2, 3  ;;  %v1808_v7 = vrot.slane %v5241_v30, 1  ;;  %v3414_v48 = vperm.slane %v5191_v4, 5  ;;  %v4183_v55 = vpop.eup %4182  ;;  %4184 = vpow2.f32 %v1888_v36 }
 0x39b   : > { %v1661_v39 = vadd.f32 %v1660_v14, %v1659_v23  ;;  %v1493_v19 = vpop.permute.xlu1 %1492  ;;  %v5278_v37 = vpop.permute.xlu2 %1988  ;;  %v1886_v62 = vmul.f32 1.442695, %v1854_v63  ;;  %v1544_v40 = vmul.f32 %v4179_v46, %v5248_v8  ;;  %v2225_v47 = vsel %vm921_vm9, %v2172_v51, 0.0 }
 0x39c   : > { %v1541_v5 = vmul.f32 %v4175_v34, %v1493_v19  ;;  %v1823_v63 = vperm.slane %v1808_v7, 0 }
 0x39d   : > { %v1733_v32 = vmul.f32 %v1701_v18, %v1661_v39  ;;  %4186 = vpow2.f32 %v1886_v62  ;;  %v1681_v8 = vsel %vm921_vm9, %v1544_v40, 0.0  ;;  %v5321_v40 = vld [vmem:[%s6101_s6 + $0x8] sm:$0xff] }
 0x39e   : > { %v1671_v49 = vsel %vm921_vm9, %v1541_v5, 0.0 }
 0x39f   : > { %v1780_v17 = vrot.slane %v1733_v32, 4  ;;  %v1673_v23 = vadd.f32 %v1672_v9, %v1671_v49 }
 0x3a0   : > { %v4185_v46 = vpop.eup %4184 }
 0x3a1   : > { %v1781_v34 = vsel %vm1763_vm0, %v1780_v17, %v1779_v43  ;;  %v1674_v14 = vrot.slane %v1673_v23, 4  ;;  %2118 = vperm.xlu2 %4005, %v2113_v56   ;;  %4004 = vset.pattern.permute.xlu1 %v4906_v42  ;;  %v5297_v43 = vmul.f32 %v5012_v12, %v4867_v35  ;;  %v5306_v35 = vld [vmem:[%s6101_s6] sm:$0xff]  ;;  %v2166_v51 = vmul.f32 %v4185_v46, %v5264_v57 }
 0x3a2   : > { %v1783_v39 = vsel %vm1766_vm1, %v1782_v10, %v1781_v34  ;;  %3419 = vperm.xlu0 %4021, %v3414_v48   ;;  %v1856_v62 = vmul.f32 %v5306_v35, %v1823_v63 }
 0x3a3   : > { %v1675_v2 = vadd.f32 %v1674_v14, %v1673_v23  ;;  %v1506_v18 = vpop.permute.xlu1 %1505  ;;  %v2002_v19 = vpop.permute.xlu2 %2001  ;;  %v6113_v10 = vperm.slane %v5297_v43, 1  ;;  %v2198_v46 = vsel %vm921_vm9, %v2166_v51, 0.0 }
 0x3a4   : > { %v1543_v5 = vmul.f32 %v4181_v29, %v1506_v18  ;;  %v2171_v32 = vmul.f32 %v4183_v55, %v2002_v19  ;;  %v1809_v29 = vrot.slane %v5241_v30, 2  ;;  %v4187_v7 = vpop.eup %4186  ;;  %v1703_v19 = vrot.slane %v5142_v61, 6 }
 0x3a5   : > { %v1676_v36 = vrot.slane %v1675_v2, 2 }
 0x3a6   : > { %v1680_v9 = vsel %vm921_vm9, %v1543_v5, 0.0  ;;  %v2224_v49 = vsel %vm921_vm9, %v2171_v32, 0.0 }
 0x3a7   : > { %v1677_v38 = vadd.f32 %v1676_v36, %v1675_v2  ;;  %v1682_v17 = vadd.f32 %v1681_v8, %v1680_v9  ;;  %v2226_v23 = vadd.f32 %v2225_v47, %v2224_v49  ;;  %v1857_v2 = vmul.f32 %v5321_v40, %v1823_v63 }
 0x3a8   : > { %v1890_v36 = vmul.f32 1.442695, %v1856_v62  ;;  %v5327_v49 = vmul.f32 %v4930_v53, %v4785_v33  ;;  %v1704_v33 = vrot.slane %v5142_v61, 7 }
 0x3a9   : > { %v1678_v55 = vrot.slane %v1677_v38, 1  ;;  %v1683_v34 = vrot.slane %v1682_v17, 4  ;;  %v2227_v14 = vrot.slane %v2226_v23, 4  ;;  %2131 = vperm.xlu2 %4005, %v2126_v1   ;;  %2111 = vperm.xlu1 %4004, %v2100_v44   ;;  %v1824_v44 = vperm.slane %v1809_v29, 0 }
 0x3aa   : > { %2619 = vperm.xlu0 %4021, %v6113_v10   ;;  %4188 = vpow2.f32 %v1890_v36  ;;  %v2345_v53 = vrot.slane %v5327_v49, 3 }
 0x3ab   : > { %v1679_v18 = vadd.f32 %v1678_v55, %v1677_v38  ;;  %v1684_v5 = vadd.f32 %v1683_v34, %v1682_v17  ;;  %v2228_v1 = vadd.f32 %v2227_v14, %v2226_v23  ;;  %v1963_v32 = vpop.permute.xlu1 %1962  ;;  %v1892_v38 = vmul.f32 1.442695, %v1857_v2 }
 0x3ac   : > { %v2165_v47 = vmul.f32 %v4187_v7, %v1963_v32  ;;  %v1858_v62 = vmul.f32 %v5306_v35, %v1824_v44 }
 0x3ad   : > { %v1735_v57 = vmul.f32 %v1703_v19, %v1679_v18  ;;  %v1685_v8 = vrot.slane %v1684_v5, 2  ;;  %v2229_v9 = vrot.slane %v2228_v1, 2  ;;  %4190 = vpow2.f32 %v1892_v38 }
 0x3ae   : > { %v2197_v63 = vsel %vm921_vm9, %v2165_v47, 0.0  ;;  %v1894_v19 = vmul.f32 1.442695, %v1858_v62  ;;  %v5342_v47 = vpop.f32.mrf.mxu3 }
 0x3af   : > { %v1784_v55 = vrot.slane %v1735_v57, 2  ;;  %v1686_v10 = vadd.f32 %v1685_v8, %v1684_v5  ;;  %v2230_v17 = vadd.f32 %v2229_v9, %v2228_v1  ;;  %v2199_v23 = vadd.f32 %v2198_v46, %v2197_v63 }
 0x3b0   : > { %v4189_v36 = vpop.eup %4188  ;;  %v2139_v57 = vperm.slane %v5070_v59, 6  ;;  %v2640_v46 = vperm.slane %v5297_v43, 3  ;;  %4192 = vpow2.f32 %v1894_v19 }
 0x3b1   : > { %v1785_v29 = vsel %vm1769_vm6, %v1784_v55, %v1783_v39  ;;  %v1687_v7 = vrot.slane %v1686_v10, 1  ;;  %v2231_v34 = vrot.slane %v2230_v17, 1  ;;  %v2200_v14 = vrot.slane %v2199_v23, 4  ;;  %4008 = vset.pattern.permute.xlu2 %v4906_v42  ;;  %2124 = vperm.xlu1 %4004, %v2113_v56  }
 0x3b2   : > { %4028 = vset.pattern.permute.xlu0 %v4906_v42  ;;  %v1859_v39 = vmul.f32 %v5321_v40, %v1824_v44  ;;  %v1790_v55 = vsel %vm921_vm9, %v5208_v28, 0.0 }
 0x3b3   : > { %v1688_v51 = vadd.f32 %v1687_v7, %v1686_v10  ;;  %v2232_v2 = vadd.f32 %v2231_v34, %v2230_v17  ;;  %v2201_v18 = vadd.f32 %v2200_v14, %v2199_v23  ;;  %v4191_v9 = vpop.eup %4190  ;;  %v1811_v10 = vrot.slane %v5241_v30, 4  ;;  %v5348_v38 = vpop.permute.xlu2 %2020 }
 0x3b4   : > { %v1896_v8 = vmul.f32 1.442695, %v1859_v39  ;;  %v2167_v17 = vmul.f32 %v4189_v36, %v5268_v50  ;;  %v1830_v23 = vperm.slane %v5342_v47, 0 }
 0x3b5   : > { %v1736_v5 = vmul.f32 %v1704_v33, %v1688_v51  ;;  %v5340_v1 = vmul.f32 %v2345_v53, %v2232_v2  ;;  %v2202_v32 = vrot.slane %v2201_v18, 2  ;;  %v1826_v14 = vperm.slane %v1811_v10, 0 }
 0x3b6   : > { %4194 = vpow2.f32 %v1896_v8  ;;  %v2206_v28 = vsel %vm921_vm9, %v2167_v17, 0.0  ;;  %v1871_v50 = vmul.f32 %v5321_v40, %v1830_v23 }
 0x3b7   : > { %v1786_v56 = vrot.slane %v1736_v5, 1  ;;  %v2203_v61 = vadd.f32 %v2202_v32, %v2201_v18  ;;  %v4193_v18 = vpop.eup %4192  ;;  %v2152_v5 = vperm.slane %v5070_v59, 7  ;;  %v1863_v32 = vmul.f32 %v5321_v40, %v1826_v14 }
 0x3b8   : > { %v2169_v10 = vmul.f32 %v4193_v18, %v5278_v37  ;;  %v1870_v59 = vmul.f32 %v5306_v35, %v1830_v23 }
 0x3b9   : > { %v1787_v44 = vsel %vm1772_vm7, %v1786_v56, %v1785_v29  ;;  %v2204_v63 = vrot.slane %v2203_v61, 1  ;;  %2150 = vperm.xlu2 %4008, %v2139_v57   ;;  %4007 = vset.pattern.permute.xlu1 %v4908_v45 }
 0x3ba   : > { %v1791_v62 = vsel %vm921_vm9, %v1787_v44, 0.0  ;;  %2651 = vperm.xlu0 %4028, %v2640_v46   ;;  %v1920_v44 = vmul.f32 1.442695, %v1871_v50  ;;  %v2215_v37 = vsel %vm921_vm9, %v2169_v10, 0.0  ;;  %v1918_v23 = vmul.f32 1.442695, %v1870_v59 }
 0x3bb   : > { %v1792_v7 = vadd.f32 %v1791_v62, %v1790_v55  ;;  %v2205_v29 = vadd.f32 %v2204_v63, %v2203_v61  ;;  %v1982_v34 = vpop.permute.xlu1 %1981  ;;  %v1812_v61 = vrot.slane %v5241_v30, 5  ;;  %v5373_v55 = vpop.permute.xlu2 %2033 }
 0x3bc   : > { %v2168_v33 = vmul.f32 %v4191_v9, %v1982_v34  ;;  %v4195_v36 = vpop.eup %4194  ;;  %v1799_v9 = vld [vmem:[%s6102_s7] sm:$0x1]  ;;  %4196 = vpow2.f32 %v1920_v44 }
 0x3bd   : > { %v1793_v53 = vrot.slane %v1792_v7, 4  ;;  %v5359_v51 = vmul.f32 %v2205_v29, %v5327_v49  ;;  %v1904_v29 = vmul.f32 1.442695, %v1863_v32  ;;  %v1804_v34 = vmul.f32 %v4817_v15, %v1799_v9 }
 0x3be   : > { %v2207_v2 = vsel %vm921_vm9, %v2168_v33, 0.0 }
 0x3bf   : > { %v1794_v39 = vadd.f32 %v1793_v53, %v1792_v7  ;;  %v2208_v19 = vadd.f32 %v2207_v2, %v2206_v28  ;;  %v1862_v7 = vmul.f32 %v5306_v35, %v1826_v14  ;;  %v1827_v53 = vperm.slane %v1812_v61, 0  ;;  %v5379_v2 = vpop.permute.xlu0 %2040 }
 0x3c0   : > { %4198 = vpow2.f32 %v1904_v29  ;;  %v2679_v14 = vperm.slane %v5297_v43, 6 }
 0x3c1   : > { %v1795_v56 = vrot.slane %v1794_v39, 2  ;;  %v2209_v8 = vrot.slane %v2208_v19, 4  ;;  %2163 = vperm.xlu2 %4008, %v2152_v5   ;;  %2144 = vperm.xlu1 %4007, %v2139_v57   ;;  %v1865_v15 = vmul.f32 %v5321_v40, %v1827_v53  ;;  %4200 = vpow2.f32 %v1918_v23 }
 0x3c2   : > { %4031 = vset.pattern.permute.xlu0 %v4908_v45  ;;  %v1864_v59 = vmul.f32 %v5306_v35, %v1827_v53 }
 0x3c3   : > { %v1796_v63 = vadd.f32 %v1795_v56, %v1794_v39  ;;  %v2210_v17 = vadd.f32 %v2209_v8, %v2208_v19  ;;  %v1995_v62 = vpop.permute.xlu1 %1994  ;;  %v1902_v19 = vmul.f32 1.442695, %v1862_v7  ;;  %v2343_v8 = vrot.slane %v5327_v49, 1 }
 0x3c4   : > { %v2170_v57 = vmul.f32 %v4195_v36, %v1995_v62 }
 0x3c5   : > { %v1797_v33 = vrot.slane %v1796_v63, 1  ;;  %v2211_v28 = vrot.slane %v2210_v17, 2  ;;  %4202 = vpow2.f32 %v1902_v19  ;;  %v2344_v19 = vrot.slane %v5327_v49, 2 }
 0x3c6   : > { %v2216_v50 = vsel %vm921_vm9, %v2170_v57, 0.0 }
 0x3c7   : > { %v2212_v18 = vadd.f32 %v2211_v28, %v2210_v17  ;;  %v2217_v39 = vadd.f32 %v2216_v50, %v2215_v37  ;;  %v1798_v56 = vadd.f32 %v1797_v33, %v1796_v63  ;;  %v4197_v63 = vpop.eup %4196  ;;  %v1908_v17 = vmul.f32 1.442695, %v1865_v15  ;;  %v2073_v29 = vpop.permute.xlu0 %2072 }
 0x3c8   : > { %v1906_v33 = vmul.f32 1.442695, %v1864_v59  ;;  %v1813_v37 = vrot.slane %v5241_v30, 6  ;;  %v2182_v53 = vmul.f32 %v4197_v63, %v2073_v29 }
 0x3c9   : > { %v2213_v32 = vrot.slane %v2212_v18, 1  ;;  %v2218_v36 = vrot.slane %v2217_v39, 4  ;;  %4011 = vset.pattern.permute.xlu2 %v4908_v45  ;;  %2157 = vperm.xlu1 %4007, %v2152_v5   ;;  %v5384_v61 = vadd.f32 %v1804_v34, %v1798_v56  ;;  %v4199_v5 = vpop.eup %4198  ;;  %4204 = vpow2.f32 %v1908_v17 }
 0x3ca   : > { %2684 = vperm.xlu0 %4031, %v2679_v14   ;;  %v4201_v28 = vpop.eup %4200  ;;  %4206 = vpow2.f32 %v1906_v33  ;;  %v1814_v33 = vrot.slane %v5241_v30, 7 }
 0x3cb   : > { %v2214_v9 = vadd.f32 %v2213_v32, %v2212_v18  ;;  %v2219_v10 = vadd.f32 %v2218_v36, %v2217_v39  ;;  %v5389_v44 = vpop.permute.xlu2 %2053  ;;  %v4203_v50 = vpop.eup %4202  ;;  %v2174_v39 = vmul.f32 %v4199_v5, %v5348_v38  ;;  %v1828_v36 = vperm.slane %v1813_v37, 0 }
 0x3cd   : > { %v2374_v62 = vmul.f32 %v2343_v8, %v2214_v9  ;;  %v2220_v7 = vrot.slane %v2219_v10, 2  ;;  %v2234_v38 = vsel %vm921_vm9, %v2174_v39, 0.0  ;;  %v1866_v29 = vmul.f32 %v5306_v35, %v1828_v36 }
 0x3cf   : > { %v2405_v57 = vrot.slane %v2374_v62, 7  ;;  %v2221_v34 = vadd.f32 %v2220_v7, %v2219_v10  ;;  %v4205_v17 = vpop.eup %4204  ;;  %v1910_v30 = vmul.f32 1.442695, %v1866_v29 }
 0x3d1   : > { %v2406_v23 = vsel %vm1754_vm14, %v2405_v57, %v5359_v51  ;;  %v2222_v18 = vrot.slane %v2221_v34, 1  ;;  %4010 = vset.pattern.permute.xlu1 %v4906_v42  ;;  %3367 = vperm.xlu2 %4011, %v3362_v58   ;;  %v5403_v51 = vmul.f32 %v5012_v12, %v4883_v0  ;;  %v2270_v58 = vsel %vm921_vm9, %v2182_v53, 0.0  ;;  %v4207_v57 = vpop.eup %4206 }
 0x3d2   : > { %4034 = vset.pattern.permute.xlu0 %v4906_v42  ;;  %v2409_v0 = vrot.slane %v5340_v1, 5  ;;  %v1867_v1 = vmul.f32 %v5321_v40, %v1828_v36  ;;  %4208 = vpow2.f32 %v1910_v30 }
 0x3d3   : > { %v2223_v56 = vadd.f32 %v2222_v18, %v2221_v34  ;;  %v2067_v15 = vpop.permute.xlu2 %2066  ;;  %v2015_v32 = vpop.permute.xlu1 %2014  ;;  %v2705_v12 = vperm.slane %v5403_v51, 0  ;;  %v6115_v30 = vperm.slane %v5403_v51, 4 }
 0x3d4   : > { %v2181_v8 = vmul.f32 %v4201_v28, %v2067_v15  ;;  %v2173_v9 = vmul.f32 %v4203_v50, %v2015_v32  ;;  %v2176_v50 = vmul.f32 %v4205_v17, %v5373_v55  ;;  %v1912_v55 = vmul.f32 1.442695, %v1867_v1 }
 0x3d5   : > { %v2375_v10 = vmul.f32 %v2344_v19, %v2223_v56  ;;  %v1829_v56 = vperm.slane %v1814_v33, 0 }
 0x3d6   : > { %v2269_v59 = vsel %vm921_vm9, %v2181_v8, 0.0  ;;  %v2233_v63 = vsel %vm921_vm9, %v2173_v9, 0.0  ;;  %v2243_v8 = vsel %vm921_vm9, %v2176_v50, 0.0  ;;  %4210 = vpow2.f32 %v1912_v55 }
 0x3d7   : > { %v2407_v62 = vrot.slane %v2375_v10, 6  ;;  %v2271_v7 = vadd.f32 %v2270_v58, %v2269_v59  ;;  %v2235_v5 = vadd.f32 %v2234_v38, %v2233_v63  ;;  %v3271_v38 = vperm.slane %v5160_v6, 2 }
 0x3d8   : > { %v1868_v36 = vmul.f32 %v5306_v35, %v1829_v56  ;;  %v4209_v50 = vpop.eup %4208 }
 0x3d9   : > { %v2408_v34 = vsel %vm1757_vm4, %v2407_v62, %v2406_v23  ;;  %v2272_v28 = vrot.slane %v2271_v7, 4  ;;  %v2236_v37 = vrot.slane %v2235_v5, 4  ;;  %4014 = vset.pattern.permute.xlu2 %v4906_v42  ;;  %3269 = vperm.xlu1 %4010, %v3258_v11   ;;  %v5429_v62 = vmul.f32 %v4926_v26, %v4806_v3 }
 0x3da   : > { %v2410_v18 = vsel %vm1760_vm15, %v2409_v0, %v2408_v34  ;;  %2716 = vperm.xlu0 %4034, %v2705_v12   ;;  %v1914_v34 = vmul.f32 1.442695, %v1868_v36  ;;  %v3375_v26 = vperm.slane %v5191_v4, 2 }
 0x3db   : > { %v2273_v53 = vadd.f32 %v2272_v28, %v2271_v7  ;;  %v2237_v23 = vadd.f32 %v2236_v37, %v2235_v5  ;;  %v2028_v39 = vpop.permute.xlu1 %2027  ;;  %v2346_v7 = vrot.slane %v5327_v49, 4 }
 0x3dc   : > { %v2175_v19 = vmul.f32 %v4207_v57, %v2028_v39  ;;  %v1869_v57 = vmul.f32 %v5321_v40, %v1829_v56  ;;  %v1819_v39 = vrot.slane %v5342_v47, 5  ;;  %4212 = vpow2.f32 %v1914_v34 }
 0x3dd   : > { %v2274_v15 = vrot.slane %v2273_v53, 2  ;;  %v2238_v32 = vrot.slane %v2237_v23, 2  ;;  %v1816_v34 = vrot.slane %v5342_v47, 2 }
 0x3de   : > { %v2242_v11 = vsel %vm921_vm9, %v2175_v19, 0.0 }
 0x3df   : > { %v2275_v9 = vadd.f32 %v2274_v15, %v2273_v53  ;;  %v2239_v10 = vadd.f32 %v2238_v32, %v2237_v23  ;;  %v2244_v58 = vadd.f32 %v2243_v8, %v2242_v11  ;;  %v1916_v53 = vmul.f32 1.442695, %v1869_v57  ;;  %v4211_v23 = vpop.eup %4210 }
 0x3e0   : > { %v1815_v32 = vrot.slane %v5342_v47, 1  ;;  %v2177_v8 = vmul.f32 %v4209_v50, %v5379_v2  ;;  %v2347_v11 = vrot.slane %v5327_v49, 5 }
 0x3e1   : > { %v2276_v59 = vrot.slane %v2275_v9, 1  ;;  %v2240_v63 = vrot.slane %v2239_v10, 1  ;;  %v2245_v17 = vrot.slane %v2244_v58, 4  ;;  %3282 = vperm.xlu2 %4014, %v3271_v38   ;;  %4013 = vset.pattern.permute.xlu1 %v4908_v45  ;;  %4214 = vpow2.f32 %v1916_v53 }
 0x3e2   : > { %4037 = vset.pattern.permute.xlu0 %v4908_v45  ;;  %v1831_v36 = vperm.slane %v1815_v32, 0  ;;  %v1832_v32 = vperm.slane %v1816_v34, 0 }
 0x3e3   : > { %v2277_v5 = vadd.f32 %v2276_v59, %v2275_v9  ;;  %v2241_v29 = vadd.f32 %v2240_v63, %v2239_v10  ;;  %v2246_v0 = vadd.f32 %v2245_v17, %v2244_v58  ;;  %v5441_v15 = vpop.permute.xlu2 %2085  ;;  %v1835_v10 = vperm.slane %v1819_v39, 0  ;;  %v4213_v17 = vpop.eup %4212 }
 0x3e4   : > { %v2251_v59 = vsel %vm921_vm9, %v2177_v8, 0.0  ;;  %v1873_v57 = vmul.f32 %v5321_v40, %v1831_v36  ;;  %v1874_v34 = vmul.f32 %v5306_v35, %v1832_v32 }
 0x3e5   : > { %v5435_v33 = vmul.f32 %v2277_v5, %v5429_v62  ;;  %v2377_v28 = vmul.f32 %v2346_v7, %v2241_v29  ;;  %v2247_v37 = vrot.slane %v2246_v0, 2  ;;  %v1881_v2 = vmul.f32 %v5321_v40, %v1835_v10  ;;  %v5451_v29 = vpop.f32.mrf.mxu3 }
 0x3e6   : > { %v1880_v50 = vmul.f32 %v5306_v35, %v1835_v10 }
 0x3e7   : > { %v2411_v1 = vrot.slane %v2377_v28, 4  ;;  %v2248_v3 = vadd.f32 %v2247_v37, %v2246_v0  ;;  %v4215_v5 = vpop.eup %4214  ;;  %v2179_v37 = vmul.f32 %v4213_v17, %v5389_v44  ;;  %v1940_v39 = vmul.f32 1.442695, %v1881_v2 }
 0x3e8   : > { %v1938_v44 = vmul.f32 1.442695, %v1880_v50 }
 0x3e9   : > { %v2412_v19 = vsel %vm1763_vm0, %v2411_v1, %v2410_v18  ;;  %v2249_v56 = vrot.slane %v2248_v3, 1  ;;  %3386 = vperm.xlu2 %4014, %v3375_v26   ;;  %3276 = vperm.xlu1 %4013, %v3271_v38   ;;  %4216 = vpow2.f32 %v1940_v39 }
 0x3ea   : > { %2762 = vperm.xlu0 %4037, %v6115_v30  }
 0x3eb   : > { %v2250_v55 = vadd.f32 %v2249_v56, %v2248_v3  ;;  %v2047_v9 = vpop.permute.xlu1 %2046  ;;  %v5460_v1 = vpop.permute.xlu2 %2098  ;;  %v1924_v56 = vmul.f32 1.442695, %v1873_v57 }
 0x3ec   : > { %v2178_v58 = vmul.f32 %v4211_v23, %v2047_v9  ;;  %v1872_v23 = vmul.f32 %v5306_v35, %v1831_v36  ;;  %v2796_v36 = vperm.slane %v5403_v51, 7 }
 0x3ed   : > { %v2378_v18 = vmul.f32 %v2347_v11, %v2250_v55  ;;  %v2260_v11 = vsel %vm921_vm9, %v2179_v37, 0.0  ;;  %v5465_v55 = vpop.permute.xlu0 %2105  ;;  %4218 = vpow2.f32 %v1924_v56  ;;  %v1926_v56 = vmul.f32 1.442695, %v1874_v34 }
 0x3ee   : > { %v2252_v63 = vsel %vm921_vm9, %v2178_v58, 0.0  ;;  %v3284_v58 = vperm.slane %v5160_v6, 3  ;;  %4220 = vpow2.f32 %v1938_v44 }
 0x3ef   : > { %v2413_v38 = vrot.slane %v2378_v18, 3  ;;  %v2253_v7 = vadd.f32 %v2252_v63, %v2251_v59  ;;  %v1922_v18 = vmul.f32 1.442695, %v1872_v23  ;;  %v1875_v59 = vmul.f32 %v5321_v40, %v1832_v32 }
 0x3f0   : > { %v6122_v32 = vperm.slane %v5160_v6, 0 }
 0x3f1   : > { %v2414_v0 = vsel %vm1766_vm1, %v2413_v38, %v2412_v19  ;;  %v2254_v28 = vrot.slane %v2253_v7, 4  ;;  %4017 = vset.pattern.permute.xlu2 %v4908_v45  ;;  %3380 = vperm.xlu1 %4013, %v3375_v26   ;;  %v2348_v38 = vrot.slane %v5327_v49, 6  ;;  %4222 = vpow2.f32 %v1922_v18 }
 0x3f2   : > { %4042 = vset.pattern.permute.xlu0 %v4906_v42 }
 0x3f3   : > { %v2255_v3 = vadd.f32 %v2254_v28, %v2253_v7  ;;  %v2060_v53 = vpop.permute.xlu1 %2059  ;;  %v5476_v7 = vpop.f32.mrf.mxu3  ;;  %v1928_v28 = vmul.f32 1.442695, %v1875_v59  ;;  %v2349_v59 = vrot.slane %v5327_v49, 7 }
 0x3f4   : > { %v2180_v19 = vmul.f32 %v4215_v5, %v2060_v53 }
 0x3f5   : > { %v2256_v8 = vrot.slane %v2255_v3, 2  ;;  %v2138_v23 = vpop.permute.xlu0 %2137  ;;  %4224 = vpow2.f32 %v1928_v28 }
 0x3f6   : > { %v2261_v26 = vsel %vm921_vm9, %v2180_v19, 0.0  ;;  %4226 = vpow2.f32 %v1926_v56 }
 0x3f7   : > { %v2257_v9 = vadd.f32 %v2256_v8, %v2255_v3  ;;  %v2262_v10 = vadd.f32 %v2261_v26, %v2260_v11  ;;  %v4217_v3 = vpop.eup %4216  ;;  %v1817_v11 = vrot.slane %v5342_v47, 3 }
 0x3f8   : > { %v4219_v53 = vpop.eup %4218 }
 0x3f9   : > { %v2258_v63 = vrot.slane %v2257_v9, 1  ;;  %v2263_v17 = vrot.slane %v2262_v10, 4  ;;  %3289 = vperm.xlu2 %4017, %v3284_v58   ;;  %4016 = vset.pattern.permute.xlu1 %v4906_v42  ;;  %v4221_v8 = vpop.eup %4220  ;;  %v2184_v18 = vmul.f32 %v4219_v53, %v5441_v15 }
 0x3fa   : > { %2807 = vperm.xlu0 %4042, %v2796_v36   ;;  %v4223_v26 = vpop.eup %4222 }
 0x3fb   : > { %v2259_v2 = vadd.f32 %v2258_v63, %v2257_v9  ;;  %v2264_v5 = vadd.f32 %v2263_v17, %v2262_v10  ;;  %v5478_v57 = vpop.permute.xlu2 %2118  ;;  %v2192_v10 = vmul.f32 %v4217_v3, %v2138_v23  ;;  %v5490_v34 = vpop.f32.mrf.mxu3 }
 0x3fc   : > { %v4225_v3 = vpop.eup %4224 }
 0x3fd   : > { %v2379_v37 = vmul.f32 %v2348_v38, %v2259_v2  ;;  %v2265_v50 = vrot.slane %v2264_v5, 2  ;;  %v1833_v2 = vperm.slane %v1817_v11, 0  ;;  %v2315_v28 = vsel %vm921_vm9, %v2192_v10, 0.0  ;;  %v4227_v56 = vpop.eup %4226 }
 0x3fe   : > { %v1818_v11 = vrot.slane %v5342_v47, 4 }
 0x3ff   : > { %v2415_v39 = vrot.slane %v2379_v37, 2  ;;  %v2266_v19 = vadd.f32 %v2265_v50, %v2264_v5  ;;  %v2279_v37 = vsel %vm921_vm9, %v2184_v18, 0.0  ;;  %v1877_v10 = vmul.f32 %v5321_v40, %v1833_v2 }
 0x401   : > { %v2416_v44 = vsel %vm1769_vm6, %v2415_v39, %v2414_v0  ;;  %v2267_v9 = vrot.slane %v2266_v19, 1  ;;  %3354 = vperm.xlu2 %4017, %v3349_v54   ;;  %3256 = vperm.xlu1 %4016, %v6122_v32   ;;  %v1876_v39 = vmul.f32 %v5306_v35, %v1833_v2  ;;  %v2186_v32 = vmul.f32 %v4225_v3, %v5460_v1 }
 0x402   : > { %4043 = vset.pattern.permute.xlu0 %v4908_v45  ;;  %v1932_v1 = vmul.f32 1.442695, %v1877_v10  ;;  %v3388_v2 = vperm.slane %v5191_v4, 3 }
 0x403   : > { %v2268_v63 = vadd.f32 %v2267_v9, %v2266_v19  ;;  %v2132_v17 = vpop.permute.xlu2 %2131  ;;  %v2080_v38 = vpop.permute.xlu1 %2079  ;;  %v6114_v19 = vperm.slane %v5160_v6, 7 }
 0x404   : > { %v2191_v0 = vmul.f32 %v4221_v8, %v2132_v17  ;;  %v2183_v5 = vmul.f32 %v4223_v26, %v2080_v38  ;;  %v5509_v38 = vpop.f32.mrf.mxu3 }
 0x405   : > { %v2380_v54 = vmul.f32 %v2349_v59, %v2268_v63  ;;  %v1930_v63 = vmul.f32 1.442695, %v1876_v39  ;;  %v3103_v3 = vrot.slane %v5509_v38, 1 }
 0x406   : > { %v2314_v15 = vsel %vm921_vm9, %v2191_v0, 0.0  ;;  %v2278_v50 = vsel %vm921_vm9, %v2183_v5, 0.0  ;;  %v1834_v0 = vperm.slane %v1818_v11, 0  ;;  %v2350_v11 = vrot.slane %v5429_v62, 1 }
 0x407   : > { %v2417_v49 = vrot.slane %v2380_v54, 1  ;;  %v2316_v53 = vadd.f32 %v2315_v28, %v2314_v15  ;;  %v2280_v23 = vadd.f32 %v2279_v37, %v2278_v50  ;;  %v2288_v28 = vsel %vm921_vm9, %v2186_v32, 0.0 }
 0x408   : > { %4228 = vpow2.f32 %v1930_v63  ;;  %v1879_v10 = vmul.f32 %v5321_v40, %v1834_v0 }
 0x409   : > { %v5499_v8 = vsel %vm1772_vm7, %v2417_v49, %v2416_v44  ;;  %v2317_v26 = vrot.slane %v2316_v53, 4  ;;  %v2281_v9 = vrot.slane %v2280_v23, 4  ;;  %4020 = vset.pattern.permute.xlu2 %v4906_v42  ;;  %3295 = vperm.xlu1 %4016, %v3284_v58   ;;  %v1878_v49 = vmul.f32 %v5306_v35, %v1834_v0 }
 0x40a   : > { %3341 = vperm.xlu0 %4043, %v6114_v19   ;;  %4230 = vpow2.f32 %v1932_v1  ;;  %v1936_v19 = vmul.f32 1.442695, %v1879_v10 }
 0x40b   : > { %v2318_v18 = vadd.f32 %v2317_v26, %v2316_v53  ;;  %v2282_v59 = vadd.f32 %v2281_v9, %v2280_v23  ;;  %v2093_v44 = vpop.permute.xlu1 %2092 }
 0x40c   : > { %v2185_v17 = vmul.f32 %v4227_v56, %v2093_v44  ;;  %v2354_v56 = vrot.slane %v5429_v62, 5 }
 0x40d   : > { %v2319_v5 = vrot.slane %v2318_v18, 2  ;;  %v2283_v54 = vrot.slane %v2282_v59, 2 }
 0x40e   : > { %v2287_v58 = vsel %vm921_vm9, %v2185_v17, 0.0 }
 0x40f   : > { %v2320_v37 = vadd.f32 %v2319_v5, %v2318_v18  ;;  %v2284_v15 = vadd.f32 %v2283_v54, %v2282_v59  ;;  %v2289_v50 = vadd.f32 %v2288_v28, %v2287_v58  ;;  %v3119_v18 = vperm.slane %v3103_v3, 0  ;;  %v4229_v5 = vpop.eup %4228 }
 0x410   : > { %v1934_v59 = vmul.f32 1.442695, %v1878_v49  ;;  %v3297_v58 = vperm.slane %v5160_v6, 4  ;;  %v4231_v1 = vpop.eup %4230  ;;  %v2187_v3 = vmul.f32 %v4229_v5, %v5465_v55  ;;  %v1821_v5 = vrot.slane %v5342_v47, 7 }
 0x411   : > { %v2321_v53 = vrot.slane %v2320_v37, 1  ;;  %v2285_v23 = vrot.slane %v2284_v15, 1  ;;  %v2290_v39 = vrot.slane %v2289_v50, 4  ;;  %3399 = vperm.xlu2 %4020, %v3388_v2   ;;  %4019 = vset.pattern.permute.xlu1 %v4908_v45  ;;  %v3161_v30 = vmul.f32 %v5321_v40, %v3119_v18 }
 0x412   : > { %4044 = vset.pattern.permute.xlu0 %v4906_v42  ;;  %4232 = vpow2.f32 %v1934_v59  ;;  %v5535_v59 = vpop.permute.xlu0 %3263 }
 0x413   : > { %v2322_v26 = vadd.f32 %v2321_v53, %v2320_v37  ;;  %v2286_v9 = vadd.f32 %v2285_v23, %v2284_v15  ;;  %v2291_v32 = vadd.f32 %v2290_v39, %v2289_v50  ;;  %v5527_v15 = vpop.permute.xlu2 %2150  ;;  %v1820_v50 = vrot.slane %v5342_v47, 6 }
 0x414   : > { %v2351_v53 = vrot.slane %v5429_v62, 2  ;;  %4234 = vpow2.f32 %v1936_v19  ;;  %v3160_v39 = vmul.f32 %v5306_v35, %v3119_v18 }
 0x415   : > { %v5521_v44 = vmul.f32 %v2354_v56, %v2322_v26  ;;  %v2382_v63 = vmul.f32 %v2350_v11, %v2286_v9  ;;  %v2292_v17 = vrot.slane %v2291_v32, 2  ;;  %v3212_v56 = vmul.f32 1.442695, %v3161_v30 }
 0x416   : > { %v2296_v9 = vsel %vm921_vm9, %v2187_v3, 0.0 }
 0x417   : > { %v2419_v54 = vrot.slane %v2382_v63, 7  ;;  %v2293_v28 = vadd.f32 %v2292_v17, %v2291_v32  ;;  %v3310_v63 = vperm.slane %v5160_v6, 5  ;;  %v3210_v17 = vmul.f32 1.442695, %v3160_v39 }
 0x418   : > { %v4233_v10 = vpop.eup %4232  ;;  %4236 = vpow2.f32 %v3212_v56 }
 0x419   : > { %v2420_v37 = vsel %vm1754_vm14, %v2419_v54, %v5435_v33  ;;  %v2294_v0 = vrot.slane %v2293_v28, 1  ;;  %3308 = vperm.xlu2 %4020, %v3297_v58   ;;  %3393 = vperm.xlu1 %4019, %v3388_v2   ;;  %v1836_v33 = vperm.slane %v1820_v50, 0  ;;  %4238 = vpow2.f32 %v3210_v17 }
 0x41a   : > { %v4235_v19 = vpop.eup %4234  ;;  %v2352_v17 = vrot.slane %v5429_v62, 3 }
 0x41b   : > { %v2295_v49 = vadd.f32 %v2294_v0, %v2293_v28  ;;  %v2112_v23 = vpop.permute.xlu1 %2111  ;;  %v1883_v30 = vmul.f32 %v5321_v40, %v1836_v33  ;;  %v2189_v28 = vmul.f32 %v4233_v10, %v5478_v57  ;;  %v1882_v3 = vmul.f32 %v5306_v35, %v1836_v33 }
 0x41c   : > { %v2188_v11 = vmul.f32 %v4231_v1, %v2112_v23  ;;  %v5544_v1 = vpop.permute.xlu2 %2163  ;;  %v3323_v57 = vperm.slane %v5160_v6, 6 }
 0x41d   : > { %v2383_v26 = vmul.f32 %v2351_v53, %v2295_v49  ;;  %v1837_v53 = vperm.slane %v1821_v5, 0  ;;  %v2305_v47 = vsel %vm921_vm9, %v2189_v28, 0.0 }
 0x41e   : > { %v2297_v32 = vsel %vm921_vm9, %v2188_v11, 0.0  ;;  %v4237_v39 = vpop.eup %4236  ;;  %v3374_v11 = vpop.permute.xlu0 %3373 }
 0x41f   : > { %v2421_v2 = vrot.slane %v2383_v26, 6  ;;  %v2298_v55 = vadd.f32 %v2297_v32, %v2296_v9  ;;  %v1942_v9 = vmul.f32 1.442695, %v1882_v3  ;;  %v4239_v32 = vpop.eup %4238  ;;  %v1885_v10 = vmul.f32 %v5321_v40, %v1837_v53 }
 0x421   : > { %v2422_v18 = vsel %vm1757_vm4, %v2421_v2, %v2420_v37  ;;  %v2299_v54 = vrot.slane %v2298_v55, 4  ;;  %3321 = vperm.xlu2 %4020, %v3310_v63   ;;  %3302 = vperm.xlu1 %4019, %v3297_v58   ;;  %v1944_v37 = vmul.f32 1.442695, %v1883_v30 }
 0x423   : > { %v2300_v0 = vadd.f32 %v2299_v54, %v2298_v55  ;;  %v2125_v50 = vpop.permute.xlu1 %2124  ;;  %4240 = vpow2.f32 %v1944_v37  ;;  %v3472_v55 = vmul.f32 %v4237_v39, %v3374_v11  ;;  %v1884_v54 = vmul.f32 %v5306_v35, %v1837_v53 }
 0x424   : > { %v2190_v49 = vmul.f32 %v4235_v19, %v2125_v50  ;;  %4242 = vpow2.f32 %v1942_v9 }
 0x425   : > { %v2301_v23 = vrot.slane %v2300_v0, 2 }
 0x426   : > { %v2306_v56 = vsel %vm921_vm9, %v2190_v49, 0.0  ;;  %v3567_v49 = vsel %vm921_vm9, %v3472_v55, 0.0  ;;  %v2353_v55 = vrot.slane %v5429_v62, 4 }
 0x427   : > { %v2302_v58 = vadd.f32 %v2301_v23, %v2300_v0  ;;  %v2307_v26 = vadd.f32 %v2306_v56, %v2305_v47  ;;  %v1948_v0 = vmul.f32 1.442695, %v1885_v10  ;;  %v3427_v23 = vperm.slane %v5191_v4, 6 }
 0x429   : > { %v2303_v33 = vrot.slane %v2302_v58, 1  ;;  %v2308_v2 = vrot.slane %v2307_v26, 4  ;;  %3334 = vperm.xlu2 %4020, %v3323_v57   ;;  %4022 = vset.pattern.permute.xlu1 %v4906_v42  ;;  %v4241_v47 = vpop.eup %4240  ;;  %4244 = vpow2.f32 %v1948_v0 }
 0x42a   : > { %v4243_v9 = vpop.eup %4242 }
 0x42b   : > { %v2304_v19 = vadd.f32 %v2303_v33, %v2302_v58  ;;  %v2309_v30 = vadd.f32 %v2308_v2, %v2307_v26  ;;  %v3368_v5 = vpop.permute.xlu2 %3367  ;;  %v1946_v58 = vmul.f32 1.442695, %v1884_v54  ;;  %v3096_v26 = vrot.slane %v5490_v34, 1 }
 0x42c   : > { %v3471_v28 = vmul.f32 %v4239_v32, %v3368_v5  ;;  %v2194_v33 = vmul.f32 %v4241_v47, %v5527_v15  ;;  %v2601_v47 = vperm.slane %v5297_v43, 0 }
 0x42d   : > { %v2384_v50 = vmul.f32 %v2352_v17, %v2304_v19  ;;  %v2310_v3 = vrot.slane %v2309_v30, 2  ;;  %4246 = vpow2.f32 %v1946_v58  ;;  %v3111_v5 = vperm.slane %v3096_v26, 0 }
 0x42e   : > { %v3566_v37 = vsel %vm921_vm9, %v3471_v28, 0.0  ;;  %v4378_v28 = vld [vmem:[#allocation1] sm:$0xff] }
 0x42f   : > { %v2423_v39 = vrot.slane %v2384_v50, 5  ;;  %v2311_v56 = vadd.f32 %v2310_v3, %v2309_v30  ;;  %v3568_v11 = vadd.f32 %v3567_v49, %v3566_v37  ;;  %v5568_v0 = vmul.f32 %v4378_v28, %v4903_v31  ;;  %v4245_v3 = vpop.eup %4244 }
 0x430   : > { %v2324_v50 = vsel %vm921_vm9, %v2194_v33, 0.0 }
 0x431   : > { %v2424_v53 = vsel %vm1760_vm15, %v2423_v39, %v2422_v18  ;;  %v2312_v32 = vrot.slane %v2311_v56, 1  ;;  %v3569_v10 = vrot.slane %v3568_v11, 4  ;;  %3438 = vperm.xlu2 %4020, %v3427_v23   ;;  %3412 = vperm.xlu1 %4022, %v3401_v41   ;;  %v2427_v39 = vrot.slane %v5521_v44, 3 }
 0x433   : > { %v2313_v2 = vadd.f32 %v2312_v32, %v2311_v56  ;;  %v3570_v17 = vadd.f32 %v3569_v10, %v3568_v11  ;;  %v2145_v19 = vpop.permute.xlu1 %2144  ;;  %v4247_v56 = vpop.eup %4246  ;;  %v3144_v11 = vmul.f32 %v5306_v35, %v3111_v5  ;;  %v3638_v10 = vrot.slane %v5568_v0, 1 }
 0x434   : > { %v2193_v30 = vmul.f32 %v4243_v9, %v2145_v19  ;;  %v2196_v9 = vmul.f32 %v4245_v3, %v5544_v1  ;;  %v3145_v35 = vmul.f32 %v5321_v40, %v3111_v5  ;;  %v2355_v5 = vrot.slane %v5429_v62, 6 }
 0x435   : > { %v2385_v54 = vmul.f32 %v2353_v55, %v2313_v2  ;;  %v3571_v18 = vrot.slane %v3570_v17, 2 }
 0x436   : > { %v2323_v41 = vsel %vm921_vm9, %v2193_v30, 0.0  ;;  %v2333_v30 = vsel %vm921_vm9, %v2196_v9, 0.0  ;;  %v3180_v28 = vmul.f32 1.442695, %v3145_v35  ;;  %v2627_v9 = vperm.slane %v5297_v43, 2 }
 0x437   : > { %v2425_v15 = vrot.slane %v2385_v54, 4  ;;  %v3572_v49 = vadd.f32 %v3571_v18, %v3570_v17  ;;  %v2325_v37 = vadd.f32 %v2324_v50, %v2323_v41 }
 0x439   : > { %v2426_v58 = vsel %vm1763_vm0, %v2425_v15, %v2424_v53  ;;  %v3573_v26 = vrot.slane %v3572_v49, 1  ;;  %v2326_v31 = vrot.slane %v2325_v37, 4  ;;  %2612 = vperm.xlu2 %4020, %v2601_v47   ;;  %4023 = vset.pattern.permute.xlu1 %v4908_v45  ;;  %v3178_v53 = vmul.f32 1.442695, %v3144_v11 }
 0x43a   : > { %v2428_v32 = vsel %vm1766_vm1, %v2427_v39, %v2426_v58  ;;  %v3097_v15 = vrot.slane %v5490_v34, 2 }
 0x43b   : > { %v3574_v33 = vadd.f32 %v3573_v26, %v3572_v49  ;;  %v2327_v44 = vadd.f32 %v2326_v31, %v2325_v37  ;;  %v2158_v2 = vpop.permute.xlu1 %2157  ;;  %4248 = vpow2.f32 %v3178_v53  ;;  %v5587_v3 = vpop.permute.xlu2 %3282  ;;  %v3118_v37 = vperm.slane %v5509_v38, 0 }
 0x43c   : > { %v2195_v55 = vmul.f32 %v4247_v56, %v2158_v2  ;;  %4250 = vpow2.f32 %v3180_v28  ;;  %v3112_v11 = vperm.slane %v3097_v15, 0 }
 0x43d   : > { %v5583_v17 = vmul.f32 %v3638_v10, %v3574_v33  ;;  %v2328_v19 = vrot.slane %v2327_v44, 2  ;;  %v5599_v10 = vld [vmem:[%s6101_s6 + $0x8] sm:$0xff] }
 0x43e   : > { %v2332_v54 = vsel %vm921_vm9, %v2195_v55, 0.0  ;;  %v3147_v35 = vmul.f32 %v5599_v10, %v3112_v11  ;;  %v3104_v55 = vrot.slane %v5509_v38, 2 }
 0x43f   : > { %v2329_v18 = vadd.f32 %v2328_v19, %v2327_v44  ;;  %v2334_v1 = vadd.f32 %v2333_v30, %v2332_v54  ;;  %v5612_v19 = vld [vmem:[%s6101_s6] sm:$0xff]  ;;  %v2356_v54 = vrot.slane %v5429_v62, 7 }
 0x440   : > { %v3158_v30 = vmul.f32 %v5612_v19, %v3118_v37  ;;  %v3146_v28 = vmul.f32 %v5612_v19, %v3112_v11 }
 0x441   : > { %v2330_v50 = vrot.slane %v2329_v18, 1  ;;  %v2335_v41 = vrot.slane %v2334_v1, 4  ;;  %4027 = vset.pattern.permute.xlu2 %v4908_v45  ;;  %3315 = vperm.xlu1 %4023, %v3310_v63   ;;  %v4249_v58 = vpop.eup %4248  ;;  %v3159_v63 = vmul.f32 %v5599_v10, %v3118_v37 }
 0x442   : > { %v4251_v33 = vpop.eup %4250  ;;  %v3455_v53 = vmul.f32 %v4249_v58, %v5535_v59  ;;  %v3120_v59 = vperm.slane %v3104_v55, 0  ;;  %v3182_v62 = vmul.f32 1.442695, %v3146_v28 }
 0x443   : > { %v2331_v40 = vadd.f32 %v2330_v50, %v2329_v18  ;;  %v2336_v49 = vadd.f32 %v2335_v41, %v2334_v1  ;;  %v5616_v18 = vpop.permute.xlu2 %3386  ;;  %v3208_v50 = vmul.f32 1.442695, %v3159_v63  ;;  %v2435_v63 = vsel %vm921_vm9, %v5499_v8, 0.0 }
 0x444   : > { %v3163_v11 = vmul.f32 %v5599_v10, %v3120_v59 }
 0x445   : > { %v2387_v39 = vmul.f32 %v2355_v5, %v2331_v40  ;;  %v2337_v56 = vrot.slane %v2336_v49, 2  ;;  %v3184_v40 = vmul.f32 1.442695, %v3147_v35  ;;  %v3494_v5 = vsel %vm921_vm9, %v3455_v53, 0.0 }
 0x446   : > { %4252 = vpow2.f32 %v3208_v50 }
 0x447   : > { %v2429_v26 = vrot.slane %v2387_v39, 2  ;;  %v2338_v31 = vadd.f32 %v2337_v56, %v2336_v49  ;;  %v3206_v39 = vmul.f32 1.442695, %v3158_v30  ;;  %v5621_v56 = vpop.permute.xlu0 %3250  ;;  %4254 = vpow2.f32 %v3184_v40 }
 0x448   : > { %v3216_v30 = vmul.f32 1.442695, %v3163_v11  ;;  %v3110_v11 = vperm.slane %v5490_v34, 0 }
 0x449   : > { %v2430_v44 = vsel %vm1769_vm6, %v2429_v26, %v2428_v32  ;;  %v2339_v2 = vrot.slane %v2338_v31, 1  ;;  %2632 = vperm.xlu2 %4027, %v2627_v9   ;;  %4024 = vset.pattern.permute.xlu1 %v4906_v42  ;;  %4256 = vpow2.f32 %v3206_v39 }
 0x44a   : > { %4258 = vpow2.f32 %v3182_v62 }
 0x44b   : > { %v2340_v32 = vadd.f32 %v2339_v2, %v2338_v31  ;;  %v3270_v1 = vpop.permute.xlu1 %3269  ;;  %4260 = vpow2.f32 %v3216_v30 }
 0x44c   : > { %v3456_v41 = vmul.f32 %v4251_v33, %v3270_v1 }
 0x44d   : > { %v2388_v15 = vmul.f32 %v2356_v54, %v2340_v32 }
 0x44e   : > { %v3495_v49 = vsel %vm921_vm9, %v3456_v41, 0.0 }
 0x44f   : > { %v2431_v37 = vrot.slane %v2388_v15, 1  ;;  %v3496_v58 = vadd.f32 %v3495_v49, %v3494_v5  ;;  %v3361_v8 = vpop.permute.xlu0 %3360 }
 0x451   : > { %v2432_v26 = vsel %vm1772_vm7, %v2431_v37, %v2430_v44  ;;  %v3497_v31 = vrot.slane %v3496_v58, 4  ;;  %2645 = vperm.xlu2 %4027, %v2640_v46   ;;  %3425 = vperm.xlu1 %4024, %v3414_v48   ;;  %v3162_v44 = vmul.f32 %v5612_v19, %v3120_v59  ;;  %v4253_v46 = vpop.eup %4252  ;;  %v5637_v48 = vmul.f32 %v4914_v52, %v4850_v27 }
 0x452   : > { %v2436_v33 = vsel %vm921_vm9, %v2432_v26, 0.0  ;;  %v4255_v54 = vpop.eup %4254  ;;  %v3470_v59 = vmul.f32 %v4253_v46, %v3361_v8  ;;  %v4381_v46 = vld [vmem:[%s6102_s7] sm:$0x1]  ;;  %v3098_v8 = vrot.slane %v5490_v34, 3 }
 0x453   : > { %v2437_v2 = vadd.f32 %v2436_v33, %v2435_v63  ;;  %v3498_v35 = vadd.f32 %v3497_v31, %v3496_v58  ;;  %v5632_v55 = vpop.permute.xlu2 %3289  ;;  %v3214_v50 = vmul.f32 1.442695, %v3162_v44  ;;  %v4257_v41 = vpop.eup %4256  ;;  %v3458_v49 = vmul.f32 %v4255_v54, %v5587_v3 }
 0x454   : > { %v4259_v15 = vpop.eup %4258  ;;  %v3631_v27 = vrot.slane %v5637_v48, 1  ;;  %v3558_v33 = vsel %vm921_vm9, %v3470_v59, 0.0  ;;  %v2448_v54 = vmul.f32 %v4381_v46, %v4837_v24 }
 0x455   : > { %v2438_v53 = vrot.slane %v2437_v2, 4  ;;  %v3499_v32 = vrot.slane %v3498_v35, 2  ;;  %4262 = vpow2.f32 %v3214_v50  ;;  %v4261_v44 = vpop.eup %4260  ;;  %v3142_v50 = vmul.f32 %v5612_v19, %v3110_v11 }
 0x457   : > { %v2439_v1 = vadd.f32 %v2438_v53, %v2437_v2  ;;  %v3500_v28 = vadd.f32 %v3499_v32, %v3498_v35  ;;  %v3504_v2 = vsel %vm921_vm9, %v3458_v49, 0.0  ;;  %v2653_v32 = vperm.slane %v5297_v43, 4 }
 0x459   : > { %v2440_v40 = vrot.slane %v2439_v1, 2  ;;  %v3501_v5 = vrot.slane %v3500_v28, 1  ;;  %4030 = vset.pattern.permute.xlu2 %v4906_v42  ;;  %4025 = vset.pattern.permute.xlu1 %v4908_v45 }
 0x45b   : > { %v2441_v39 = vadd.f32 %v2440_v40, %v2439_v1  ;;  %v3502_v37 = vadd.f32 %v3501_v5, %v3500_v28  ;;  %v3355_v52 = vpop.permute.xlu2 %3354  ;;  %v3277_v58 = vpop.permute.xlu1 %3276  ;;  %v3474_v40 = vmul.f32 %v4261_v44, %v5616_v18  ;;  %v3143_v5 = vmul.f32 %v5599_v10, %v3110_v11 }
 0x45c   : > { %v3469_v62 = vmul.f32 %v4257_v41, %v3355_v52  ;;  %v3457_v26 = vmul.f32 %v4259_v15, %v3277_v58  ;;  %v4263_v28 = vpop.eup %4262  ;;  %v3174_v58 = vmul.f32 1.442695, %v3142_v50 }
 0x45d   : > { %v2442_v31 = vrot.slane %v2441_v39, 1  ;;  %v5644_v63 = vmul.f32 %v3631_v27, %v3502_v37 }
 0x45e   : > { %v3557_v3 = vsel %vm921_vm9, %v3469_v62, 0.0  ;;  %v3503_v35 = vsel %vm921_vm9, %v3457_v26, 0.0  ;;  %4264 = vpow2.f32 %v3174_v58  ;;  %v3105_v58 = vrot.slane %v5509_v38, 3 }
 0x45f   : > { %v3559_v53 = vadd.f32 %v3558_v33, %v3557_v3  ;;  %v3505_v30 = vadd.f32 %v3504_v2, %v3503_v35  ;;  %v2443_v1 = vadd.f32 %v2442_v31, %v2441_v39  ;;  %v3113_v39 = vperm.slane %v3098_v8, 0 }
 0x460   : > { %v3576_v31 = vsel %vm921_vm9, %v3474_v40, 0.0  ;;  %v3176_v2 = vmul.f32 1.442695, %v3143_v5  ;;  %v2666_v35 = vperm.slane %v5297_v43, 5 }
 0x461   : > { %v3560_v41 = vrot.slane %v3559_v53, 4  ;;  %v3506_v15 = vrot.slane %v3505_v30, 4  ;;  %2664 = vperm.xlu2 %4030, %v2653_v32   ;;  %3328 = vperm.xlu1 %4025, %v3323_v57   ;;  %v2449_v59 = vadd.f32 %v2448_v54, %v2443_v1  ;;  %v3148_v44 = vmul.f32 %v5612_v19, %v3113_v39 }
 0x462   : > { %4266 = vpow2.f32 %v3176_v2  ;;  %v3149_v50 = vmul.f32 %v5599_v10, %v3113_v39  ;;  %v3639_v39 = vrot.slane %v5568_v0, 2 }
 0x463   : > { %v3561_v24 = vadd.f32 %v3560_v41, %v3559_v53  ;;  %v3507_v49 = vadd.f32 %v3506_v15, %v3505_v30  ;;  %v3381_v37 = vpop.permute.xlu1 %3380  ;;  %v3739_v52 = vrot.slane %v2449_v59, 7  ;;  %v3186_v41 = vmul.f32 1.442695, %v3148_v44 }
 0x464   : > { %v3473_v27 = vmul.f32 %v4263_v28, %v3381_v37  ;;  %v3707_v15 = vrot.slane %v5583_v17, 7  ;;  %v3188_v37 = vmul.f32 1.442695, %v3149_v50 }
 0x465   : > { %v3562_v62 = vrot.slane %v3561_v24, 2  ;;  %v3508_v26 = vrot.slane %v3507_v49, 2  ;;  %v5667_v57 = vsel %vm3747_vm2, %v5384_v61, %v3739_v52  ;;  %v3632_v61 = vrot.slane %v5637_v48, 2 }
 0x466   : > { %v3575_v33 = vsel %vm921_vm9, %v3473_v27, 0.0  ;;  %4268 = vpow2.f32 %v3186_v41  ;;  %vm3751_vm2 = vcmask 1042432  }
 0x467   : > { %v3563_v18 = vadd.f32 %v3562_v62, %v3561_v24  ;;  %v3509_v11 = vadd.f32 %v3508_v26, %v3507_v49  ;;  %v3577_v3 = vadd.f32 %v3576_v31, %v3575_v33  ;;  %v4265_v24 = vpop.eup %4264  ;;  %4270 = vpow2.f32 %v3188_v37 }
 0x468   : > { %v4267_v27 = vpop.eup %4266  ;;  %v3453_v17 = vmul.f32 %v4265_v24, %v5621_v56 }
 0x469   : > { %v3564_v53 = vrot.slane %v3563_v18, 1  ;;  %v3510_v30 = vrot.slane %v3509_v11, 1  ;;  %v3578_v46 = vrot.slane %v3577_v3, 4  ;;  %2677 = vperm.xlu2 %4030, %v2666_v35   ;;  %3432 = vperm.xlu1 %4025, %v3427_v23  }
 0x46b   : > { %v3565_v54 = vadd.f32 %v3564_v53, %v3563_v18  ;;  %v3511_v8 = vadd.f32 %v3510_v30, %v3509_v11  ;;  %v3579_v1 = vadd.f32 %v3578_v46, %v3577_v3  ;;  %v5676_v28 = vpop.permute.xlu2 %3399  ;;  %v3121_v18 = vperm.slane %v3105_v58, 0 }
 0x46c   : > { %v3485_v11 = vsel %vm921_vm9, %v3453_v17, 0.0  ;;  %v4269_v44 = vpop.eup %4268 }
 0x46d   : > { %v3669_v40 = vmul.f32 %v3565_v54, %v5568_v0  ;;  %v5681_v5 = vmul.f32 %v3632_v61, %v3511_v8  ;;  %v3580_v59 = vrot.slane %v3579_v1, 2  ;;  %v4271_v56 = vpop.eup %4270  ;;  %v3165_v61 = vmul.f32 %v5599_v10, %v3121_v18 }
 0x46e   : > { %v3099_v54 = vrot.slane %v5490_v34, 4 }
 0x46f   : > { %v3708_v23 = vsel %vm1754_vm14, %v3707_v15, %v3669_v40  ;;  %v3581_v49 = vadd.f32 %v3580_v59, %v3579_v1  ;;  %v3459_v1 = vmul.f32 %v4269_v44, %v5632_v55  ;;  %v3164_v15 = vmul.f32 %v5612_v19, %v3121_v18 }
 0x470   : > { %v3220_v59 = vmul.f32 1.442695, %v3165_v61  ;;  %v3114_v24 = vperm.slane %v3099_v54, 0 }
 0x471   : > { %v3582_v52 = vrot.slane %v3581_v49, 1  ;;  %4033 = vset.pattern.permute.xlu2 %v4908_v45  ;;  %2606 = vperm.xlu1 %4025, %v2601_v47   ;;  %v2692_v47 = vperm.slane %v5297_v43, 7  ;;  %v3512_v37 = vsel %vm921_vm9, %v3459_v1, 0.0  ;;  %v3218_v17 = vmul.f32 1.442695, %v3164_v15  ;;  %v5727_v15 = vpop.permute.xlu0 %3406 }
 0x472   : > { %4272 = vpow2.f32 %v3220_v59  ;;  %v3151_v55 = vmul.f32 %v5599_v10, %v3114_v24  ;;  %v3150_v18 = vmul.f32 %v5612_v19, %v3114_v24  ;;  %v3106_v1 = vrot.slane %v5509_v38, 4 }
 0x473   : > { %v3583_v62 = vadd.f32 %v3582_v52, %v3581_v49  ;;  %v5690_v26 = vpop.permute.xlu2 %3308  ;;  %v3257_v31 = vpop.permute.xlu1 %3256  ;;  %4274 = vpow2.f32 %v3218_v17  ;;  %v3633_v59 = vrot.slane %v5637_v48, 3 }
 0x474   : > { %v3454_v33 = vmul.f32 %v4267_v27, %v3257_v31  ;;  %v6123_v31 = vperm.slane %v5297_v43, 1 }
 0x475   : > { %v3671_v2 = vmul.f32 %v3639_v39, %v3583_v62 }
 0x476   : > { %v3486_v3 = vsel %vm921_vm9, %v3454_v33, 0.0 }
 0x477   : > { %v3709_v53 = vrot.slane %v3671_v2, 6  ;;  %v3487_v30 = vadd.f32 %v3486_v3, %v3485_v11  ;;  %v3693_v11 = vrot.slane %v5644_v63, 7  ;;  %v3192_v3 = vmul.f32 1.442695, %v3151_v55 }
 0x479   : > { %v5696_v46 = vsel %vm1757_vm4, %v3709_v53, %v3708_v23  ;;  %v3488_v8 = vrot.slane %v3487_v30, 4  ;;  %2697 = vperm.xlu2 %4033, %v2692_v47   ;;  %4026 = vset.pattern.permute.xlu1 %v4906_v42  ;;  %4276 = vpow2.f32 %v3192_v3 }
 0x47b   : > { %v3489_v50 = vadd.f32 %v3488_v8, %v3487_v30  ;;  %v3296_v41 = vpop.permute.xlu1 %3295  ;;  %v5705_v49 = vpop.permute.xlu2 %3321  ;;  %v3695_v30 = vrot.slane %v5681_v5, 6  ;;  %v3190_v8 = vmul.f32 1.442695, %v3150_v18 }
 0x47c   : > { %v3460_v40 = vmul.f32 %v4271_v56, %v3296_v41  ;;  %v4273_v56 = vpop.eup %4272 }
 0x47d   : > { %v3490_v23 = vrot.slane %v3489_v50, 2  ;;  %v4275_v41 = vpop.eup %4274  ;;  %v3476_v5 = vmul.f32 %v4273_v56, %v5676_v28  ;;  %4278 = vpow2.f32 %v3190_v8 }
 0x47e   : > { %v3513_v27 = vsel %vm921_vm9, %v3460_v40, 0.0 }
 0x47f   : > { %v3491_v52 = vadd.f32 %v3490_v23, %v3489_v50  ;;  %v3514_v58 = vadd.f32 %v3513_v27, %v3512_v37  ;;  %v3122_v23 = vperm.slane %v3106_v1, 0  ;;  %v4277_v17 = vpop.eup %4276 }
 0x481   : > { %v3492_v39 = vrot.slane %v3491_v52, 1  ;;  %v3515_v62 = vrot.slane %v3514_v58, 4  ;;  %2710 = vperm.xlu2 %4033, %v2705_v12   ;;  %2625 = vperm.xlu1 %4026, %v6123_v31   ;;  %v3166_v28 = vmul.f32 %v5612_v19, %v3122_v23  ;;  %v2454_v31 = vrot.slane %v5451_v29, 3 }
 0x483   : > { %v3493_v33 = vadd.f32 %v3492_v39, %v3491_v52  ;;  %v3516_v2 = vadd.f32 %v3515_v62, %v3514_v58  ;;  %v5719_v54 = vpop.permute.xlu2 %3334  ;;  %v3585_v52 = vsel %vm921_vm9, %v3476_v5, 0.0  ;;  %v4279_v62 = vpop.eup %4278  ;;  %v2731_v5 = vperm.slane %v5403_v51, 2 }
 0x485   : > { %v3661_v44 = vmul.f32 %v3493_v33, %v5637_v48  ;;  %v3517_v53 = vrot.slane %v3516_v2, 2 }
 0x487   : > { %v3694_v61 = vsel %vm1754_vm14, %v3693_v11, %v3661_v44  ;;  %v3518_v12 = vadd.f32 %v3517_v53, %v3516_v2  ;;  %v3462_v11 = vmul.f32 %v4277_v17, %v5690_v26  ;;  %v3167_v53 = vmul.f32 %v5599_v10, %v3122_v23 }
 0x488   : > { %v3696_v50 = vsel %vm1757_vm4, %v3695_v30, %v3694_v61  ;;  %v3222_v30 = vmul.f32 1.442695, %v3166_v28  ;;  %v5745_v61 = vpop.permute.xlu0 %3419 }
 0x489   : > { %v3519_v63 = vrot.slane %v3518_v12, 1  ;;  %4036 = vset.pattern.permute.xlu2 %v4906_v42  ;;  %2638 = vperm.xlu1 %4026, %v2627_v9   ;;  %v2718_v9 = vperm.slane %v5403_v51, 1  ;;  %v3522_v1 = vsel %vm921_vm9, %v3462_v11, 0.0 }
 0x48a   : > { %4280 = vpow2.f32 %v3222_v30 }
 0x48b   : > { %v3520_v40 = vadd.f32 %v3519_v63, %v3518_v12  ;;  %v3394_v24 = vpop.permute.xlu1 %3393  ;;  %v5738_v2 = vpop.permute.xlu2 %3438  ;;  %v2469_v12 = vperm.slane %v2454_v31, 0 }
 0x48c   : > { %v3475_v37 = vmul.f32 %v4275_v41, %v3394_v24 }
 0x48d   : > { %v3664_v27 = vmul.f32 %v3633_v59, %v3520_v40  ;;  %v3224_v40 = vmul.f32 1.442695, %v3167_v53  ;;  %v2505_v26 = vmul.f32 %v5599_v10, %v2469_v12  ;;  %v3100_v59 = vrot.slane %v5490_v34, 5 }
 0x48e   : > { %v3584_v58 = vsel %vm921_vm9, %v3475_v37, 0.0  ;;  %v3640_v37 = vrot.slane %v5568_v0, 3  ;;  %v2504_v17 = vmul.f32 %v5612_v19, %v2469_v12 }
 0x48f   : > { %v3697_v55 = vrot.slane %v3664_v27, 5  ;;  %v3586_v39 = vadd.f32 %v3585_v52, %v3584_v58  ;;  %4282 = vpow2.f32 %v3224_v40 }
 0x490   : > { %v4281_v31 = vpop.eup %4280 }
 0x491   : > { %v5736_v33 = vsel %vm1760_vm15, %v3697_v55, %v3696_v50  ;;  %v3587_v18 = vrot.slane %v3586_v39, 4  ;;  %2729 = vperm.xlu2 %4036, %v2718_v9   ;;  %4029 = vset.pattern.permute.xlu1 %v4908_v45  ;;  %v2544_v55 = vmul.f32 1.442695, %v2505_v26 }
 0x493   : > { %v3588_v3 = vadd.f32 %v3587_v18, %v3586_v39  ;;  %v3303_v44 = vpop.permute.xlu1 %3302  ;;  %v5757_v52 = vpop.permute.xlu2 %2612  ;;  %v3115_v39 = vperm.slane %v3100_v59, 0  ;;  %4284 = vpow2.f32 %v2544_v55 }
 0x494   : > { %v3461_v56 = vmul.f32 %v4279_v62, %v3303_v44  ;;  %v5760_v18 = vpop.permute.xlu0 %2619  ;;  %v2542_v44 = vmul.f32 1.442695, %v2504_v17  ;;  %v3107_v17 = vrot.slane %v5509_v38, 5 }
 0x495   : > { %v3589_v8 = vrot.slane %v3588_v3, 2  ;;  %v4283_v53 = vpop.eup %4282  ;;  %v3153_v30 = vmul.f32 %v5599_v10, %v3115_v39  ;;  %v3152_v40 = vmul.f32 %v5612_v19, %v3115_v39 }
 0x496   : > { %v3521_v50 = vsel %vm921_vm9, %v3461_v56, 0.0  ;;  %4286 = vpow2.f32 %v2542_v44  ;;  %v3123_v44 = vperm.slane %v3107_v17, 0 }
 0x497   : > { %v3590_v41 = vadd.f32 %v3589_v8, %v3588_v3  ;;  %v3523_v63 = vadd.f32 %v3522_v1, %v3521_v50  ;;  %v3477_v8 = vmul.f32 %v4281_v31, %v5727_v15  ;;  %v3634_v50 = vrot.slane %v5637_v48, 4 }
 0x498   : > { %v3196_v26 = vmul.f32 1.442695, %v3153_v30 }
 0x499   : > { %v3591_v24 = vrot.slane %v3590_v41, 1  ;;  %v3524_v23 = vrot.slane %v3523_v63, 4  ;;  %2742 = vperm.xlu2 %4036, %v2731_v5   ;;  %2658 = vperm.xlu1 %4029, %v2653_v32   ;;  %v2744_v32 = vperm.slane %v5403_v51, 3 }
 0x49a   : > { %4288 = vpow2.f32 %v3196_v26 }
 0x49b   : > { %v3592_v27 = vadd.f32 %v3591_v24, %v3590_v41  ;;  %v3525_v58 = vadd.f32 %v3524_v23, %v3523_v63  ;;  %v3593_v24 = vsel %vm921_vm9, %v3477_v8, 0.0 }
 0x49d   : > { %v3672_v28 = vmul.f32 %v3640_v37, %v3592_v27  ;;  %v3526_v62 = vrot.slane %v3525_v58, 2  ;;  %v4285_v37 = vpop.eup %4284 }
 0x49e   : > { %v4287_v55 = vpop.eup %4286 }
 0x49f   : > { %v3711_v11 = vrot.slane %v3672_v28, 5  ;;  %v3527_v3 = vadd.f32 %v3526_v62, %v3525_v58  ;;  %v3194_v58 = vmul.f32 1.442695, %v3152_v40  ;;  %v3763_v62 = vrot.slane %v4501_v16, 4 }
 0x4a0   : > { %v2770_v16 = vperm.slane %v5403_v51, 5  ;;  %v3168_v40 = vmul.f32 %v5612_v19, %v3123_v44 }
 0x4a1   : > { %v5766_v56 = vsel %vm1760_vm15, %v3711_v11, %v5696_v46  ;;  %v3528_v12 = vrot.slane %v3527_v3, 1  ;;  %2755 = vperm.xlu2 %4036, %v2744_v32   ;;  %2671 = vperm.xlu1 %4029, %v2666_v35   ;;  %v2652_v35 = vpop.permute.xlu0 %2651  ;;  %4290 = vpow2.f32 %v3194_v58  ;;  %v5791_v8 = vsel %vm3751_vm2, %v4516_v22, %v3763_v62 }
 0x4a2   : > { %v2816_v31 = vmul.f32 %v4285_v37, %v2652_v35  ;;  %v3226_v58 = vmul.f32 1.442695, %v3168_v40  ;;  %v5805_v62 = vmul.f32 %v4922_v25, %v4832_v13 }
 0x4a3   : > { %v3529_v1 = vadd.f32 %v3528_v12, %v3527_v3  ;;  %v5774_v41 = vpop.permute.xlu2 %2632  ;;  %v3413_v63 = vpop.permute.xlu1 %3412 }
 0x4a4   : > { %v3478_v46 = vmul.f32 %v4283_v53, %v3413_v63  ;;  %v2869_v12 = vsel %vm921_vm9, %v2816_v31, 0.0  ;;  %v2783_v31 = vperm.slane %v5403_v51, 6 }
 0x4a5   : > { %v3665_v59 = vmul.f32 %v3634_v50, %v3529_v1  ;;  %v4289_v1 = vpop.eup %4288 }
 0x4a6   : > { %v3594_v23 = vsel %vm921_vm9, %v3478_v46, 0.0  ;;  %v3464_v22 = vmul.f32 %v4289_v1, %v5705_v49  ;;  %v2989_v1 = vrot.slane %v5805_v62, 3 }
 0x4a7   : > { %v3699_v27 = vrot.slane %v3665_v59, 4  ;;  %v3595_v15 = vadd.f32 %v3594_v23, %v3593_v24  ;;  %v4291_v46 = vpop.eup %4290  ;;  %v3943_v24 = vmul.f32 -1.442695, %v5791_v8  ;;  %v3641_v23 = vrot.slane %v5568_v0, 4 }
 0x4a9   : > { %v5782_v28 = vsel %vm1763_vm0, %v3699_v27, %v5736_v33  ;;  %v3596_v39 = vrot.slane %v3595_v15, 4  ;;  %4039 = vset.pattern.permute.xlu2 %v4908_v45  ;;  %4032 = vset.pattern.permute.xlu1 %v4906_v42  ;;  %4292 = vpow2.f32 %v3943_v24 }
 0x4aa   : > { %4294 = vpow2.f32 %v3226_v58 }
 0x4ab   : > { %v3597_v11 = vadd.f32 %v3596_v39, %v3595_v15  ;;  %v2646_v3 = vpop.permute.xlu2 %2645  ;;  %v3169_v15 = vmul.f32 %v5599_v10, %v3123_v44  ;;  %v3101_v44 = vrot.slane %v5490_v34, 6 }
 0x4ac   : > { %v2815_v53 = vmul.f32 %v4287_v55, %v2646_v3 }
 0x4ad   : > { %v3598_v30 = vrot.slane %v3597_v11, 2  ;;  %v3116_v40 = vperm.slane %v3101_v44, 0 }
 0x4ae   : > { %v2868_v33 = vsel %vm921_vm9, %v2815_v53, 0.0 }
 0x4af   : > { %v3599_v50 = vadd.f32 %v3598_v30, %v3597_v11  ;;  %v2870_v63 = vadd.f32 %v2869_v12, %v2868_v33  ;;  %v3228_v30 = vmul.f32 1.442695, %v3169_v15  ;;  %v4293_v25 = vpop.eup %4292  ;;  %v3154_v58 = vmul.f32 %v5612_v19, %v3116_v40 }
 0x4b0   : > { %v5824_v43 = vadd.f32 1.0, %v4293_v25 }
 0x4b1   : > { %v3600_v26 = vrot.slane %v3599_v50, 1  ;;  %v2871_v59 = vrot.slane %v2870_v63, 4  ;;  %2775 = vperm.xlu2 %4039, %v2770_v16   ;;  %2690 = vperm.xlu1 %4032, %v2679_v14   ;;  %v3531_v14 = vsel %vm921_vm9, %v3464_v22, 0.0  ;;  %4296 = vpow2.f32 %v3228_v30 }
 0x4b2   : > { %v3155_v22 = vmul.f32 %v5599_v10, %v3116_v40  ;;  %4298 = vrcp.f32 %v5824_v43  ;;  %v3198_v30 = vmul.f32 1.442695, %v3154_v58  ;;  %vm3777_vm8 = vweird.f32 %v5824_v43 }
 0x4b3   : > { %v3601_v37 = vadd.f32 %v3600_v26, %v3599_v50  ;;  %v2872_v35 = vadd.f32 %v2871_v59, %v2870_v63  ;;  %v3316_v27 = vpop.permute.xlu1 %3315  ;;  %v4295_v59 = vpop.eup %4294 }
 0x4b4   : > { %v3463_v17 = vmul.f32 %v4291_v46, %v3316_v27  ;;  %v3635_v27 = vrot.slane %v5637_v48, 5 }
 0x4b5   : > { %v3673_v55 = vmul.f32 %v3641_v23, %v3601_v37  ;;  %v2873_v39 = vrot.slane %v2872_v35, 2  ;;  %v3108_v23 = vrot.slane %v5509_v38, 6 }
 0x4b6   : > { %v3530_v49 = vsel %vm921_vm9, %v3463_v17, 0.0 }
 0x4b7   : > { %v3713_v11 = vrot.slane %v3673_v55, 4  ;;  %v2874_v3 = vadd.f32 %v2873_v39, %v2872_v35  ;;  %v3532_v53 = vadd.f32 %v3531_v14, %v3530_v49  ;;  %v3200_v55 = vmul.f32 1.442695, %v3155_v22 }
 0x4b8   : > { %v3124_v39 = vperm.slane %v3108_v23, 0 }
 0x4b9   : > { %v5813_v12 = vsel %vm1763_vm0, %v3713_v11, %v5766_v56  ;;  %v2875_v33 = vrot.slane %v2874_v3, 1  ;;  %v3533_v13 = vrot.slane %v3532_v53, 4  ;;  %2788 = vperm.xlu2 %4039, %v2783_v31   ;;  %2703 = vperm.xlu1 %4032, %v2692_v47   ;;  %v4297_v56 = vpop.eup %4296  ;;  %v3479_v47 = vmul.f32 %v4295_v59, %v5745_v61 }
 0x4ba   : > { %4300 = vpow2.f32 %v3200_v55  ;;  %v3171_v61 = vmul.f32 %v5599_v10, %v3124_v39 }
 0x4bb   : > { %v2876_v50 = vadd.f32 %v2875_v33, %v2874_v3  ;;  %v3534_v63 = vadd.f32 %v3533_v13, %v3532_v53  ;;  %v3602_v49 = vsel %vm921_vm9, %v3479_v47, 0.0  ;;  %v5839_v13 = vpop.eup %4298  ;;  %4302 = vpow2.f32 %v3198_v30 }
 0x4bc   : > { %vm3778_vm5 = vweird.f32 %v5839_v13 }
 0x4bd   : > { %v5818_v46 = vmul.f32 %v2989_v1, %v2876_v50  ;;  %v3535_v26 = vrot.slane %v3534_v63, 2  ;;  %v3170_v1 = vmul.f32 %v5612_v19, %v3124_v39  ;;  %v3232_v50 = vmul.f32 1.442695, %v3171_v61  ;;  %vm5872_vm10 = vmor %vm3777_vm8, %vm3778_vm5 }
 0x4bf   : > { %v3536_v24 = vadd.f32 %v3535_v26, %v3534_v63  ;;  %v2466_v63 = vperm.slane %v5451_v29, 0  ;;  %v3773_v26 = vmul.f32 %v5839_v13, %v5824_v43  ;;  %4304 = vpow2.f32 %v3232_v50 }
 0x4c1   : > { %v3537_v37 = vrot.slane %v3536_v24, 1  ;;  %4040 = vset.pattern.permute.xlu2 %v4906_v42  ;;  %4035 = vset.pattern.permute.xlu1 %v4908_v45  ;;  %v3774_v23 = vsub.f32 1.0, %v3773_v26 }
 0x4c3   : > { %v3538_v35 = vadd.f32 %v3537_v37, %v3536_v24  ;;  %v3426_v15 = vpop.permute.xlu1 %3425  ;;  %v3230_v24 = vmul.f32 1.442695, %v3170_v1  ;;  %v3642_v37 = vrot.slane %v5568_v0, 5 }
 0x4c4   : > { %v3480_v17 = vmul.f32 %v4297_v56, %v3426_v15 }
 0x4c5   : > { %v3666_v14 = vmul.f32 %v3635_v27, %v3538_v35  ;;  %4306 = vpow2.f32 %v3230_v24  ;;  %v2498_v27 = vmul.f32 %v5612_v19, %v2466_v63 }
 0x4c6   : > { %v3603_v11 = vsel %vm921_vm9, %v3480_v17, 0.0 }
 0x4c7   : > { %v3701_v3 = vrot.slane %v3666_v14, 3  ;;  %v3604_v53 = vadd.f32 %v3603_v11, %v3602_v49  ;;  %v2530_v49 = vmul.f32 1.442695, %v2498_v27  ;;  %v2452_v11 = vrot.slane %v5451_v29, 1 }
 0x4c9   : > { %v5835_v44 = vsel %vm1766_vm1, %v3701_v3, %v5782_v28  ;;  %v3605_v33 = vrot.slane %v3604_v53, 4  ;;  %2794 = vperm.xlu2 %4040, %v2783_v31   ;;  %2723 = vperm.xlu1 %4035, %v2718_v9   ;;  %v4301_v28 = vpop.eup %4300  ;;  %v2499_v9 = vmul.f32 %v5599_v10, %v2466_v63  ;;  %v2467_v50 = vperm.slane %v2452_v11, 0 }
 0x4ca   : > { %v4303_v31 = vpop.eup %4302  ;;  %v3466_v22 = vmul.f32 %v4301_v28, %v5719_v54  ;;  %v3775_v54 = vmul.f32 %v5839_v13, %v3774_v23  ;;  %v2453_v23 = vrot.slane %v5451_v29, 2 }
 0x4cb   : > { %v3606_v25 = vadd.f32 %v3605_v33, %v3604_v53  ;;  %v2532_v58 = vmul.f32 1.442695, %v2499_v9  ;;  %v4305_v39 = vpop.eup %4304 }
 0x4cc   : > { %v3540_v55 = vsel %vm921_vm9, %v3466_v22, 0.0  ;;  %v4307_v3 = vpop.eup %4306  ;;  %v3482_v61 = vmul.f32 %v4305_v39, %v5738_v2  ;;  %v3776_v1 = vadd.f32 %v5839_v13, %v3775_v54 }
 0x4cd   : > { %v3607_v40 = vrot.slane %v3606_v25, 2  ;;  %4308 = vpow2.f32 %v2532_v58 }
 0x4ce   : > { %4310 = vpow2.f32 %v2530_v49  ;;  %v3780_v9 = vsel %vm5872_vm10, %v5839_v13, %v3776_v1  ;;  %v3636_v13 = vrot.slane %v5637_v48, 6 }
 0x4cf   : > { %v3608_v59 = vadd.f32 %v3607_v40, %v3606_v25 }
 0x4d1   : > { %v3609_v56 = vrot.slane %v3608_v59, 1  ;;  %4041 = vset.pattern.permute.xlu2 %v4908_v45  ;;  %2736 = vperm.xlu1 %4035, %v2731_v5  }
 0x4d3   : > { %v3610_v47 = vadd.f32 %v3609_v56, %v3608_v59  ;;  %v3329_v35 = vpop.permute.xlu1 %3328  ;;  %v4309_v28 = vpop.eup %4308  ;;  %v2500_v56 = vmul.f32 %v5612_v19, %v2467_v50 }
 0x4d4   : > { %v3465_v15 = vmul.f32 %v4303_v31, %v3329_v35  ;;  %v3440_v31 = vperm.slane %v5191_v4, 7  ;;  %v4311_v22 = vpop.eup %4310  ;;  %v2810_v35 = vmul.f32 %v4309_v28, %v5757_v52 }
 0x4d5   : > { %v3674_v17 = vmul.f32 %v3642_v37, %v3610_v47 }
 0x4d6   : > { %v3539_v45 = vsel %vm921_vm9, %v3465_v15, 0.0  ;;  %v2842_v54 = vsel %vm921_vm9, %v2810_v35, 0.0  ;;  %v2665_v35 = vpop.permute.xlu2 %2664 }
 0x4d7   : > { %v3715_v14 = vrot.slane %v3674_v17, 3  ;;  %v3541_v5 = vadd.f32 %v3540_v55, %v3539_v45  ;;  %v2501_v55 = vmul.f32 %v5599_v10, %v2467_v50  ;;  %v2534_v45 = vmul.f32 1.442695, %v2500_v56 }
 0x4d8   : > { %v2455_v56 = vrot.slane %v5451_v29, 4 }
 0x4d9   : > { %v5858_v53 = vsel %vm1766_vm1, %v3715_v14, %v5813_v12  ;;  %v3542_v30 = vrot.slane %v3541_v5, 4  ;;  %2801 = vperm.xlu2 %4041, %v2796_v36   ;;  %2749 = vperm.xlu1 %4035, %v2744_v32   ;;  %v3783_v12 = vand.u32 2147483648, %v5824_v43  ;;  %v3781_v36 = vand.u32 2147483647, %v5824_v43 }
 0x4da   : > { %v3612_v32 = vsel %vm921_vm9, %v3482_v61, 0.0  ;;  %v2468_v14 = vperm.slane %v2453_v23, 0  ;;  %v2536_v61 = vmul.f32 1.442695, %v2501_v55  ;;  %4312 = vpow2.f32 %v2534_v45 }
 0x4db   : > { %v3543_v33 = vadd.f32 %v3542_v30, %v3541_v5  ;;  %v3433_v25 = vpop.permute.xlu1 %3432  ;;  %v3784_v43 = vor.u32 1.1754944e-38, %v3783_v12  ;;  %vm3782_vm11 = vcmp.eq.f32.partialorder %v3781_v36, 8.507059e+37 }
 0x4dc   : > { %v3481_v63 = vmul.f32 %v4307_v3, %v3433_v25  ;;  %4314 = vpow2.f32 %v2536_v61  ;;  %v2503_v36 = vmul.f32 %v5599_v10, %v2468_v14 }
 0x4dd   : > { %v3544_v40 = vrot.slane %v3543_v33, 2  ;;  %v3785_v27 = vsel %vm3782_vm11, %v3784_v43, %v3780_v9 }
 0x4de   : > { %v3611_v2 = vsel %vm921_vm9, %v3481_v63, 0.0  ;;  %v3787_v11 = vmul.f32 %v3785_v27, %v5791_v8  ;;  %v6126_v63 = vperm.slane %v5403_v51, 4  ;;  %v3643_v8 = vrot.slane %v5568_v0, 6  ;;  %v2678_v61 = vpop.permute.xlu2 %2677 }
 0x4df   : > { %v3545_v59 = vadd.f32 %v3544_v40, %v3543_v33  ;;  %v3613_v24 = vadd.f32 %v3612_v32, %v3611_v2  ;;  %v2502_v33 = vmul.f32 %v5612_v19, %v2468_v14 }
 0x4e0   : > { %v4313_v28 = vpop.eup %4312 }
 0x4e1   : > { %v3546_v37 = vrot.slane %v3545_v59, 1  ;;  %v3614_v47 = vrot.slane %v3613_v24, 4  ;;  %3445 = vperm.xlu2 %4041, %v3440_v31   ;;  %4038 = vset.pattern.permute.xlu1 %v4906_v42  ;;  %v2538_v32 = vmul.f32 1.442695, %v2502_v33  ;;  %v2811_v23 = vmul.f32 %v4313_v28, %v5760_v18 }
 0x4e2   : > { %v4315_v9 = vpop.eup %4314 }
 0x4e3   : > { %v3547_v15 = vadd.f32 %v3546_v37, %v3545_v59  ;;  %v3615_v58 = vadd.f32 %v3614_v47, %v3613_v24  ;;  %v2607_v17 = vpop.permute.xlu1 %2606  ;;  %v2540_v24 = vmul.f32 1.442695, %v2503_v36  ;;  %4316 = vpow2.f32 %v2538_v32  ;;  %v5931_v36 = vld [vmem:[%s6101_s6] sm:$0xff] }
 0x4e4   : > { %v2809_v39 = vmul.f32 %v4311_v22, %v2607_v17 }
 0x4e5   : > { %v3667_v5 = vmul.f32 %v3636_v13, %v3547_v15  ;;  %v3616_v49 = vrot.slane %v3615_v58, 2  ;;  %4318 = vpow2.f32 %v2540_v24  ;;  %v2470_v15 = vperm.slane %v2455_v56, 0 }
 0x4e6   : > { %v2841_v42 = vsel %vm921_vm9, %v2809_v39, 0.0  ;;  %v6127_v39 = vperm.slane %v5160_v6, 7  ;;  %v5922_v6 = vld [vmem:[%s6101_s6 + $0x8] sm:$0xff]  ;;  %v2457_v56 = vrot.slane %v5451_v29, 6 }
 0x4e7   : > { %v3703_v52 = vrot.slane %v3667_v5, 2  ;;  %v3617_v3 = vadd.f32 %v3616_v49, %v3615_v58  ;;  %v2843_v30 = vadd.f32 %v2842_v54, %v2841_v42  ;;  %v2850_v58 = vsel %vm921_vm9, %v2811_v23, 0.0 }
 0x4e8   : > { %v2507_v51 = vmul.f32 %v5599_v10, %v2470_v15  ;;  %v2506_v54 = vmul.f32 %v5612_v19, %v2470_v15 }
 0x4e9   : > { %v5894_v25 = vsel %vm1769_vm6, %v3703_v52, %v5835_v44  ;;  %v3618_v1 = vrot.slane %v3617_v3, 1  ;;  %v2844_v50 = vrot.slane %v2843_v30, 4  ;;  %3789 = vrot.lane.b32.xlu2 %v3787_v11, %s4394_s30  ;;  %2768 = vperm.xlu1 %4038, %v6126_v63  }
 0x4ea   : > { %v2548_v11 = vmul.f32 1.442695, %v2507_v51 }
 0x4eb   : > { %v3619_v12 = vadd.f32 %v3618_v1, %v3617_v3  ;;  %v2845_v40 = vadd.f32 %v2844_v50, %v2843_v30  ;;  %v2546_v50 = vmul.f32 1.442695, %v2506_v54 }
 0x4ec   : > { %4320 = vpow2.f32 %v2548_v11 }
 0x4ed   : > { %v3675_v2 = vmul.f32 %v3643_v8, %v3619_v12  ;;  %v2846_v26 = vrot.slane %v2845_v40, 2  ;;  %v2987_v8 = vrot.slane %v5805_v62, 1  ;;  %4322 = vpow2.f32 %v2546_v50 }
 0x4ef   : > { %v3717_v44 = vrot.slane %v3675_v2, 2  ;;  %v2847_v59 = vadd.f32 %v2846_v26, %v2845_v40 }
 0x4f1   : > { %v5903_v43 = vsel %vm1769_vm6, %v3717_v44, %v5858_v53  ;;  %v2848_v22 = vrot.slane %v2847_v59, 1  ;;  %2781 = vperm.xlu1 %4038, %v2770_v16   ;;  %v4317_v53 = vpop.eup %4316  ;;  %v2456_v16 = vrot.slane %v5451_v29, 5  ;;  %v5934_v44 = vpop.permute.xlu2 %2697 }
 0x4f2   : > { %v4319_v45 = vpop.eup %4318  ;;  %v2813_v14 = vmul.f32 %v4317_v53, %v5774_v41 }
 0x4f3   : > { %v2849_v37 = vadd.f32 %v2848_v22, %v2847_v59  ;;  %v2626_v47 = vpop.permute.xlu1 %2625  ;;  %v2471_v52 = vperm.slane %v2456_v16, 0  ;;  %v4321_v59 = vpop.eup %4320 }
 0x4f4   : > { %v2812_v27 = vmul.f32 %v4315_v9, %v2626_v47  ;;  %v2859_v30 = vsel %vm921_vm9, %v2813_v14, 0.0  ;;  %v4323_v9 = vpop.eup %4322  ;;  %v2988_v47 = vrot.slane %v5805_v62, 2 }
 0x4f5   : > { %v3017_v13 = vmul.f32 %v2849_v37, %v5805_v62  ;;  %v2509_v19 = vmul.f32 %v5922_v6, %v2471_v52  ;;  %v2508_v32 = vmul.f32 %v5931_v36, %v2471_v52  ;;  %v2818_v37 = vmul.f32 %v4321_v59, %v2665_v35 }
 0x4f6   : > { %v2851_v17 = vsel %vm921_vm9, %v2812_v27, 0.0 }
 0x4f7   : > { %v2852_v55 = vadd.f32 %v2851_v17, %v2850_v58  ;;  %v2552_v2 = vmul.f32 1.442695, %v2509_v19  ;;  %v2550_v24 = vmul.f32 1.442695, %v2508_v32  ;;  %v2472_v17 = vperm.slane %v2457_v56, 0 }
 0x4f8   : > { %v2990_v32 = vrot.slane %v5805_v62, 4 }
 0x4f9   : > { %v2853_v18 = vrot.slane %v2852_v55, 4  ;;  %3347 = vperm.xlu1 %4038, %v6127_v39   ;;  %4324 = vpow2.f32 %v2552_v2  ;;  %v3053_v39 = vrot.slane %v5818_v46, 5  ;;  %v2510_v14 = vmul.f32 %v5931_v36, %v2472_v17 }
 0x4fa   : > { %4326 = vpow2.f32 %v2550_v24 }
 0x4fb   : > { %v2854_v5 = vadd.f32 %v2853_v18, %v2852_v55  ;;  %v2639_v49 = vpop.permute.xlu1 %2638  ;;  %v2878_v55 = vsel %vm921_vm9, %v2818_v37, 0.0 }
 0x4fc   : > { %v2814_v42 = vmul.f32 %v4319_v45, %v2639_v49 }
 0x4fd   : > { %v2855_v3 = vrot.slane %v2854_v5, 2 }
 0x4fe   : > { %v2860_v10 = vsel %vm921_vm9, %v2814_v42, 0.0 }
 0x4ff   : > { %v2856_v33 = vadd.f32 %v2855_v3, %v2854_v5  ;;  %v2861_v1 = vadd.f32 %v2860_v10, %v2859_v30  ;;  %v4325_v51 = vpop.eup %4324  ;;  %v2458_v5 = vrot.slane %v5451_v29, 7  ;;  %v2511_v30 = vmul.f32 %v5922_v6, %v2472_v17 }
 0x500   : > { %v4327_v35 = vpop.eup %4326  ;;  %v2820_v42 = vmul.f32 %v4325_v51, %v2678_v61  ;;  %v2991_v17 = vrot.slane %v5805_v62, 5 }
 0x501   : > { %v2857_v41 = vrot.slane %v2856_v33, 1  ;;  %v2862_v63 = vrot.slane %v2861_v1, 4  ;;  %3451 = vperm.xlu1 %4038, %v3440_v31   ;;  %v2473_v46 = vperm.slane %v2458_v5, 0 }
 0x502   : > { %v2887_v50 = vsel %vm921_vm9, %v2820_v42, 0.0 }
 0x503   : > { %v2858_v12 = vadd.f32 %v2857_v41, %v2856_v33  ;;  %v2863_v40 = vadd.f32 %v2862_v63, %v2861_v1  ;;  %v2554_v33 = vmul.f32 1.442695, %v2510_v14  ;;  %v2556_v63 = vmul.f32 1.442695, %v2511_v30 }
 0x504   : > { %v2512_v61 = vmul.f32 %v5931_v36, %v2473_v46 }
 0x505   : > { %v3018_v26 = vmul.f32 %v2987_v8, %v2858_v12  ;;  %v2864_v28 = vrot.slane %v2863_v40, 2  ;;  %4328 = vpow2.f32 %v2554_v33 }
 0x506   : > { %4330 = vpow2.f32 %v2556_v63  ;;  %v2558_v59 = vmul.f32 1.442695, %v2512_v61  ;;  %v2474_v63 = vperm.slane %v5476_v7, 0 }
 0x507   : > { %v3049_v4 = vrot.slane %v3018_v26, 7  ;;  %v2865_v31 = vadd.f32 %v2864_v28, %v2863_v40  ;;  %v2513_v28 = vmul.f32 %v5922_v6, %v2473_v46 }
 0x508   : > { %4332 = vpow2.f32 %v2558_v59 }
 0x509   : > { %v3050_v22 = vsel %vm1754_vm14, %v3049_v4, %v3017_v13  ;;  %v2866_v23 = vrot.slane %v2865_v31, 1  ;;  %v5942_v13 = vpop.permute.xlu2 %2710 }
 0x50b   : > { %v2867_v27 = vadd.f32 %v2866_v23, %v2865_v31  ;;  %v2659_v15 = vpop.permute.xlu1 %2658  ;;  %v4329_v24 = vpop.eup %4328  ;;  %v2560_v23 = vmul.f32 1.442695, %v2513_v28 }
 0x50c   : > { %v2817_v58 = vmul.f32 %v4323_v9, %v2659_v15  ;;  %v2685_v9 = vpop.permute.xlu0 %2684  ;;  %v4331_v37 = vpop.eup %4330 }
 0x50d   : > { %v3019_v53 = vmul.f32 %v2988_v47, %v2867_v27  ;;  %v2821_v15 = vmul.f32 %v4329_v24, %v2685_v9  ;;  %4334 = vpow2.f32 %v2560_v23  ;;  %v2465_v9 = vrot.slane %v5476_v7, 7 }
 0x50e   : > { %v2877_v45 = vsel %vm921_vm9, %v2817_v58, 0.0 }
 0x50f   : > { %v3051_v16 = vrot.slane %v3019_v53, 6  ;;  %v2879_v18 = vadd.f32 %v2878_v55, %v2877_v45 }
 0x511   : > { %v3052_v49 = vsel %vm1757_vm4, %v3051_v16, %v3050_v22  ;;  %v2880_v54 = vrot.slane %v2879_v18, 4  ;;  %v5951_v8 = vpop.permute.xlu2 %2729  ;;  %v2895_v16 = vsel %vm921_vm9, %v2821_v15, 0.0 }
 0x512   : > { %v3054_v11 = vsel %vm1760_vm15, %v3053_v39, %v3052_v49  ;;  %v4333_v39 = vpop.eup %4332 }
 0x513   : > { %v2881_v52 = vadd.f32 %v2880_v54, %v2879_v18  ;;  %v2672_v3 = vpop.permute.xlu1 %2671  ;;  %v4335_v5 = vpop.eup %4334  ;;  %v2823_v42 = vmul.f32 %v4333_v39, %v5934_v44  ;;  %v2992_v44 = vrot.slane %v5805_v62, 6 }
 0x514   : > { %v2819_v10 = vmul.f32 %v4327_v35, %v2672_v3 }
 0x515   : > { %v2882_v1 = vrot.slane %v2881_v52, 2  ;;  %v2904_v33 = vsel %vm921_vm9, %v2823_v42, 0.0  ;;  %v2514_v42 = vmul.f32 %v5931_v36, %v2474_v63 }
 0x516   : > { %v2886_v19 = vsel %vm921_vm9, %v2819_v10, 0.0 }
 0x517   : > { %v2883_v41 = vadd.f32 %v2882_v1, %v2881_v52  ;;  %v2888_v29 = vadd.f32 %v2887_v50, %v2886_v19  ;;  %v2459_v19 = vrot.slane %v5476_v7, 1 }
 0x519   : > { %v2884_v12 = vrot.slane %v2883_v41, 1  ;;  %v2889_v40 = vrot.slane %v2888_v29, 4  ;;  %v5957_v58 = vpop.permute.xlu2 %2742 }
 0x51b   : > { %v2885_v2 = vadd.f32 %v2884_v12, %v2883_v41  ;;  %v2890_v26 = vadd.f32 %v2889_v40, %v2888_v29  ;;  %v2475_v40 = vperm.slane %v2459_v19, 0 }
 0x51d   : > { %v3021_v4 = vmul.f32 %v2990_v32, %v2885_v2  ;;  %v2891_v31 = vrot.slane %v2890_v26, 2  ;;  %v2460_v32 = vrot.slane %v5476_v7, 2  ;;  %v2461_v2 = vrot.slane %v5476_v7, 3 }
 0x51e   : > { %v2516_v15 = vmul.f32 %v5931_v36, %v2475_v40 }
 0x51f   : > { %v3055_v56 = vrot.slane %v3021_v4, 4  ;;  %v2892_v22 = vadd.f32 %v2891_v31, %v2890_v26  ;;  %v2515_v4 = vmul.f32 %v5922_v6, %v2474_v63  ;;  %v2477_v23 = vperm.slane %v2461_v2, 0 }
 0x520   : > { %v2562_v63 = vmul.f32 1.442695, %v2514_v42 }
 0x521   : > { %v3056_v47 = vsel %vm1763_vm0, %v3055_v56, %v3054_v11  ;;  %v2893_v27 = vrot.slane %v2892_v22, 1  ;;  %v5964_v3 = vpop.permute.xlu2 %2755  ;;  %v2517_v56 = vmul.f32 %v5922_v6, %v2475_v40 }
 0x523   : > { %v2894_v53 = vadd.f32 %v2893_v27, %v2892_v22  ;;  %v2691_v55 = vpop.permute.xlu1 %2690  ;;  %v2476_v22 = vperm.slane %v2460_v32, 0  ;;  %v2568_v39 = vmul.f32 1.442695, %v2517_v56 }
 0x524   : > { %v2822_v45 = vmul.f32 %v4331_v37, %v2691_v55  ;;  %v2464_v37 = vrot.slane %v5476_v7, 6  ;;  %v2993_v55 = vrot.slane %v5805_v62, 7  ;;  %v2462_v62 = vrot.slane %v5476_v7, 4 }
 0x525   : > { %v3022_v51 = vmul.f32 %v2991_v17, %v2894_v53  ;;  %v2564_v17 = vmul.f32 1.442695, %v2515_v4  ;;  %v2518_v53 = vmul.f32 %v5931_v36, %v2476_v22 }
 0x526   : > { %v2896_v18 = vsel %vm921_vm9, %v2822_v45, 0.0 }
 0x527   : > { %v3057_v35 = vrot.slane %v3022_v51, 3  ;;  %v2897_v14 = vadd.f32 %v2896_v18, %v2895_v16  ;;  %v2520_v16 = vmul.f32 %v5931_v36, %v2477_v23  ;;  %v2481_v18 = vperm.slane %v2465_v9, 0 }
 0x528   : > { %4336 = vpow2.f32 %v2564_v17 }
 0x529   : > { %v3058_v49 = vsel %vm1766_vm1, %v3057_v35, %v3056_v47  ;;  %v2898_v54 = vrot.slane %v2897_v14, 4  ;;  %v5973_v26 = vpop.permute.xlu2 %2775  ;;  %v2519_v35 = vmul.f32 %v5922_v6, %v2476_v22  ;;  %4338 = vpow2.f32 %v2568_v39 }
 0x52a   : > { %v2529_v19 = vmul.f32 %v5922_v6, %v2481_v18 }
 0x52b   : > { %v2899_v11 = vadd.f32 %v2898_v54, %v2897_v14  ;;  %v2704_v52 = vpop.permute.xlu1 %2703  ;;  %v2521_v14 = vmul.f32 %v5922_v6, %v2477_v23  ;;  %v2566_v54 = vmul.f32 1.442695, %v2516_v15  ;;  %v2463_v23 = vrot.slane %v5476_v7, 5 }
 0x52c   : > { %v2824_v30 = vmul.f32 %v4335_v5, %v2704_v52  ;;  %v2480_v5 = vperm.slane %v2464_v37, 0  ;;  %v2570_v52 = vmul.f32 1.442695, %v2518_v53 }
 0x52d   : > { %v2900_v10 = vrot.slane %v2899_v11, 2  ;;  %4340 = vpow2.f32 %v2566_v54  ;;  %v2479_v39 = vperm.slane %v2463_v23, 0 }
 0x52e   : > { %v2905_v46 = vsel %vm921_vm9, %v2824_v30, 0.0  ;;  %v2527_v30 = vmul.f32 %v5922_v6, %v2480_v5  ;;  %4342 = vpow2.f32 %v2570_v52  ;;  %v4337_v32 = vpop.eup %4336  ;;  %v3102_v52 = vrot.slane %v5490_v34, 7 }
 0x52f   : > { %v2901_v1 = vadd.f32 %v2900_v10, %v2899_v11  ;;  %v2906_v50 = vadd.f32 %v2905_v46, %v2904_v33  ;;  %v2574_v33 = vmul.f32 1.442695, %v2520_v16  ;;  %v5991_v46 = vpop.permute.xlu0 %2716 }
 0x530   : > { %v2826_v34 = vmul.f32 %v4337_v32, %v5991_v46  ;;  %v2525_v46 = vmul.f32 %v5922_v6, %v2479_v39 }
 0x531   : > { %v2902_v41 = vrot.slane %v2901_v1, 1  ;;  %v2907_v29 = vrot.slane %v2906_v50, 4  ;;  %v5987_v11 = vpop.permute.xlu2 %2788  ;;  %4344 = vpow2.f32 %v2574_v33 }
 0x532   : > { %v2914_v32 = vsel %vm921_vm9, %v2826_v34, 0.0 }
 0x533   : > { %v2903_v61 = vadd.f32 %v2902_v41, %v2901_v1  ;;  %v2908_v12 = vadd.f32 %v2907_v29, %v2906_v50  ;;  %v2572_v1 = vmul.f32 1.442695, %v2519_v35  ;;  %v2528_v50 = vmul.f32 %v5931_v36, %v2481_v18 }
 0x534   : > { %v2576_v41 = vmul.f32 1.442695, %v2521_v14 }
 0x535   : > { %v3023_v28 = vmul.f32 %v2992_v44, %v2903_v61  ;;  %v2909_v59 = vrot.slane %v2908_v12, 2  ;;  %v2526_v44 = vmul.f32 %v5931_v36, %v2480_v5  ;;  %v2478_v61 = vperm.slane %v2462_v62, 0 }
 0x536   : > { %4346 = vpow2.f32 %v2572_v1  ;;  %v2590_v2 = vmul.f32 1.442695, %v2528_v50 }
 0x537   : > { %v3059_v31 = vrot.slane %v3023_v28, 2  ;;  %v2910_v24 = vadd.f32 %v2909_v59, %v2908_v12  ;;  %v2588_v12 = vmul.f32 1.442695, %v2527_v30  ;;  %v2592_v28 = vmul.f32 1.442695, %v2529_v19  ;;  %v4339_v59 = vpop.eup %4338  ;;  %v6000_v22 = vpop.permute.xlu0 %2762 }
 0x538   : > { %4348 = vpow2.f32 %v2576_v41  ;;  %v2586_v4 = vmul.f32 1.442695, %v2526_v44  ;;  %v2522_v9 = vmul.f32 %v5931_v36, %v2478_v61  ;;  %v2828_v18 = vmul.f32 %v4339_v59, %v5951_v8 }
 0x539   : > { %v3060_v47 = vsel %vm1769_vm6, %v3059_v31, %v3058_v49  ;;  %v2911_v27 = vrot.slane %v2910_v24, 1  ;;  %4350 = vpow2.f32 %v2562_v63  ;;  %v2795_v31 = vpop.permute.xlu2 %2794 }
 0x53a   : > { %4352 = vpow2.f32 %v2588_v12  ;;  %v2578_v17 = vmul.f32 1.442695, %v2522_v9  ;;  %v2923_v1 = vsel %vm921_vm9, %v2828_v18, 0.0 }
 0x53b   : > { %v2912_v45 = vadd.f32 %v2911_v27, %v2910_v24  ;;  %v2724_v51 = vpop.permute.xlu1 %2723  ;;  %v4341_v24 = vpop.eup %4340  ;;  %4354 = vpow2.f32 %v2590_v2  ;;  %v3117_v2 = vperm.slane %v3102_v52, 0 }
 0x53c   : > { %v4343_v56 = vpop.eup %4342  ;;  %4356 = vpow2.f32 %v2592_v28  ;;  %v2827_v27 = vmul.f32 %v4341_v24, %v2724_v51 }
 0x53d   : > { %v3024_v49 = vmul.f32 %v2993_v55, %v2912_v45  ;;  %v4345_v37 = vpop.eup %4344  ;;  %4358 = vpow2.f32 %v2586_v4  ;;  %v2523_v45 = vmul.f32 %v5922_v6, %v2478_v61 }
 0x53e   : > { %v2922_v51 = vsel %vm921_vm9, %v2827_v27, 0.0  ;;  %4360 = vpow2.f32 %v2578_v17  ;;  %v3109_v17 = vrot.slane %v5509_v38, 7  ;;  %v3157_v38 = vmul.f32 %v5922_v6, %v3117_v2 }
 0x53f   : > { %v3061_v10 = vrot.slane %v3024_v49, 1  ;;  %v2580_v30 = vmul.f32 1.442695, %v2523_v45  ;;  %v2808_v8 = vpop.permute.xlu0 %2807  ;;  %v2924_v63 = vadd.f32 %v2923_v1, %v2922_v51 }
 0x540   : > { %v3204_v34 = vmul.f32 1.442695, %v3157_v38 }
 0x541   : > { %v5996_v29 = vsel %vm1772_vm7, %v3061_v10, %v3060_v47  ;;  %v4347_v47 = vpop.eup %4346  ;;  %v2802_v54 = vpop.permute.xlu2 %2801  ;;  %4362 = vpow2.f32 %v2580_v30  ;;  %v2925_v9 = vrot.slane %v2924_v63, 4 }
 0x542   : > { %v4349_v15 = vpop.eup %4348  ;;  %v2830_v7 = vmul.f32 %v4347_v47, %v5957_v58  ;;  %v2524_v58 = vmul.f32 %v5931_v36, %v2479_v39 }
 0x543   : > { %v2737_v40 = vpop.permute.xlu1 %2736  ;;  %v4351_v16 = vpop.eup %4350  ;;  %v2832_v49 = vmul.f32 %v4349_v15, %v5964_v3  ;;  %v2926_v45 = vadd.f32 %v2925_v9, %v2924_v63  ;;  %v3795_v63 = vld [vmem:[%s6103_s8 + $0x10] sm:$0xff] }
 0x544   : > { %v2829_v53 = vmul.f32 %v4343_v56, %v2737_v40  ;;  %v4353_v14 = vpop.eup %4352  ;;  %v2825_v33 = vmul.f32 %v4351_v16, %v5942_v13  ;;  %v2932_v50 = vsel %vm921_vm9, %v2830_v7, 0.0  ;;  %v2582_v59 = vmul.f32 1.442695, %v2524_v58  ;;  %3816 = vmatpush.msra.mxu0 %v3795_v63 }
 0x545   : > { %v4355_v5 = vpop.eup %4354  ;;  %v2838_v19 = vmul.f32 %v4353_v14, %v2795_v31  ;;  %v2941_v44 = vsel %vm921_vm9, %v2832_v49, 0.0  ;;  %v2584_v16 = vmul.f32 1.442695, %v2525_v46  ;;  %v2927_v52 = vrot.slane %v2926_v45, 2 }
 0x546   : > { %v4357_v42 = vpop.eup %4356  ;;  %v2931_v62 = vsel %vm921_vm9, %v2829_v53, 0.0  ;;  %v2839_v41 = vmul.f32 %v4355_v5, %v2802_v54  ;;  %v2913_v28 = vsel %vm921_vm9, %v2825_v33, 0.0  ;;  %4364 = vpow2.f32 %v2582_v59 }
 0x547   : > { %v4359_v10 = vpop.eup %4358  ;;  %v2933_v61 = vadd.f32 %v2932_v50, %v2931_v62  ;;  %v2840_v12 = vmul.f32 %v4357_v42, %v2808_v8  ;;  %v2968_v24 = vsel %vm921_vm9, %v2838_v19, 0.0  ;;  %v3125_v54 = vperm.slane %v3109_v17, 0 }
 0x548   : > { %v2837_v40 = vmul.f32 %v4359_v10, %v5987_v11  ;;  %v4361_v4 = vpop.eup %4360  ;;  %v2976_v31 = vsel %vm921_vm9, %v2839_v41, 0.0  ;;  %v2915_v11 = vadd.f32 %v2914_v32, %v2913_v28  ;;  %4366 = vpow2.f32 %v2584_v16 }
 0x549   : > { %v2934_v56 = vrot.slane %v2933_v61, 4  ;;  %v2977_v23 = vsel %vm921_vm9, %v2840_v12, 0.0  ;;  %v4363_v53 = vpop.eup %4362  ;;  %v2833_v18 = vmul.f32 %v4361_v4, %v6000_v22  ;;  %v3172_v50 = vmul.f32 %v5931_v36, %v3125_v54 }
 0x54a   : > { %v2978_v15 = vadd.f32 %v2977_v23, %v2976_v31  ;;  %v2928_v19 = vadd.f32 %v2927_v52, %v2926_v45  ;;  %v3173_v46 = vmul.f32 %v5922_v6, %v3125_v54  ;;  %v6039_v32 = vmul.f32 %v4918_v20, %v4835_v21 }
 0x54b   : > { %v2750_v55 = vpop.permute.xlu1 %2749  ;;  %v2935_v39 = vadd.f32 %v2934_v56, %v2933_v61  ;;  %v2949_v62 = vsel %vm921_vm9, %v2833_v18, 0.0 }
 0x54c   : > { %v2831_v35 = vmul.f32 %v4345_v37, %v2750_v55  ;;  %v2967_v37 = vsel %vm921_vm9, %v2837_v40, 0.0  ;;  %v3156_v55 = vmul.f32 %v5931_v36, %v3117_v2  ;;  %v2979_v49 = vrot.slane %v2978_v15, 4  ;;  %v4365_v8 = vpop.eup %4364 }
 0x54d   : > { %v2969_v27 = vadd.f32 %v2968_v24, %v2967_v37  ;;  %v2936_v30 = vrot.slane %v2935_v39, 2  ;;  %v3234_v36 = vmul.f32 1.442695, %v3172_v50  ;;  %v2929_v31 = vrot.slane %v2928_v19, 1  ;;  %v3342_v37 = vpop.permute.xlu0 %3341  ;;  %v3446_v50 = vpop.permute.xlu2 %3445 }
 0x54e   : > { %v2940_v3 = vsel %vm921_vm9, %v2831_v35, 0.0  ;;  %v2916_v35 = vrot.slane %v2915_v11, 4  ;;  %v3202_v42 = vmul.f32 1.442695, %v3156_v55  ;;  %v4367_v12 = vpop.eup %4366  ;;  %v3236_v18 = vmul.f32 1.442695, %v3173_v46 }
 0x54f   : > { %v2942_v13 = vadd.f32 %v2941_v44, %v2940_v3  ;;  %v2970_v5 = vrot.slane %v2969_v27, 4  ;;  %v2980_v3 = vadd.f32 %v2979_v49, %v2978_v15  ;;  %v2835_v44 = vmul.f32 %v4365_v8, %v5973_v26 }
 0x550   : > { %v2917_v22 = vadd.f32 %v2916_v35, %v2915_v11  ;;  %4368 = vpow2.f32 %v3202_v42  ;;  %v2937_v61 = vadd.f32 %v2936_v30, %v2935_v39  ;;  %v2930_v45 = vadd.f32 %v2929_v31, %v2928_v19 }
 0x551   : > { %v2943_v47 = vrot.slane %v2942_v13, 4  ;;  %v2971_v58 = vadd.f32 %v2970_v5, %v2969_v27  ;;  %v2981_v4 = vrot.slane %v2980_v3, 2  ;;  %4370 = vpow2.f32 %v3204_v34 }
 0x552   : > { %v2918_v40 = vrot.slane %v2917_v22, 2  ;;  %v2958_v26 = vsel %vm921_vm9, %v2835_v44, 0.0  ;;  %v2938_v56 = vrot.slane %v2937_v61, 1  ;;  %4372 = vpow2.f32 %v3234_v36 }
 0x553   : > { %v2944_v14 = vadd.f32 %v2943_v47, %v2942_v13  ;;  %v2972_v59 = vrot.slane %v2971_v58, 2  ;;  %v2982_v55 = vadd.f32 %v2981_v4, %v2980_v3  ;;  %v2994_v20 = vrot.slane %v6039_v32, 1 }
 0x554   : > { %v2919_v47 = vadd.f32 %v2918_v40, %v2917_v22  ;;  %v2939_v39 = vadd.f32 %v2938_v56, %v2937_v61  ;;  %v2996_v42 = vrot.slane %v6039_v32, 3  ;;  %4374 = vpow2.f32 %v3236_v18 }
 0x555   : > { %v2945_v33 = vrot.slane %v2944_v14, 2  ;;  %v3026_v30 = vmul.f32 %v2994_v20, %v2930_v45  ;;  %v2999_v34 = vrot.slane %v6039_v32, 6  ;;  %v3000_v4 = vrot.slane %v6039_v32, 7 }
 0x556   : > { %v4369_v11 = vpop.eup %4368  ;;  %v2998_v31 = vrot.slane %v6039_v32, 5 }
 0x557   : > { %v2946_v13 = vadd.f32 %v2945_v33, %v2944_v14  ;;  %v3467_v21 = vmul.f32 %v4369_v11, %v3342_v37  ;;  %v4371_v35 = vpop.eup %4370  ;;  %v2920_v14 = vrot.slane %v2919_v47, 1  ;;  %v3063_v40 = vrot.slane %v3026_v30, 7 }
 0x558   : > { %v4373_v8 = vpop.eup %4372 }
 0x559   : > { %v2947_v27 = vrot.slane %v2946_v13, 1  ;;  %v3548_v22 = vsel %vm921_vm9, %v3467_v21, 0.0  ;;  %v2921_v3 = vadd.f32 %v2920_v14, %v2919_v47  ;;  %v3483_v36 = vmul.f32 %v4373_v8, %v3446_v50 }
 0x55b   : > { %v2769_v7 = vpop.permute.xlu1 %2768  ;;  %v2948_v5 = vadd.f32 %v2947_v27, %v2946_v13  ;;  %v3025_v46 = vmul.f32 %v2921_v3, %v6039_v32  ;;  %v3620_v45 = vsel %vm921_vm9, %v3483_v36, 0.0 }
 0x55c   : > { %v2834_v51 = vmul.f32 %v4363_v53, %v2769_v7  ;;  %v2973_v53 = vadd.f32 %v2972_v59, %v2971_v58  ;;  %v2995_v7 = vrot.slane %v6039_v32, 2  ;;  %v3793_v59 = vld [vmem:[%s6103_s8] sm:$0xff] }
 0x55d   : > { %v3028_v19 = vmul.f32 %v2996_v42, %v2948_v5 }
 0x55e   : > { %v2950_v10 = vsel %vm921_vm9, %v2834_v51, 0.0  ;;  %v2974_v51 = vrot.slane %v2973_v53, 1  ;;  %v3027_v33 = vmul.f32 %v2995_v7, %v2939_v39 }
 0x55f   : > { %v2951_v1 = vadd.f32 %v2950_v10, %v2949_v62  ;;  %v2983_v62 = vrot.slane %v2982_v55, 1 }
 0x560   : > { %v2975_v44 = vadd.f32 %v2974_v51, %v2973_v53 }
 0x561   : > { %v2952_v41 = vrot.slane %v2951_v1, 4 }
 0x562   : > { %v3031_v37 = vmul.f32 %v2999_v34, %v2975_v44 }
 0x563   : > { %v2953_v2 = vadd.f32 %v2952_v41, %v2951_v1  ;;  %v2782_v28 = vpop.permute.xlu1 %2781  ;;  %v2997_v1 = vrot.slane %v6039_v32, 4 }
 0x564   : > { %v2836_v24 = vmul.f32 %v4367_v12, %v2782_v28  ;;  %v2984_v12 = vadd.f32 %v2983_v62, %v2982_v55  ;;  %v3794_v28 = vld [vmem:[%s6103_s8 + $0x8] sm:$0xff]  ;;  %v3073_v39 = vrot.slane %v3031_v37, 2  ;;  %v3079_v62 = vsel %vm921_vm9, %v5996_v29, 0.0  ;;  %v3790_v37 = vpop.permute.xlu2 %3789 }
 0x565   : > { %v2954_v9 = vrot.slane %v2953_v2, 2  ;;  %3817 = vmatpush.msra.mxu0 %v3794_v28 }
 0x566   : > { %v2959_v23 = vsel %vm921_vm9, %v2836_v24, 0.0  ;;  %v3065_v24 = vrot.slane %v3027_v33, 6 }
 0x567   : > { %v2955_v15 = vadd.f32 %v2954_v9, %v2953_v2  ;;  %v2960_v17 = vadd.f32 %v2959_v23, %v2958_v26  ;;  %v4375_v9 = vpop.eup %4374  ;;  %v3067_v26 = vrot.slane %v3028_v19, 5  ;;  %3818 = vmatpush.msra.mxu0 %v3793_v59 }
 0x569   : > { %v2956_v6 = vrot.slane %v2955_v15, 1  ;;  %v2961_v16 = vrot.slane %v2960_v17, 4 }
 0x56b   : > { %v2962_v49 = vadd.f32 %v2961_v16, %v2960_v17  ;;  %v3348_v54 = vpop.permute.xlu1 %3347  ;;  %v2957_v52 = vadd.f32 %v2956_v6, %v2955_v15  ;;  %v3032_v15 = vmul.f32 %v3000_v4, %v2984_v12  ;;  %v3064_v17 = vsel %vm1754_vm14, %v3063_v40, %v3025_v46  ;;  %v3734_v46 = vld [vmem:[#allocation1 + $0x7] ss:$9 sm:$0xff] }
 0x56c   : > { %v3468_v38 = vmul.f32 %v4371_v35, %v3348_v54  ;;  %v3066_v6 = vsel %vm1757_vm4, %v3065_v24, %v3064_v17 }
 0x56d   : > { %v2963_v10 = vrot.slane %v2962_v49, 2  ;;  %v3029_v61 = vmul.f32 %v2997_v1, %v2957_v52  ;;  %v3068_v32 = vsel %vm1760_vm15, %v3067_v26, %v3066_v6  ;;  %v3075_v14 = vrot.slane %v3032_v15, 1  ;;  %v4051_v15 = vld [vmem:[#allocation2] ss:$0 sm:$0xff] }
 0x56e   : > { %v3549_v58 = vsel %vm921_vm9, %v3468_v38, 0.0  ;;  %v3637_v52 = vrot.slane %v5637_v48, 7 }
 0x56f   : > { %v2964_v41 = vadd.f32 %v2963_v10, %v2962_v49  ;;  %v3550_v63 = vadd.f32 %v3549_v58, %v3548_v22  ;;  %v3069_v47 = vrot.slane %v3029_v61, 4 }
 0x571   : > { %v2965_v13 = vrot.slane %v2964_v41, 1  ;;  %v3551_v2 = vrot.slane %v3550_v63, 4  ;;  %v3070_v35 = vsel %vm1763_vm0, %v3069_v47, %v3068_v32 }
 0x573   : > { %v2966_v56 = vadd.f32 %v2965_v13, %v2964_v41  ;;  %v3552_v23 = vadd.f32 %v3551_v2, %v3550_v63  ;;  %v3452_v11 = vpop.permute.xlu1 %3451  ;;  %v3644_v41 = vrot.slane %v5568_v0, 7  ;;  %v4384_v13 = vld [vmem:[%s6102_s7] sm:$0x1] }
 0x574   : > { %v3484_v27 = vmul.f32 %v4375_v9, %v3452_v11  ;;  %v3092_v2 = vmul.f32 %v4384_v13, %v4845_v60  ;;  %v3736_v60 = vmul.f32 %v4384_v13, %v3734_v46 }
 0x575   : > { %v3030_v53 = vmul.f32 %v2998_v31, %v2966_v56  ;;  %v3553_v55 = vrot.slane %v3552_v23, 2 }
 0x576   : > { %v3621_v16 = vsel %vm921_vm9, %v3484_v27, 0.0 }
 0x577   : > { %v3071_v18 = vrot.slane %v3030_v53, 3  ;;  %v3554_v21 = vadd.f32 %v3553_v55, %v3552_v23  ;;  %v3622_v20 = vadd.f32 %v3621_v16, %v3620_v45 }
 0x579   : > { %v3072_v7 = vsel %vm1766_vm1, %v3071_v18, %v3070_v35  ;;  %v3555_v5 = vrot.slane %v3554_v21, 1  ;;  %v3623_v49 = vrot.slane %v3622_v20, 4 }
 0x57a   : > { %v3074_v54 = vsel %vm1769_vm6, %v3073_v39, %v3072_v7 }
 0x57b   : > { %v3076_v51 = vsel %vm1772_vm7, %v3075_v14, %v3074_v54  ;;  %v3556_v42 = vadd.f32 %v3555_v5, %v3554_v21  ;;  %v3624_v38 = vadd.f32 %v3623_v49, %v3622_v20 }
 0x57c   : > { %v3080_v30 = vsel %vm921_vm9, %v3076_v51, 0.0 }
 0x57d   : > { %v3081_v10 = vadd.f32 %v3080_v30, %v3079_v62  ;;  %v3668_v8 = vmul.f32 %v3637_v52, %v3556_v42  ;;  %v3625_v22 = vrot.slane %v3624_v38, 2 }
 0x57f   : > { %v3082_v33 = vrot.slane %v3081_v10, 4  ;;  %v3705_v1 = vrot.slane %v3668_v8, 1  ;;  %v3626_v58 = vadd.f32 %v3625_v22, %v3624_v38 }
 0x581   : > { %v3083_v3 = vadd.f32 %v3082_v33, %v3081_v10  ;;  %v3706_v50 = vsel %vm1772_vm7, %v3705_v1, %v5894_v25  ;;  %v3627_v19 = vrot.slane %v3626_v58, 1 }
 0x582   : > { %v3723_v25 = vsel %vm921_vm9, %v3706_v50, 0.0 }
 0x583   : > { %v3628_v48 = vadd.f32 %v3627_v19, %v3626_v58  ;;  %v3084_v63 = vrot.slane %v3083_v3, 2 }
 0x585   : > { %v3676_v34 = vmul.f32 %v3644_v41, %v3628_v48  ;;  %v3085_v44 = vadd.f32 %v3084_v63, %v3083_v3 }
 0x587   : > { %v3719_v29 = vrot.slane %v3676_v34, 1  ;;  %v3086_v61 = vrot.slane %v3085_v44, 1 }
 0x589   : > { %v3720_v12 = vsel %vm1772_vm7, %v3719_v29, %v5903_v43  ;;  %v3087_v40 = vadd.f32 %v3086_v61, %v3085_v44 }
 0x58a   : > { %v3724_v0 = vsel %vm921_vm9, %v3720_v12, 0.0 }
 0x58b   : > { %v3725_v28 = vadd.f32 %v3724_v0, %v3723_v25  ;;  %v3093_v59 = vadd.f32 %v3092_v2, %v3087_v40 }
 0x58d   : > { %v3726_v4 = vrot.slane %v3725_v28, 4  ;;  %v3742_v36 = vrot.slane %v3093_v59, 6 }
 0x58f   : > { %v3727_v24 = vadd.f32 %v3726_v4, %v3725_v28  ;;  %v3750_v43 = vsel %vm3749_vm3, %v5667_v57, %v3742_v36  ;;  %vm3823_vm3 = vcmask 3072  }
 0x591   : > { %v3728_v31 = vrot.slane %v3727_v24, 2 }
 0x593   : > { %v3729_v9 = vadd.f32 %v3728_v31, %v3727_v24 }
 0x595   : > { %v3730_v26 = vrot.slane %v3729_v9, 1 }
 0x597   : > { %v3731_v56 = vadd.f32 %v3730_v26, %v3729_v9 }
 0x599   : > { %v3737_v23 = vadd.f32 %v3736_v60, %v3731_v56 }
 0x59b   : > { %v3745_v11 = vrot.slane %v3737_v23, 5 }
 0x59d   : > { %v3752_v47 = vsel %vm3751_vm2, %v3750_v43, %v3745_v11 }
 0x59e   : > { %v3792_v27 = vmul.f32 %v3790_v37, %v3752_v47 }
 0x5a0   : > { %3944 = vmatmul.msk.f32.vlgmr.msra.gmra.mxu0 %vm921_vm9, %v3792_v27 }
 0x61d   : > { %v3820_v57 = vpop.f32.mrf.mxu0 }
 0x61e   : > { %v3821_v17 = vadd.f32 %v4051_v15, %v3820_v57 }
 0x620   : > { %3824 = vst.msk [vmem:[%s415_s29] sm:$0xf] %vm3823_vm3, %v3821_v17 }
 0x621 PF: > { %s24_s23 = sadd.s32 1, %s4391_s23  }
 0x622   : > { %p21_p5 = scmp.ge.s32.totalorder %s24_s23, 4  }
 0x624   :  { %23 = sbr.rel (!%p21_p5) target bundleno = 3 (0x3), region = 102 }

</bundles_post_ra>
